<compile_context>
chip_gen: v5e
topology: v5e:2x2
jax: 0.10.0
libtpu: 0.0.40
codegen_flags: <defaults>
</compile_context>

<pallas_src>
import math

import jax
import jax.numpy as jnp
from jax.experimental import pallas as pl
from jax.experimental.pallas import tpu as pltpu

# ----------------------------- config (small) --------------------------------
DIM = 128          # cfg.MAC.DIM
MAX_STEP = 4       # cfg.MAC.MAX_STEPS
WORDVEC = 64       # cfg.WORD_EMB.EMB_DIM
VOCAB = 78
CLASSES = 21
OUT_PAD = 128      # lane-dense padded classifier width (sliced to CLASSES)
RESNET_FEAT = 2048
B = 2              # batch
SEQ = 8            # question length (max)
FRAMES = 8         # knowledge-base size K


# ------------------------------ Pallas kernel ---------------------------------
def mac_fused_kernel(
    img_ref, q_ref, ctx_ref,
    w_res_ref, b_res_ref,
    w_ci_ref, b_ci_ref,
    w_cu_ref, b_cu_ref,
    w_cattn_ref, b_cattn_ref,
    w_kproj_ref, b_kproj_ref,
    w_mproj_ref, b_mproj_ref,
    w_cat_i_ref, w_cat_k_ref, b_cat_ref,
    w_cat2_ref, b_cat2_ref,
    w_rattn_ref, b_rattn_ref,
    w_wr_m_ref, w_wr_i_ref, b_wr_ref,
    mem0_ref,
    w_qproj_ref, b_qproj_ref,
    w_cls1_m_ref, w_cls1_q_ref, b_cls1_ref,
    w_cls2_ref, b_cls2_ref,
    out_ref,
):
    q = q_ref[...]          # (B, D)  f32
    ctx = ctx_ref[...]      # (B, T, D) f32
    Bb, T, D = ctx.shape

    def mxu(x, w):          # bf16 x bf16 -> f32 accumulate on the MXU
        return jnp.dot(x.astype(jnp.bfloat16), w,
                       preferred_element_type=jnp.float32)

    def mxu3(x3, w):        # (B, N, Din) @ (Din, Dout) -> (B, N, Dout)
        b_, n_, d_ = x3.shape
        y = jnp.dot(x3.reshape(b_ * n_, d_).astype(jnp.bfloat16), w,
                    preferred_element_type=jnp.float32)
        return y.reshape(b_, n_, w.shape[1])

    def elu(x):             # nn.ELU, alpha=1 (exp lands on the EUP slot)
        return jnp.where(x > 0, x, jnp.exp(x) - 1.0)

    def softmax1(x):        # softmax over axis 1; reciprocal on EUP, not VALU
        m = jnp.max(x, axis=1, keepdims=True)
        e = jnp.exp(x - m)
        return e * pl.reciprocal(jnp.sum(e, axis=1, keepdims=True), approx=True)

    # ---- InputUnit.res_proj (fused): knowledge base (B, K, D) ----
    know2 = (jnp.dot(img_ref[...], w_res_ref[...],
                     preferred_element_type=jnp.float32) + b_res_ref[...])
    K = know2.shape[0] // Bb
    know = know2.reshape(Bb, K, D)

    # ---- ControlUnit: independent of memory/previous control (per mac_v2.py),
    #      so compute all step controls up-front with one wide matmul.
    num_steps = w_cu_ref.shape[1] // D
    q_ci = jnp.tanh(mxu(q, w_ci_ref[...]) + b_ci_ref[...])            # (B, D)
    qs_all = mxu(q_ci, w_cu_ref[...]) + b_cu_ref[...]                 # (B, S*D)
    ctx_w = ctx * w_cattn_ref[...][None, :, :]                        # (B, T, D)
    b_cattn = b_cattn_ref[...]                                        # (1, 1)
    controls = []
    for s in range(num_steps):                                        # static, outside recurrence
        qs_s = qs_all[:, s * D:(s + 1) * D]                           # lane-aligned slice
        logits = jnp.sum(qs_s[:, None, :] * ctx_w, axis=-1) + b_cattn  # (B, T)
        attn = softmax1(logits)
        controls.append(jnp.sum(attn[:, :, None] * ctx, axis=1))      # (B, D)

    # ---- ReadUnit loop-invariants (know never changes across steps) ----
    know_proj = mxu3(know, w_kproj_ref[...]) + b_kproj_ref[...]       # (B, K, D)
    kp_cat = mxu3(know_proj, w_cat_k_ref[...]) + b_cat_ref[...]       # (B, K, D)

    # ---- serial Read/Write recurrence (the only true dependency chain) ----
    memory = jnp.broadcast_to(mem0_ref[...], (Bb, D))                 # initial_memory
    w_rattn = w_rattn_ref[...]                                        # (1, D)
    b_rattn = b_rattn_ref[...]                                        # (1, 1)
    for s in range(num_steps):
        # ReadUnit
        mem_proj = mxu(memory, w_mproj_ref[...]) + b_mproj_ref[...]   # (B, D)
        inter = know_proj * mem_proj[:, None, :]                      # (B, K, D)
        # cat([inter, know_proj], -1) @ W_concat == inter@Wa + (know_proj@Wb + b) [hoisted]
        x = mxu3(inter, w_cat_i_ref[...]) + kp_cat
        x = elu(x)
        x = mxu3(x, w_cat2_ref[...]) + b_cat2_ref[...]
        x = elu(x * controls[s][:, None, :])
        r_logits = jnp.sum(x * w_rattn[None, :, :], axis=-1) + b_rattn  # (B, K)
        r_attn = softmax1(r_logits)
        read = jnp.sum(r_attn[:, :, None] * know, axis=1)             # (B, D)
        # WriteUnit: linear(cat([memory, read], -1))
        memory = (mxu(memory, w_wr_m_ref[...]) + mxu(read, w_wr_i_ref[...])
                  + b_wr_ref[...])

    # ---- OutputUnit ----
    q_proj = mxu(q, w_qproj_ref[...]) + b_qproj_ref[...]
    h = elu(mxu(memory, w_cls1_m_ref[...]) + mxu(q_proj, w_cls1_q_ref[...])
            + b_cls1_ref[...])
    out_ref[...] = mxu(h, w_cls2_ref[...]) + b_cls2_ref[...]          # (B, 128) lane-dense


# --------------------------- plain-JAX glue ----------------------------------
def run_lstm_dir(x, lens, w_ih, w_hh, b, reverse):
    """One direction of a PyTorch-semantics LSTM with length masking
    (reproduces pack_padded_sequence behaviour: final hidden = state at len-1
    for forward / at t=0 for backward; padded outputs are zero)."""
    Bb, T, _ = x.shape
    H = w_hh.shape[0]
    xt_seq = jnp.moveaxis(x, 1, 0)          # (T, B, E)
    ts = jnp.arange(T)
    if reverse:
        xt_seq = xt_seq[::-1]
        ts = ts[::-1]

    def step(carry, inp):
        h, c = carry
        xt, t = inp
        gates = xt @ w_ih + h @ w_hh + b    # gate order: i, f, g, o
        i, f, g, o = jnp.split(gates, 4, axis=-1)
        i = jax.nn.sigmoid(i)
        f = jax.nn.sigmoid(f)
        g = jnp.tanh(g)
        o = jax.nn.sigmoid(o)
        c_new = f * c + i * g
        h_new = o * jnp.tanh(c_new)
        valid = (t < lens)[:, None]
        h2 = jnp.where(valid, h_new, h)
        c2 = jnp.where(valid, c_new, c)
        out = jnp.where(valid, h_new, 0.0)
        return (h2, c2), out

    init = (jnp.zeros((Bb, H), jnp.float32), jnp.zeros((Bb, H), jnp.float32))
    (h_final, _), outs = jax.lax.scan(step, init, (xt_seq, ts))
    if reverse:
        outs = outs[::-1]
    return jnp.moveaxis(outs, 0, 1), h_final    # (B, T, H), (B, H)


def make_params(key, dim, wordvec, vocab, max_step, classes, resnet_feat):
    keys = iter(jax.random.split(key, 64))

    def xavier(shape_out_in):
        # torch xavier_uniform_ on a weight of shape (out, in); stored transposed (in, out).
        out_f, in_f = shape_out_in
        bound = math.sqrt(6.0 / (in_f + out_f))
        w = jax.random.uniform(next(keys), (out_f, in_f), jnp.float32, -bound, bound)
        return jnp.transpose(w)

    H = dim // 2
    p = {}
    # InputUnit
    p["res_w"] = xavier((dim, resnet_feat))
    p["res_b"] = jnp.zeros((1, dim), jnp.float32)
    p["embed"] = jax.random.uniform(next(keys), (vocab, wordvec), jnp.float32, -1.0, 1.0)
    p["w_ih_f"] = xavier((4 * H, wordvec))
    p["w_hh_f"] = xavier((4 * H, H))
    p["b_f"] = jnp.zeros((4 * H,), jnp.float32)
    p["w_ih_b"] = xavier((4 * H, wordvec))
    p["w_hh_b"] = xavier((4 * H, H))
    p["b_b"] = jnp.zeros((4 * H,), jnp.float32)
    # ControlUnit
    p["w_ci"] = xavier((dim, dim))
    p["b_ci"] = jnp.zeros((1, dim), jnp.float32)
    p["w_cu"] = jnp.stack([xavier((dim, dim)) for _ in range(max_step)], 0)
    p["b_cu"] = jnp.zeros((max_step, 1, dim), jnp.float32)
    p["w_cattn"] = jnp.transpose(xavier((1, dim)))   # stored (1, dim) row
    p["b_cattn"] = jnp.zeros((1, 1), jnp.float32)
    # ReadUnit
    p["w_kproj"] = xavier((dim, dim))
    p["b_kproj"] = jnp.zeros((1, dim), jnp.float32)
    p["w_mproj"] = xavier((dim, dim))
    p["b_mproj"] = jnp.zeros((1, dim), jnp.float32)
    w_cat = xavier((dim, 2 * dim))                   # (2*dim, dim)
    p["w_cat_i"], p["w_cat_k"] = w_cat[:dim], w_cat[dim:]
    p["b_cat"] = jnp.zeros((1, dim), jnp.float32)
    p["w_cat2"] = xavier((dim, dim))
    p["b_cat2"] = jnp.zeros((1, dim), jnp.float32)
    p["w_rattn"] = jnp.transpose(xavier((1, dim)))
    p["b_rattn"] = jnp.zeros((1, 1), jnp.float32)
    # WriteUnit
    w_wr = xavier((dim, 2 * dim))
    p["w_wr_m"], p["w_wr_i"] = w_wr[:dim], w_wr[dim:]
    p["b_wr"] = jnp.zeros((1, dim), jnp.float32)
    # MACUnit initial memory (normal init)
    p["mem0"] = jax.random.normal(next(keys), (1, dim), jnp.float32)
    # OutputUnit
    p["w_qproj"] = xavier((dim, dim))
    p["b_qproj"] = jnp.zeros((1, dim), jnp.float32)
    w_cls1 = xavier((dim, 2 * dim))
    p["w_cls1_m"], p["w_cls1_q"] = w_cls1[:dim], w_cls1[dim:]
    p["b_cls1"] = jnp.zeros((1, dim), jnp.float32)
    p["w_cls2"] = xavier((classes, dim))
    p["b_cls2"] = jnp.zeros((1, classes), jnp.float32)
    return p


def mac_network_forward(params, image, question, question_len):
    Bb, F, RF = image.shape
    dim = DIM
    T = question.shape[1]

    # ---- InputUnit: embedding + bidirectional LSTM (plain JAX glue) ----
    embed = params["embed"][question]                       # (B, T, wordvec)
    out_f, h_f = run_lstm_dir(embed, question_len, params["w_ih_f"],
                              params["w_hh_f"], params["b_f"], reverse=False)
    out_b, h_b = run_lstm_dir(embed, question_len, params["w_ih_b"],
                              params["w_hh_b"], params["b_b"], reverse=True)
    contextual_words = jnp.concatenate([out_f, out_b], -1)  # (B, T, dim) f32
    question_embedding = jnp.concatenate([h_f, h_b], -1)    # (B, dim)    f32

    # ---- one-time kernel-input prep (outside the kernel) ----
    bf = lambda a: a.astype(jnp.bfloat16)
    img2 = bf(image.reshape(Bb * F, RF))                    # bf16: half the DMA
    w_cu_cat = jnp.concatenate([params["w_cu"][s] for s in range(MAX_STEP)], axis=1)
    b_cu_cat = jnp.concatenate([params["b_cu"][s] for s in range(MAX_STEP)], axis=1)
    w_cls2_pad = jnp.pad(params["w_cls2"], ((0, 0), (0, OUT_PAD - CLASSES)))
    b_cls2_pad = jnp.pad(params["b_cls2"], ((0, 0), (0, OUT_PAD - CLASSES)))

    kernel_args = [
        img2, question_embedding, contextual_words,
        bf(params["res_w"]), params["res_b"],
        bf(params["w_ci"]), params["b_ci"],
        bf(w_cu_cat), b_cu_cat,
        params["w_cattn"], params["b_cattn"],
        bf(params["w_kproj"]), params["b_kproj"],
        bf(params["w_mproj"]), params["b_mproj"],
        bf(params["w_cat_i"]), bf(params["w_cat_k"]), params["b_cat"],
        bf(params["w_cat2"]), params["b_cat2"],
        params["w_rattn"], params["b_rattn"],
        bf(params["w_wr_m"]), bf(params["w_wr_i"]), params["b_wr"],
        params["mem0"],
        bf(params["w_qproj"]), params["b_qproj"],
        bf(params["w_cls1_m"]), bf(params["w_cls1_q"]), params["b_cls1"],
        bf(w_cls2_pad), b_cls2_pad,
    ]

    # advisory cost hint so XLA schedules the custom call vs. the LSTM scan
    S = MAX_STEP
    flops = (
        2 * Bb * F * RF * dim                              # res_proj
        + 2 * Bb * dim * dim                               # control_input
        + 2 * Bb * dim * S * dim                           # batched w_cu
        + 2 * Bb * F * dim * dim * 2                       # kproj + hoisted w_cat_k
        + S * (2 * Bb * dim * dim * 3                      # mproj + write(m,i)
               + 2 * Bb * F * dim * dim * 2)               # w_cat_i + concat_2
        + 2 * Bb * dim * dim * 3                           # qproj + cls1(m,q)
        + 2 * Bb * dim * OUT_PAD                           # cls2
    )
    transcendentals = Bb * dim + S * Bb * (T + F) + S * Bb * F * dim + Bb * dim
    bytes_accessed = (sum(int(a.size) * a.dtype.itemsize for a in kernel_args)
                      + Bb * OUT_PAD * 4)

    # ---- fused res_proj + MAC (4 steps) + OutputUnit : single Pallas kernel ----
    out_pad = pl.pallas_call(
        mac_fused_kernel,
        out_shape=jax.ShapeDtypeStruct((Bb, OUT_PAD), jnp.float32),
        in_specs=[pl.BlockSpec(memory_space=pltpu.MemorySpace.VMEM)] * len(kernel_args),
        out_specs=pl.BlockSpec(memory_space=pltpu.MemorySpace.VMEM),
        cost_estimate=pl.CostEstimate(
            flops=int(flops),
            transcendentals=int(transcendentals),
            bytes_accessed=int(bytes_accessed)),
    )(*kernel_args)
    return out_pad[:, :CLASSES]


if __name__ == "__main__":
    key = jax.random.PRNGKey(0)
    k_params, k_img, k_q = jax.random.split(key, 3)

    params = make_params(k_params, DIM, WORDVEC, VOCAB, MAX_STEP, CLASSES, RESNET_FEAT)

    image = jax.random.normal(k_img, (B, FRAMES, RESNET_FEAT), jnp.float32)
    question = jax.random.randint(k_q, (B, SEQ), 0, VOCAB, dtype=jnp.int32)
    question_len = jnp.array([SEQ, SEQ - 2], dtype=jnp.int32)

    out = mac_network_forward(params, image, question, question_len)
    out = jax.block_until_ready(out)
    assert out.shape == (B, CLASSES)
    assert bool(jnp.all(jnp.isfinite(out)))
    print("KERNEL_OK")
</pallas_src>

<mosaic_0001>
module attributes {stable_mosaic.version = 11 : i64} {
  func.func @mac_fused_kernel(%arg0: memref<16x2048xbf16, #tpu.memory_space<vmem>>, %arg1: memref<2x128xf32, #tpu.memory_space<vmem>>, %arg2: memref<2x8x128xf32, #tpu.memory_space<vmem>>, %arg3: memref<2048x128xbf16, #tpu.memory_space<vmem>>, %arg4: memref<1x128xf32, #tpu.memory_space<vmem>>, %arg5: memref<128x128xbf16, #tpu.memory_space<vmem>>, %arg6: memref<1x128xf32, #tpu.memory_space<vmem>>, %arg7: memref<128x512xbf16, #tpu.memory_space<vmem>>, %arg8: memref<1x512xf32, #tpu.memory_space<vmem>>, %arg9: memref<1x128xf32, #tpu.memory_space<vmem>>, %arg10: memref<1x1xf32, #tpu.memory_space<vmem>>, %arg11: memref<128x128xbf16, #tpu.memory_space<vmem>>, %arg12: memref<1x128xf32, #tpu.memory_space<vmem>>, %arg13: memref<128x128xbf16, #tpu.memory_space<vmem>>, %arg14: memref<1x128xf32, #tpu.memory_space<vmem>>, %arg15: memref<128x128xbf16, #tpu.memory_space<vmem>>, %arg16: memref<128x128xbf16, #tpu.memory_space<vmem>>, %arg17: memref<1x128xf32, #tpu.memory_space<vmem>>, %arg18: memref<128x128xbf16, #tpu.memory_space<vmem>>, %arg19: memref<1x128xf32, #tpu.memory_space<vmem>>, %arg20: memref<1x128xf32, #tpu.memory_space<vmem>>, %arg21: memref<1x1xf32, #tpu.memory_space<vmem>>, %arg22: memref<128x128xbf16, #tpu.memory_space<vmem>>, %arg23: memref<128x128xbf16, #tpu.memory_space<vmem>>, %arg24: memref<1x128xf32, #tpu.memory_space<vmem>>, %arg25: memref<1x128xf32, #tpu.memory_space<vmem>>, %arg26: memref<128x128xbf16, #tpu.memory_space<vmem>>, %arg27: memref<1x128xf32, #tpu.memory_space<vmem>>, %arg28: memref<128x128xbf16, #tpu.memory_space<vmem>>, %arg29: memref<128x128xbf16, #tpu.memory_space<vmem>>, %arg30: memref<1x128xf32, #tpu.memory_space<vmem>>, %arg31: memref<128x128xbf16, #tpu.memory_space<vmem>>, %arg32: memref<1x128xf32, #tpu.memory_space<vmem>>, %arg33: memref<2x128xf32, #tpu.memory_space<vmem>>) attributes {dimension_semantics = [], scalar_prefetch = 0 : i64, scratch_operands = 0 : i64, tpu.core_type = #tpu.core_type<tc>} {
    %c0 = arith.constant 0 : index
    %c0_0 = arith.constant 0 : index
    %0 = vector.load %arg1[%c0, %c0_0] : memref<2x128xf32, #tpu.memory_space<vmem>>, vector<2x128xf32>
    %c0_1 = arith.constant 0 : index
    %c0_2 = arith.constant 0 : index
    %c0_3 = arith.constant 0 : index
    %1 = vector.load %arg2[%c0_1, %c0_2, %c0_3] : memref<2x8x128xf32, #tpu.memory_space<vmem>>, vector<2x8x128xf32>
    %c0_4 = arith.constant 0 : index
    %c0_5 = arith.constant 0 : index
    %2 = vector.load %arg0[%c0_4, %c0_5] : memref<16x2048xbf16, #tpu.memory_space<vmem>>, vector<16x2048xbf16>
    %c0_6 = arith.constant 0 : index
    %c0_7 = arith.constant 0 : index
    %3 = vector.load %arg3[%c0_6, %c0_7] : memref<2048x128xbf16, #tpu.memory_space<vmem>>, vector<2048x128xbf16>
    %cst = arith.constant dense<0.000000e+00> : vector<16x128xf32>
    %4 = tpu.matmul %2, %3, %cst {dimension_numbers = #tpu.dot_dimension_numbers<[1], [0], [0], [1], [0, 0, 1, 1], [], []>} : vector<16x2048xbf16>, vector<2048x128xbf16>, vector<16x128xf32> -> vector<16x128xf32>
    %c0_8 = arith.constant 0 : index
    %c0_9 = arith.constant 0 : index
    %5 = vector.load %arg4[%c0_8, %c0_9] : memref<1x128xf32, #tpu.memory_space<vmem>>, vector<1x128xf32>
    %6 = vector.broadcast %5 : vector<1x128xf32> to vector<16x128xf32>
    %7 = arith.addf %4, %6 : vector<16x128xf32>
    %8 = vector.shape_cast %7 : vector<16x128xf32> to vector<2x8x128xf32>
    %c0_10 = arith.constant 0 : index
    %c0_11 = arith.constant 0 : index
    %9 = vector.load %arg5[%c0_10, %c0_11] : memref<128x128xbf16, #tpu.memory_space<vmem>>, vector<128x128xbf16>
    %10 = arith.truncf %0 : vector<2x128xf32> to vector<2x128xbf16>
    %cst_12 = arith.constant dense<0.000000e+00> : vector<2x128xf32>
    %11 = tpu.matmul %10, %9, %cst_12 {dimension_numbers = #tpu.dot_dimension_numbers<[1], [0], [0], [1], [0, 0, 1, 1], [], []>} : vector<2x128xbf16>, vector<128x128xbf16>, vector<2x128xf32> -> vector<2x128xf32>
    %c0_13 = arith.constant 0 : index
    %c0_14 = arith.constant 0 : index
    %12 = vector.load %arg6[%c0_13, %c0_14] : memref<1x128xf32, #tpu.memory_space<vmem>>, vector<1x128xf32>
    %13 = vector.broadcast %12 : vector<1x128xf32> to vector<2x128xf32>
    %14 = arith.addf %11, %13 : vector<2x128xf32>
    %15 = math.tanh %14 : vector<2x128xf32>
    %c0_15 = arith.constant 0 : index
    %c0_16 = arith.constant 0 : index
    %16 = vector.load %arg7[%c0_15, %c0_16] : memref<128x512xbf16, #tpu.memory_space<vmem>>, vector<128x512xbf16>
    %17 = arith.truncf %15 : vector<2x128xf32> to vector<2x128xbf16>
    %cst_17 = arith.constant dense<0.000000e+00> : vector<2x512xf32>
    %18 = tpu.matmul %17, %16, %cst_17 {dimension_numbers = #tpu.dot_dimension_numbers<[1], [0], [0], [1], [0, 0, 1, 1], [], []>} : vector<2x128xbf16>, vector<128x512xbf16>, vector<2x512xf32> -> vector<2x512xf32>
    %c0_18 = arith.constant 0 : index
    %c0_19 = arith.constant 0 : index
    %19 = vector.load %arg8[%c0_18, %c0_19] : memref<1x512xf32, #tpu.memory_space<vmem>>, vector<1x512xf32>
    %20 = vector.broadcast %19 : vector<1x512xf32> to vector<2x512xf32>
    %21 = arith.addf %18, %20 : vector<2x512xf32>
    %c0_20 = arith.constant 0 : index
    %c0_21 = arith.constant 0 : index
    %22 = vector.load %arg9[%c0_20, %c0_21] : memref<1x128xf32, #tpu.memory_space<vmem>>, vector<1x128xf32>
    %23 = vector.shape_cast %22 : vector<1x128xf32> to vector<1x1x128xf32>
    %24 = vector.broadcast %23 : vector<1x1x128xf32> to vector<2x8x128xf32>
    %25 = arith.mulf %1, %24 : vector<2x8x128xf32>
    %c0_22 = arith.constant 0 : index
    %c0_23 = arith.constant 0 : index
    %26 = vector.load %arg10[%c0_22, %c0_23] : memref<1x1xf32, #tpu.memory_space<vmem>>, vector<1x1xf32>
    %27 = vector.extract_strided_slice %21 {offsets = [0, 0], sizes = [2, 128], strides = [1, 1]} : vector<2x512xf32> to vector<2x128xf32>
    %28 = vector.shape_cast %27 : vector<2x128xf32> to vector<2x1x128xf32>
    %29 = vector.broadcast %28 : vector<2x1x128xf32> to vector<2x8x128xf32>
    %30 = arith.mulf %29, %25 : vector<2x8x128xf32>
    %cst_24 = arith.constant dense<0.000000e+00> : vector<2x8xf32>
    %31 = vector.multi_reduction <add>, %30, %cst_24 [2] : vector<2x8x128xf32> to vector<2x8xf32>
    %32 = vector.broadcast %26 : vector<1x1xf32> to vector<2x8xf32>
    %33 = arith.addf %31, %32 : vector<2x8xf32>
    %cst_25 = arith.constant dense<0xFF800000> : vector<2xf32>
    %34 = vector.multi_reduction <maximumf>, %33, %cst_25 [1] : vector<2x8xf32> to vector<2xf32>
    %35 = vector.shape_cast %34 : vector<2xf32> to vector<2x1xf32>
    %36 = vector.broadcast %35 : vector<2x1xf32> to vector<2x8xf32>
    %37 = arith.subf %33, %36 : vector<2x8xf32>
    %38 = math.exp %37 : vector<2x8xf32>
    %cst_26 = arith.constant dense<0.000000e+00> : vector<2xf32>
    %39 = vector.multi_reduction <add>, %38, %cst_26 [1] : vector<2x8xf32> to vector<2xf32>
    %40 = vector.shape_cast %39 : vector<2xf32> to vector<2x1xf32>
    %41 = tpu.reciprocal %40 {approx = true} : vector<2x1xf32> -> vector<2x1xf32>
    %42 = vector.broadcast %41 : vector<2x1xf32> to vector<2x8xf32>
    %43 = arith.mulf %38, %42 : vector<2x8xf32>
    %44 = vector.shape_cast %43 : vector<2x8xf32> to vector<2x8x1xf32>
    %45 = vector.broadcast %44 : vector<2x8x1xf32> to vector<2x8x128xf32>
    %46 = arith.mulf %45, %1 : vector<2x8x128xf32>
    %cst_27 = arith.constant dense<0.000000e+00> : vector<2x128xf32>
    %47 = vector.multi_reduction <add>, %46, %cst_27 [1] : vector<2x8x128xf32> to vector<2x128xf32>
    %48 = vector.extract_strided_slice %21 {offsets = [0, 128], sizes = [2, 128], strides = [1, 1]} : vector<2x512xf32> to vector<2x128xf32>
    %49 = vector.shape_cast %48 : vector<2x128xf32> to vector<2x1x128xf32>
    %50 = vector.broadcast %49 : vector<2x1x128xf32> to vector<2x8x128xf32>
    %51 = arith.mulf %50, %25 : vector<2x8x128xf32>
    %cst_28 = arith.constant dense<0.000000e+00> : vector<2x8xf32>
    %52 = vector.multi_reduction <add>, %51, %cst_28 [2] : vector<2x8x128xf32> to vector<2x8xf32>
    %53 = vector.broadcast %26 : vector<1x1xf32> to vector<2x8xf32>
    %54 = arith.addf %52, %53 : vector<2x8xf32>
    %cst_29 = arith.constant dense<0xFF800000> : vector<2xf32>
    %55 = vector.multi_reduction <maximumf>, %54, %cst_29 [1] : vector<2x8xf32> to vector<2xf32>
    %56 = vector.shape_cast %55 : vector<2xf32> to vector<2x1xf32>
    %57 = vector.broadcast %56 : vector<2x1xf32> to vector<2x8xf32>
    %58 = arith.subf %54, %57 : vector<2x8xf32>
    %59 = math.exp %58 : vector<2x8xf32>
    %cst_30 = arith.constant dense<0.000000e+00> : vector<2xf32>
    %60 = vector.multi_reduction <add>, %59, %cst_30 [1] : vector<2x8xf32> to vector<2xf32>
    %61 = vector.shape_cast %60 : vector<2xf32> to vector<2x1xf32>
    %62 = tpu.reciprocal %61 {approx = true} : vector<2x1xf32> -> vector<2x1xf32>
    %63 = vector.broadcast %62 : vector<2x1xf32> to vector<2x8xf32>
    %64 = arith.mulf %59, %63 : vector<2x8xf32>
    %65 = vector.shape_cast %64 : vector<2x8xf32> to vector<2x8x1xf32>
    %66 = vector.broadcast %65 : vector<2x8x1xf32> to vector<2x8x128xf32>
    %67 = arith.mulf %66, %1 : vector<2x8x128xf32>
    %cst_31 = arith.constant dense<0.000000e+00> : vector<2x128xf32>
    %68 = vector.multi_reduction <add>, %67, %cst_31 [1] : vector<2x8x128xf32> to vector<2x128xf32>
    %69 = vector.extract_strided_slice %21 {offsets = [0, 256], sizes = [2, 128], strides = [1, 1]} : vector<2x512xf32> to vector<2x128xf32>
    %70 = vector.shape_cast %69 : vector<2x128xf32> to vector<2x1x128xf32>
    %71 = vector.broadcast %70 : vector<2x1x128xf32> to vector<2x8x128xf32>
    %72 = arith.mulf %71, %25 : vector<2x8x128xf32>
    %cst_32 = arith.constant dense<0.000000e+00> : vector<2x8xf32>
    %73 = vector.multi_reduction <add>, %72, %cst_32 [2] : vector<2x8x128xf32> to vector<2x8xf32>
    %74 = vector.broadcast %26 : vector<1x1xf32> to vector<2x8xf32>
    %75 = arith.addf %73, %74 : vector<2x8xf32>
    %cst_33 = arith.constant dense<0xFF800000> : vector<2xf32>
    %76 = vector.multi_reduction <maximumf>, %75, %cst_33 [1] : vector<2x8xf32> to vector<2xf32>
    %77 = vector.shape_cast %76 : vector<2xf32> to vector<2x1xf32>
    %78 = vector.broadcast %77 : vector<2x1xf32> to vector<2x8xf32>
    %79 = arith.subf %75, %78 : vector<2x8xf32>
    %80 = math.exp %79 : vector<2x8xf32>
    %cst_34 = arith.constant dense<0.000000e+00> : vector<2xf32>
    %81 = vector.multi_reduction <add>, %80, %cst_34 [1] : vector<2x8xf32> to vector<2xf32>
    %82 = vector.shape_cast %81 : vector<2xf32> to vector<2x1xf32>
    %83 = tpu.reciprocal %82 {approx = true} : vector<2x1xf32> -> vector<2x1xf32>
    %84 = vector.broadcast %83 : vector<2x1xf32> to vector<2x8xf32>
    %85 = arith.mulf %80, %84 : vector<2x8xf32>
    %86 = vector.shape_cast %85 : vector<2x8xf32> to vector<2x8x1xf32>
    %87 = vector.broadcast %86 : vector<2x8x1xf32> to vector<2x8x128xf32>
    %88 = arith.mulf %87, %1 : vector<2x8x128xf32>
    %cst_35 = arith.constant dense<0.000000e+00> : vector<2x128xf32>
    %89 = vector.multi_reduction <add>, %88, %cst_35 [1] : vector<2x8x128xf32> to vector<2x128xf32>
    %90 = vector.extract_strided_slice %21 {offsets = [0, 384], sizes = [2, 128], strides = [1, 1]} : vector<2x512xf32> to vector<2x128xf32>
    %91 = vector.shape_cast %90 : vector<2x128xf32> to vector<2x1x128xf32>
    %92 = vector.broadcast %91 : vector<2x1x128xf32> to vector<2x8x128xf32>
    %93 = arith.mulf %92, %25 : vector<2x8x128xf32>
    %cst_36 = arith.constant dense<0.000000e+00> : vector<2x8xf32>
    %94 = vector.multi_reduction <add>, %93, %cst_36 [2] : vector<2x8x128xf32> to vector<2x8xf32>
    %95 = vector.broadcast %26 : vector<1x1xf32> to vector<2x8xf32>
    %96 = arith.addf %94, %95 : vector<2x8xf32>
    %cst_37 = arith.constant dense<0xFF800000> : vector<2xf32>
    %97 = vector.multi_reduction <maximumf>, %96, %cst_37 [1] : vector<2x8xf32> to vector<2xf32>
    %98 = vector.shape_cast %97 : vector<2xf32> to vector<2x1xf32>
    %99 = vector.broadcast %98 : vector<2x1xf32> to vector<2x8xf32>
    %100 = arith.subf %96, %99 : vector<2x8xf32>
    %101 = math.exp %100 : vector<2x8xf32>
    %cst_38 = arith.constant dense<0.000000e+00> : vector<2xf32>
    %102 = vector.multi_reduction <add>, %101, %cst_38 [1] : vector<2x8xf32> to vector<2xf32>
    %103 = vector.shape_cast %102 : vector<2xf32> to vector<2x1xf32>
    %104 = tpu.reciprocal %103 {approx = true} : vector<2x1xf32> -> vector<2x1xf32>
    %105 = vector.broadcast %104 : vector<2x1xf32> to vector<2x8xf32>
    %106 = arith.mulf %101, %105 : vector<2x8xf32>
    %107 = vector.shape_cast %106 : vector<2x8xf32> to vector<2x8x1xf32>
    %108 = vector.broadcast %107 : vector<2x8x1xf32> to vector<2x8x128xf32>
    %109 = arith.mulf %108, %1 : vector<2x8x128xf32>
    %cst_39 = arith.constant dense<0.000000e+00> : vector<2x128xf32>
    %110 = vector.multi_reduction <add>, %109, %cst_39 [1] : vector<2x8x128xf32> to vector<2x128xf32>
    %c0_40 = arith.constant 0 : index
    %c0_41 = arith.constant 0 : index
    %111 = vector.load %arg11[%c0_40, %c0_41] : memref<128x128xbf16, #tpu.memory_space<vmem>>, vector<128x128xbf16>
    %112 = vector.shape_cast %8 : vector<2x8x128xf32> to vector<16x128xf32>
    %113 = arith.truncf %112 : vector<16x128xf32> to vector<16x128xbf16>
    %cst_42 = arith.constant dense<0.000000e+00> : vector<16x128xf32>
    %114 = tpu.matmul %113, %111, %cst_42 {dimension_numbers = #tpu.dot_dimension_numbers<[1], [0], [0], [1], [0, 0, 1, 1], [], []>} : vector<16x128xbf16>, vector<128x128xbf16>, vector<16x128xf32> -> vector<16x128xf32>
    %115 = vector.shape_cast %114 : vector<16x128xf32> to vector<2x8x128xf32>
    %c0_43 = arith.constant 0 : index
    %c0_44 = arith.constant 0 : index
    %116 = vector.load %arg12[%c0_43, %c0_44] : memref<1x128xf32, #tpu.memory_space<vmem>>, vector<1x128xf32>
    %117 = vector.shape_cast %116 : vector<1x128xf32> to vector<1x1x128xf32>
    %118 = vector.broadcast %117 : vector<1x1x128xf32> to vector<2x8x128xf32>
    %119 = arith.addf %115, %118 : vector<2x8x128xf32>
    %c0_45 = arith.constant 0 : index
    %c0_46 = arith.constant 0 : index
    %120 = vector.load %arg16[%c0_45, %c0_46] : memref<128x128xbf16, #tpu.memory_space<vmem>>, vector<128x128xbf16>
    %121 = vector.shape_cast %119 : vector<2x8x128xf32> to vector<16x128xf32>
    %122 = arith.truncf %121 : vector<16x128xf32> to vector<16x128xbf16>
    %cst_47 = arith.constant dense<0.000000e+00> : vector<16x128xf32>
    %123 = tpu.matmul %122, %120, %cst_47 {dimension_numbers = #tpu.dot_dimension_numbers<[1], [0], [0], [1], [0, 0, 1, 1], [], []>} : vector<16x128xbf16>, vector<128x128xbf16>, vector<16x128xf32> -> vector<16x128xf32>
    %124 = vector.shape_cast %123 : vector<16x128xf32> to vector<2x8x128xf32>
    %c0_48 = arith.constant 0 : index
    %c0_49 = arith.constant 0 : index
    %125 = vector.load %arg17[%c0_48, %c0_49] : memref<1x128xf32, #tpu.memory_space<vmem>>, vector<1x128xf32>
    %126 = vector.shape_cast %125 : vector<1x128xf32> to vector<1x1x128xf32>
    %127 = vector.broadcast %126 : vector<1x1x128xf32> to vector<2x8x128xf32>
    %128 = arith.addf %124, %127 : vector<2x8x128xf32>
    %c0_50 = arith.constant 0 : index
    %c0_51 = arith.constant 0 : index
    %129 = vector.load %arg25[%c0_50, %c0_51] : memref<1x128xf32, #tpu.memory_space<vmem>>, vector<1x128xf32>
    %130 = vector.shape_cast %129 : vector<1x128xf32> to vector<1x128xf32>
    %131 = vector.broadcast %130 : vector<1x128xf32> to vector<2x128xf32>
    %c0_52 = arith.constant 0 : index
    %c0_53 = arith.constant 0 : index
    %132 = vector.load %arg20[%c0_52, %c0_53] : memref<1x128xf32, #tpu.memory_space<vmem>>, vector<1x128xf32>
    %c0_54 = arith.constant 0 : index
    %c0_55 = arith.constant 0 : index
    %133 = vector.load %arg21[%c0_54, %c0_55] : memref<1x1xf32, #tpu.memory_space<vmem>>, vector<1x1xf32>
    %c0_56 = arith.constant 0 : index
    %c0_57 = arith.constant 0 : index
    %134 = vector.load %arg13[%c0_56, %c0_57] : memref<128x128xbf16, #tpu.memory_space<vmem>>, vector<128x128xbf16>
    %135 = arith.truncf %131 : vector<2x128xf32> to vector<2x128xbf16>
    %cst_58 = arith.constant dense<0.000000e+00> : vector<2x128xf32>
    %136 = tpu.matmul %135, %134, %cst_58 {dimension_numbers = #tpu.dot_dimension_numbers<[1], [0], [0], [1], [0, 0, 1, 1], [], []>} : vector<2x128xbf16>, vector<128x128xbf16>, vector<2x128xf32> -> vector<2x128xf32>
    %c0_59 = arith.constant 0 : index
    %c0_60 = arith.constant 0 : index
    %137 = vector.load %arg14[%c0_59, %c0_60] : memref<1x128xf32, #tpu.memory_space<vmem>>, vector<1x128xf32>
    %138 = vector.broadcast %137 : vector<1x128xf32> to vector<2x128xf32>
    %139 = arith.addf %136, %138 : vector<2x128xf32>
    %140 = vector.shape_cast %139 : vector<2x128xf32> to vector<2x1x128xf32>
    %141 = vector.broadcast %140 : vector<2x1x128xf32> to vector<2x8x128xf32>
    %142 = arith.mulf %119, %141 : vector<2x8x128xf32>
    %c0_61 = arith.constant 0 : index
    %c0_62 = arith.constant 0 : index
    %143 = vector.load %arg15[%c0_61, %c0_62] : memref<128x128xbf16, #tpu.memory_space<vmem>>, vector<128x128xbf16>
    %144 = vector.shape_cast %142 : vector<2x8x128xf32> to vector<16x128xf32>
    %145 = arith.truncf %144 : vector<16x128xf32> to vector<16x128xbf16>
    %cst_63 = arith.constant dense<0.000000e+00> : vector<16x128xf32>
    %146 = tpu.matmul %145, %143, %cst_63 {dimension_numbers = #tpu.dot_dimension_numbers<[1], [0], [0], [1], [0, 0, 1, 1], [], []>} : vector<16x128xbf16>, vector<128x128xbf16>, vector<16x128xf32> -> vector<16x128xf32>
    %147 = vector.shape_cast %146 : vector<16x128xf32> to vector<2x8x128xf32>
    %148 = arith.addf %147, %128 : vector<2x8x128xf32>
    %cst_64 = arith.constant 0.000000e+00 : f32
    %149 = vector.broadcast %cst_64 : f32 to vector<2x8x128xf32>
    %150 = arith.cmpf ogt, %148, %149 : vector<2x8x128xf32>
    %151 = math.exp %148 : vector<2x8x128xf32>
    %cst_65 = arith.constant 1.000000e+00 : f32
    %152 = vector.broadcast %cst_65 : f32 to vector<2x8x128xf32>
    %153 = arith.subf %151, %152 : vector<2x8x128xf32>
    %154 = arith.select %150, %148, %153 : vector<2x8x128xi1>, vector<2x8x128xf32>
    %c0_66 = arith.constant 0 : index
    %c0_67 = arith.constant 0 : index
    %155 = vector.load %arg18[%c0_66, %c0_67] : memref<128x128xbf16, #tpu.memory_space<vmem>>, vector<128x128xbf16>
    %156 = vector.shape_cast %154 : vector<2x8x128xf32> to vector<16x128xf32>
    %157 = arith.truncf %156 : vector<16x128xf32> to vector<16x128xbf16>
    %cst_68 = arith.constant dense<0.000000e+00> : vector<16x128xf32>
    %158 = tpu.matmul %157, %155, %cst_68 {dimension_numbers = #tpu.dot_dimension_numbers<[1], [0], [0], [1], [0, 0, 1, 1], [], []>} : vector<16x128xbf16>, vector<128x128xbf16>, vector<16x128xf32> -> vector<16x128xf32>
    %159 = vector.shape_cast %158 : vector<16x128xf32> to vector<2x8x128xf32>
    %c0_69 = arith.constant 0 : index
    %c0_70 = arith.constant 0 : index
    %160 = vector.load %arg19[%c0_69, %c0_70] : memref<1x128xf32, #tpu.memory_space<vmem>>, vector<1x128xf32>
    %161 = vector.shape_cast %160 : vector<1x128xf32> to vector<1x1x128xf32>
    %162 = vector.broadcast %161 : vector<1x1x128xf32> to vector<2x8x128xf32>
    %163 = arith.addf %159, %162 : vector<2x8x128xf32>
    %164 = vector.shape_cast %47 : vector<2x128xf32> to vector<2x1x128xf32>
    %165 = vector.broadcast %164 : vector<2x1x128xf32> to vector<2x8x128xf32>
    %166 = arith.mulf %163, %165 : vector<2x8x128xf32>
    %cst_71 = arith.constant 0.000000e+00 : f32
    %167 = vector.broadcast %cst_71 : f32 to vector<2x8x128xf32>
    %168 = arith.cmpf ogt, %166, %167 : vector<2x8x128xf32>
    %169 = math.exp %166 : vector<2x8x128xf32>
    %cst_72 = arith.constant 1.000000e+00 : f32
    %170 = vector.broadcast %cst_72 : f32 to vector<2x8x128xf32>
    %171 = arith.subf %169, %170 : vector<2x8x128xf32>
    %172 = arith.select %168, %166, %171 : vector<2x8x128xi1>, vector<2x8x128xf32>
    %173 = vector.shape_cast %132 : vector<1x128xf32> to vector<1x1x128xf32>
    %174 = vector.broadcast %173 : vector<1x1x128xf32> to vector<2x8x128xf32>
    %175 = arith.mulf %172, %174 : vector<2x8x128xf32>
    %cst_73 = arith.constant dense<0.000000e+00> : vector<2x8xf32>
    %176 = vector.multi_reduction <add>, %175, %cst_73 [2] : vector<2x8x128xf32> to vector<2x8xf32>
    %177 = vector.broadcast %133 : vector<1x1xf32> to vector<2x8xf32>
    %178 = arith.addf %176, %177 : vector<2x8xf32>
    %cst_74 = arith.constant dense<0xFF800000> : vector<2xf32>
    %179 = vector.multi_reduction <maximumf>, %178, %cst_74 [1] : vector<2x8xf32> to vector<2xf32>
    %180 = vector.shape_cast %179 : vector<2xf32> to vector<2x1xf32>
    %181 = vector.broadcast %180 : vector<2x1xf32> to vector<2x8xf32>
    %182 = arith.subf %178, %181 : vector<2x8xf32>
    %183 = math.exp %182 : vector<2x8xf32>
    %cst_75 = arith.constant dense<0.000000e+00> : vector<2xf32>
    %184 = vector.multi_reduction <add>, %183, %cst_75 [1] : vector<2x8xf32> to vector<2xf32>
    %185 = vector.shape_cast %184 : vector<2xf32> to vector<2x1xf32>
    %186 = tpu.reciprocal %185 {approx = true} : vector<2x1xf32> -> vector<2x1xf32>
    %187 = vector.broadcast %186 : vector<2x1xf32> to vector<2x8xf32>
    %188 = arith.mulf %183, %187 : vector<2x8xf32>
    %189 = vector.shape_cast %188 : vector<2x8xf32> to vector<2x8x1xf32>
    %190 = vector.broadcast %189 : vector<2x8x1xf32> to vector<2x8x128xf32>
    %191 = arith.mulf %190, %8 : vector<2x8x128xf32>
    %cst_76 = arith.constant dense<0.000000e+00> : vector<2x128xf32>
    %192 = vector.multi_reduction <add>, %191, %cst_76 [1] : vector<2x8x128xf32> to vector<2x128xf32>
    %c0_77 = arith.constant 0 : index
    %c0_78 = arith.constant 0 : index
    %193 = vector.load %arg22[%c0_77, %c0_78] : memref<128x128xbf16, #tpu.memory_space<vmem>>, vector<128x128xbf16>
    %194 = arith.truncf %131 : vector<2x128xf32> to vector<2x128xbf16>
    %cst_79 = arith.constant dense<0.000000e+00> : vector<2x128xf32>
    %195 = tpu.matmul %194, %193, %cst_79 {dimension_numbers = #tpu.dot_dimension_numbers<[1], [0], [0], [1], [0, 0, 1, 1], [], []>} : vector<2x128xbf16>, vector<128x128xbf16>, vector<2x128xf32> -> vector<2x128xf32>
    %c0_80 = arith.constant 0 : index
    %c0_81 = arith.constant 0 : index
    %196 = vector.load %arg23[%c0_80, %c0_81] : memref<128x128xbf16, #tpu.memory_space<vmem>>, vector<128x128xbf16>
    %197 = arith.truncf %192 : vector<2x128xf32> to vector<2x128xbf16>
    %cst_82 = arith.constant dense<0.000000e+00> : vector<2x128xf32>
    %198 = tpu.matmul %197, %196, %cst_82 {dimension_numbers = #tpu.dot_dimension_numbers<[1], [0], [0], [1], [0, 0, 1, 1], [], []>} : vector<2x128xbf16>, vector<128x128xbf16>, vector<2x128xf32> -> vector<2x128xf32>
    %199 = arith.addf %195, %198 : vector<2x128xf32>
    %c0_83 = arith.constant 0 : index
    %c0_84 = arith.constant 0 : index
    %200 = vector.load %arg24[%c0_83, %c0_84] : memref<1x128xf32, #tpu.memory_space<vmem>>, vector<1x128xf32>
    %201 = vector.broadcast %200 : vector<1x128xf32> to vector<2x128xf32>
    %202 = arith.addf %199, %201 : vector<2x128xf32>
    %c0_85 = arith.constant 0 : index
    %c0_86 = arith.constant 0 : index
    %203 = vector.load %arg13[%c0_85, %c0_86] : memref<128x128xbf16, #tpu.memory_space<vmem>>, vector<128x128xbf16>
    %204 = arith.truncf %202 : vector<2x128xf32> to vector<2x128xbf16>
    %cst_87 = arith.constant dense<0.000000e+00> : vector<2x128xf32>
    %205 = tpu.matmul %204, %203, %cst_87 {dimension_numbers = #tpu.dot_dimension_numbers<[1], [0], [0], [1], [0, 0, 1, 1], [], []>} : vector<2x128xbf16>, vector<128x128xbf16>, vector<2x128xf32> -> vector<2x128xf32>
    %c0_88 = arith.constant 0 : index
    %c0_89 = arith.constant 0 : index
    %206 = vector.load %arg14[%c0_88, %c0_89] : memref<1x128xf32, #tpu.memory_space<vmem>>, vector<1x128xf32>
    %207 = vector.broadcast %206 : vector<1x128xf32> to vector<2x128xf32>
    %208 = arith.addf %205, %207 : vector<2x128xf32>
    %209 = vector.shape_cast %208 : vector<2x128xf32> to vector<2x1x128xf32>
    %210 = vector.broadcast %209 : vector<2x1x128xf32> to vector<2x8x128xf32>
    %211 = arith.mulf %119, %210 : vector<2x8x128xf32>
    %c0_90 = arith.constant 0 : index
    %c0_91 = arith.constant 0 : index
    %212 = vector.load %arg15[%c0_90, %c0_91] : memref<128x128xbf16, #tpu.memory_space<vmem>>, vector<128x128xbf16>
    %213 = vector.shape_cast %211 : vector<2x8x128xf32> to vector<16x128xf32>
    %214 = arith.truncf %213 : vector<16x128xf32> to vector<16x128xbf16>
    %cst_92 = arith.constant dense<0.000000e+00> : vector<16x128xf32>
    %215 = tpu.matmul %214, %212, %cst_92 {dimension_numbers = #tpu.dot_dimension_numbers<[1], [0], [0], [1], [0, 0, 1, 1], [], []>} : vector<16x128xbf16>, vector<128x128xbf16>, vector<16x128xf32> -> vector<16x128xf32>
    %216 = vector.shape_cast %215 : vector<16x128xf32> to vector<2x8x128xf32>
    %217 = arith.addf %216, %128 : vector<2x8x128xf32>
    %cst_93 = arith.constant 0.000000e+00 : f32
    %218 = vector.broadcast %cst_93 : f32 to vector<2x8x128xf32>
    %219 = arith.cmpf ogt, %217, %218 : vector<2x8x128xf32>
    %220 = math.exp %217 : vector<2x8x128xf32>
    %cst_94 = arith.constant 1.000000e+00 : f32
    %221 = vector.broadcast %cst_94 : f32 to vector<2x8x128xf32>
    %222 = arith.subf %220, %221 : vector<2x8x128xf32>
    %223 = arith.select %219, %217, %222 : vector<2x8x128xi1>, vector<2x8x128xf32>
    %c0_95 = arith.constant 0 : index
    %c0_96 = arith.constant 0 : index
    %224 = vector.load %arg18[%c0_95, %c0_96] : memref<128x128xbf16, #tpu.memory_space<vmem>>, vector<128x128xbf16>
    %225 = vector.shape_cast %223 : vector<2x8x128xf32> to vector<16x128xf32>
    %226 = arith.truncf %225 : vector<16x128xf32> to vector<16x128xbf16>
    %cst_97 = arith.constant dense<0.000000e+00> : vector<16x128xf32>
    %227 = tpu.matmul %226, %224, %cst_97 {dimension_numbers = #tpu.dot_dimension_numbers<[1], [0], [0], [1], [0, 0, 1, 1], [], []>} : vector<16x128xbf16>, vector<128x128xbf16>, vector<16x128xf32> -> vector<16x128xf32>
    %228 = vector.shape_cast %227 : vector<16x128xf32> to vector<2x8x128xf32>
    %c0_98 = arith.constant 0 : index
    %c0_99 = arith.constant 0 : index
    %229 = vector.load %arg19[%c0_98, %c0_99] : memref<1x128xf32, #tpu.memory_space<vmem>>, vector<1x128xf32>
    %230 = vector.shape_cast %229 : vector<1x128xf32> to vector<1x1x128xf32>
    %231 = vector.broadcast %230 : vector<1x1x128xf32> to vector<2x8x128xf32>
    %232 = arith.addf %228, %231 : vector<2x8x128xf32>
    %233 = vector.shape_cast %68 : vector<2x128xf32> to vector<2x1x128xf32>
    %234 = vector.broadcast %233 : vector<2x1x128xf32> to vector<2x8x128xf32>
    %235 = arith.mulf %232, %234 : vector<2x8x128xf32>
    %cst_100 = arith.constant 0.000000e+00 : f32
    %236 = vector.broadcast %cst_100 : f32 to vector<2x8x128xf32>
    %237 = arith.cmpf ogt, %235, %236 : vector<2x8x128xf32>
    %238 = math.exp %235 : vector<2x8x128xf32>
    %cst_101 = arith.constant 1.000000e+00 : f32
    %239 = vector.broadcast %cst_101 : f32 to vector<2x8x128xf32>
    %240 = arith.subf %238, %239 : vector<2x8x128xf32>
    %241 = arith.select %237, %235, %240 : vector<2x8x128xi1>, vector<2x8x128xf32>
    %242 = vector.shape_cast %132 : vector<1x128xf32> to vector<1x1x128xf32>
    %243 = vector.broadcast %242 : vector<1x1x128xf32> to vector<2x8x128xf32>
    %244 = arith.mulf %241, %243 : vector<2x8x128xf32>
    %cst_102 = arith.constant dense<0.000000e+00> : vector<2x8xf32>
    %245 = vector.multi_reduction <add>, %244, %cst_102 [2] : vector<2x8x128xf32> to vector<2x8xf32>
    %246 = vector.broadcast %133 : vector<1x1xf32> to vector<2x8xf32>
    %247 = arith.addf %245, %246 : vector<2x8xf32>
    %cst_103 = arith.constant dense<0xFF800000> : vector<2xf32>
    %248 = vector.multi_reduction <maximumf>, %247, %cst_103 [1] : vector<2x8xf32> to vector<2xf32>
    %249 = vector.shape_cast %248 : vector<2xf32> to vector<2x1xf32>
    %250 = vector.broadcast %249 : vector<2x1xf32> to vector<2x8xf32>
    %251 = arith.subf %247, %250 : vector<2x8xf32>
    %252 = math.exp %251 : vector<2x8xf32>
    %cst_104 = arith.constant dense<0.000000e+00> : vector<2xf32>
    %253 = vector.multi_reduction <add>, %252, %cst_104 [1] : vector<2x8xf32> to vector<2xf32>
    %254 = vector.shape_cast %253 : vector<2xf32> to vector<2x1xf32>
    %255 = tpu.reciprocal %254 {approx = true} : vector<2x1xf32> -> vector<2x1xf32>
    %256 = vector.broadcast %255 : vector<2x1xf32> to vector<2x8xf32>
    %257 = arith.mulf %252, %256 : vector<2x8xf32>
    %258 = vector.shape_cast %257 : vector<2x8xf32> to vector<2x8x1xf32>
    %259 = vector.broadcast %258 : vector<2x8x1xf32> to vector<2x8x128xf32>
    %260 = arith.mulf %259, %8 : vector<2x8x128xf32>
    %cst_105 = arith.constant dense<0.000000e+00> : vector<2x128xf32>
    %261 = vector.multi_reduction <add>, %260, %cst_105 [1] : vector<2x8x128xf32> to vector<2x128xf32>
    %c0_106 = arith.constant 0 : index
    %c0_107 = arith.constant 0 : index
    %262 = vector.load %arg22[%c0_106, %c0_107] : memref<128x128xbf16, #tpu.memory_space<vmem>>, vector<128x128xbf16>
    %263 = arith.truncf %202 : vector<2x128xf32> to vector<2x128xbf16>
    %cst_108 = arith.constant dense<0.000000e+00> : vector<2x128xf32>
    %264 = tpu.matmul %263, %262, %cst_108 {dimension_numbers = #tpu.dot_dimension_numbers<[1], [0], [0], [1], [0, 0, 1, 1], [], []>} : vector<2x128xbf16>, vector<128x128xbf16>, vector<2x128xf32> -> vector<2x128xf32>
    %c0_109 = arith.constant 0 : index
    %c0_110 = arith.constant 0 : index
    %265 = vector.load %arg23[%c0_109, %c0_110] : memref<128x128xbf16, #tpu.memory_space<vmem>>, vector<128x128xbf16>
    %266 = arith.truncf %261 : vector<2x128xf32> to vector<2x128xbf16>
    %cst_111 = arith.constant dense<0.000000e+00> : vector<2x128xf32>
    %267 = tpu.matmul %266, %265, %cst_111 {dimension_numbers = #tpu.dot_dimension_numbers<[1], [0], [0], [1], [0, 0, 1, 1], [], []>} : vector<2x128xbf16>, vector<128x128xbf16>, vector<2x128xf32> -> vector<2x128xf32>
    %268 = arith.addf %264, %267 : vector<2x128xf32>
    %c0_112 = arith.constant 0 : index
    %c0_113 = arith.constant 0 : index
    %269 = vector.load %arg24[%c0_112, %c0_113] : memref<1x128xf32, #tpu.memory_space<vmem>>, vector<1x128xf32>
    %270 = vector.broadcast %269 : vector<1x128xf32> to vector<2x128xf32>
    %271 = arith.addf %268, %270 : vector<2x128xf32>
    %c0_114 = arith.constant 0 : index
    %c0_115 = arith.constant 0 : index
    %272 = vector.load %arg13[%c0_114, %c0_115] : memref<128x128xbf16, #tpu.memory_space<vmem>>, vector<128x128xbf16>
    %273 = arith.truncf %271 : vector<2x128xf32> to vector<2x128xbf16>
    %cst_116 = arith.constant dense<0.000000e+00> : vector<2x128xf32>
    %274 = tpu.matmul %273, %272, %cst_116 {dimension_numbers = #tpu.dot_dimension_numbers<[1], [0], [0], [1], [0, 0, 1, 1], [], []>} : vector<2x128xbf16>, vector<128x128xbf16>, vector<2x128xf32> -> vector<2x128xf32>
    %c0_117 = arith.constant 0 : index
    %c0_118 = arith.constant 0 : index
    %275 = vector.load %arg14[%c0_117, %c0_118] : memref<1x128xf32, #tpu.memory_space<vmem>>, vector<1x128xf32>
    %276 = vector.broadcast %275 : vector<1x128xf32> to vector<2x128xf32>
    %277 = arith.addf %274, %276 : vector<2x128xf32>
    %278 = vector.shape_cast %277 : vector<2x128xf32> to vector<2x1x128xf32>
    %279 = vector.broadcast %278 : vector<2x1x128xf32> to vector<2x8x128xf32>
    %280 = arith.mulf %119, %279 : vector<2x8x128xf32>
    %c0_119 = arith.constant 0 : index
    %c0_120 = arith.constant 0 : index
    %281 = vector.load %arg15[%c0_119, %c0_120] : memref<128x128xbf16, #tpu.memory_space<vmem>>, vector<128x128xbf16>
    %282 = vector.shape_cast %280 : vector<2x8x128xf32> to vector<16x128xf32>
    %283 = arith.truncf %282 : vector<16x128xf32> to vector<16x128xbf16>
    %cst_121 = arith.constant dense<0.000000e+00> : vector<16x128xf32>
    %284 = tpu.matmul %283, %281, %cst_121 {dimension_numbers = #tpu.dot_dimension_numbers<[1], [0], [0], [1], [0, 0, 1, 1], [], []>} : vector<16x128xbf16>, vector<128x128xbf16>, vector<16x128xf32> -> vector<16x128xf32>
    %285 = vector.shape_cast %284 : vector<16x128xf32> to vector<2x8x128xf32>
    %286 = arith.addf %285, %128 : vector<2x8x128xf32>
    %cst_122 = arith.constant 0.000000e+00 : f32
    %287 = vector.broadcast %cst_122 : f32 to vector<2x8x128xf32>
    %288 = arith.cmpf ogt, %286, %287 : vector<2x8x128xf32>
    %289 = math.exp %286 : vector<2x8x128xf32>
    %cst_123 = arith.constant 1.000000e+00 : f32
    %290 = vector.broadcast %cst_123 : f32 to vector<2x8x128xf32>
    %291 = arith.subf %289, %290 : vector<2x8x128xf32>
    %292 = arith.select %288, %286, %291 : vector<2x8x128xi1>, vector<2x8x128xf32>
    %c0_124 = arith.constant 0 : index
    %c0_125 = arith.constant 0 : index
    %293 = vector.load %arg18[%c0_124, %c0_125] : memref<128x128xbf16, #tpu.memory_space<vmem>>, vector<128x128xbf16>
    %294 = vector.shape_cast %292 : vector<2x8x128xf32> to vector<16x128xf32>
    %295 = arith.truncf %294 : vector<16x128xf32> to vector<16x128xbf16>
    %cst_126 = arith.constant dense<0.000000e+00> : vector<16x128xf32>
    %296 = tpu.matmul %295, %293, %cst_126 {dimension_numbers = #tpu.dot_dimension_numbers<[1], [0], [0], [1], [0, 0, 1, 1], [], []>} : vector<16x128xbf16>, vector<128x128xbf16>, vector<16x128xf32> -> vector<16x128xf32>
    %297 = vector.shape_cast %296 : vector<16x128xf32> to vector<2x8x128xf32>
    %c0_127 = arith.constant 0 : index
    %c0_128 = arith.constant 0 : index
    %298 = vector.load %arg19[%c0_127, %c0_128] : memref<1x128xf32, #tpu.memory_space<vmem>>, vector<1x128xf32>
    %299 = vector.shape_cast %298 : vector<1x128xf32> to vector<1x1x128xf32>
    %300 = vector.broadcast %299 : vector<1x1x128xf32> to vector<2x8x128xf32>
    %301 = arith.addf %297, %300 : vector<2x8x128xf32>
    %302 = vector.shape_cast %89 : vector<2x128xf32> to vector<2x1x128xf32>
    %303 = vector.broadcast %302 : vector<2x1x128xf32> to vector<2x8x128xf32>
    %304 = arith.mulf %301, %303 : vector<2x8x128xf32>
    %cst_129 = arith.constant 0.000000e+00 : f32
    %305 = vector.broadcast %cst_129 : f32 to vector<2x8x128xf32>
    %306 = arith.cmpf ogt, %304, %305 : vector<2x8x128xf32>
    %307 = math.exp %304 : vector<2x8x128xf32>
    %cst_130 = arith.constant 1.000000e+00 : f32
    %308 = vector.broadcast %cst_130 : f32 to vector<2x8x128xf32>
    %309 = arith.subf %307, %308 : vector<2x8x128xf32>
    %310 = arith.select %306, %304, %309 : vector<2x8x128xi1>, vector<2x8x128xf32>
    %311 = vector.shape_cast %132 : vector<1x128xf32> to vector<1x1x128xf32>
    %312 = vector.broadcast %311 : vector<1x1x128xf32> to vector<2x8x128xf32>
    %313 = arith.mulf %310, %312 : vector<2x8x128xf32>
    %cst_131 = arith.constant dense<0.000000e+00> : vector<2x8xf32>
    %314 = vector.multi_reduction <add>, %313, %cst_131 [2] : vector<2x8x128xf32> to vector<2x8xf32>
    %315 = vector.broadcast %133 : vector<1x1xf32> to vector<2x8xf32>
    %316 = arith.addf %314, %315 : vector<2x8xf32>
    %cst_132 = arith.constant dense<0xFF800000> : vector<2xf32>
    %317 = vector.multi_reduction <maximumf>, %316, %cst_132 [1] : vector<2x8xf32> to vector<2xf32>
    %318 = vector.shape_cast %317 : vector<2xf32> to vector<2x1xf32>
    %319 = vector.broadcast %318 : vector<2x1xf32> to vector<2x8xf32>
    %320 = arith.subf %316, %319 : vector<2x8xf32>
    %321 = math.exp %320 : vector<2x8xf32>
    %cst_133 = arith.constant dense<0.000000e+00> : vector<2xf32>
    %322 = vector.multi_reduction <add>, %321, %cst_133 [1] : vector<2x8xf32> to vector<2xf32>
    %323 = vector.shape_cast %322 : vector<2xf32> to vector<2x1xf32>
    %324 = tpu.reciprocal %323 {approx = true} : vector<2x1xf32> -> vector<2x1xf32>
    %325 = vector.broadcast %324 : vector<2x1xf32> to vector<2x8xf32>
    %326 = arith.mulf %321, %325 : vector<2x8xf32>
    %327 = vector.shape_cast %326 : vector<2x8xf32> to vector<2x8x1xf32>
    %328 = vector.broadcast %327 : vector<2x8x1xf32> to vector<2x8x128xf32>
    %329 = arith.mulf %328, %8 : vector<2x8x128xf32>
    %cst_134 = arith.constant dense<0.000000e+00> : vector<2x128xf32>
    %330 = vector.multi_reduction <add>, %329, %cst_134 [1] : vector<2x8x128xf32> to vector<2x128xf32>
    %c0_135 = arith.constant 0 : index
    %c0_136 = arith.constant 0 : index
    %331 = vector.load %arg22[%c0_135, %c0_136] : memref<128x128xbf16, #tpu.memory_space<vmem>>, vector<128x128xbf16>
    %332 = arith.truncf %271 : vector<2x128xf32> to vector<2x128xbf16>
    %cst_137 = arith.constant dense<0.000000e+00> : vector<2x128xf32>
    %333 = tpu.matmul %332, %331, %cst_137 {dimension_numbers = #tpu.dot_dimension_numbers<[1], [0], [0], [1], [0, 0, 1, 1], [], []>} : vector<2x128xbf16>, vector<128x128xbf16>, vector<2x128xf32> -> vector<2x128xf32>
    %c0_138 = arith.constant 0 : index
    %c0_139 = arith.constant 0 : index
    %334 = vector.load %arg23[%c0_138, %c0_139] : memref<128x128xbf16, #tpu.memory_space<vmem>>, vector<128x128xbf16>
    %335 = arith.truncf %330 : vector<2x128xf32> to vector<2x128xbf16>
    %cst_140 = arith.constant dense<0.000000e+00> : vector<2x128xf32>
    %336 = tpu.matmul %335, %334, %cst_140 {dimension_numbers = #tpu.dot_dimension_numbers<[1], [0], [0], [1], [0, 0, 1, 1], [], []>} : vector<2x128xbf16>, vector<128x128xbf16>, vector<2x128xf32> -> vector<2x128xf32>
    %337 = arith.addf %333, %336 : vector<2x128xf32>
    %c0_141 = arith.constant 0 : index
    %c0_142 = arith.constant 0 : index
    %338 = vector.load %arg24[%c0_141, %c0_142] : memref<1x128xf32, #tpu.memory_space<vmem>>, vector<1x128xf32>
    %339 = vector.broadcast %338 : vector<1x128xf32> to vector<2x128xf32>
    %340 = arith.addf %337, %339 : vector<2x128xf32>
    %c0_143 = arith.constant 0 : index
    %c0_144 = arith.constant 0 : index
    %341 = vector.load %arg13[%c0_143, %c0_144] : memref<128x128xbf16, #tpu.memory_space<vmem>>, vector<128x128xbf16>
    %342 = arith.truncf %340 : vector<2x128xf32> to vector<2x128xbf16>
    %cst_145 = arith.constant dense<0.000000e+00> : vector<2x128xf32>
    %343 = tpu.matmul %342, %341, %cst_145 {dimension_numbers = #tpu.dot_dimension_numbers<[1], [0], [0], [1], [0, 0, 1, 1], [], []>} : vector<2x128xbf16>, vector<128x128xbf16>, vector<2x128xf32> -> vector<2x128xf32>
    %c0_146 = arith.constant 0 : index
    %c0_147 = arith.constant 0 : index
    %344 = vector.load %arg14[%c0_146, %c0_147] : memref<1x128xf32, #tpu.memory_space<vmem>>, vector<1x128xf32>
    %345 = vector.broadcast %344 : vector<1x128xf32> to vector<2x128xf32>
    %346 = arith.addf %343, %345 : vector<2x128xf32>
    %347 = vector.shape_cast %346 : vector<2x128xf32> to vector<2x1x128xf32>
    %348 = vector.broadcast %347 : vector<2x1x128xf32> to vector<2x8x128xf32>
    %349 = arith.mulf %119, %348 : vector<2x8x128xf32>
    %c0_148 = arith.constant 0 : index
    %c0_149 = arith.constant 0 : index
    %350 = vector.load %arg15[%c0_148, %c0_149] : memref<128x128xbf16, #tpu.memory_space<vmem>>, vector<128x128xbf16>
    %351 = vector.shape_cast %349 : vector<2x8x128xf32> to vector<16x128xf32>
    %352 = arith.truncf %351 : vector<16x128xf32> to vector<16x128xbf16>
    %cst_150 = arith.constant dense<0.000000e+00> : vector<16x128xf32>
    %353 = tpu.matmul %352, %350, %cst_150 {dimension_numbers = #tpu.dot_dimension_numbers<[1], [0], [0], [1], [0, 0, 1, 1], [], []>} : vector<16x128xbf16>, vector<128x128xbf16>, vector<16x128xf32> -> vector<16x128xf32>
    %354 = vector.shape_cast %353 : vector<16x128xf32> to vector<2x8x128xf32>
    %355 = arith.addf %354, %128 : vector<2x8x128xf32>
    %cst_151 = arith.constant 0.000000e+00 : f32
    %356 = vector.broadcast %cst_151 : f32 to vector<2x8x128xf32>
    %357 = arith.cmpf ogt, %355, %356 : vector<2x8x128xf32>
    %358 = math.exp %355 : vector<2x8x128xf32>
    %cst_152 = arith.constant 1.000000e+00 : f32
    %359 = vector.broadcast %cst_152 : f32 to vector<2x8x128xf32>
    %360 = arith.subf %358, %359 : vector<2x8x128xf32>
    %361 = arith.select %357, %355, %360 : vector<2x8x128xi1>, vector<2x8x128xf32>
    %c0_153 = arith.constant 0 : index
    %c0_154 = arith.constant 0 : index
    %362 = vector.load %arg18[%c0_153, %c0_154] : memref<128x128xbf16, #tpu.memory_space<vmem>>, vector<128x128xbf16>
    %363 = vector.shape_cast %361 : vector<2x8x128xf32> to vector<16x128xf32>
    %364 = arith.truncf %363 : vector<16x128xf32> to vector<16x128xbf16>
    %cst_155 = arith.constant dense<0.000000e+00> : vector<16x128xf32>
    %365 = tpu.matmul %364, %362, %cst_155 {dimension_numbers = #tpu.dot_dimension_numbers<[1], [0], [0], [1], [0, 0, 1, 1], [], []>} : vector<16x128xbf16>, vector<128x128xbf16>, vector<16x128xf32> -> vector<16x128xf32>
    %366 = vector.shape_cast %365 : vector<16x128xf32> to vector<2x8x128xf32>
    %c0_156 = arith.constant 0 : index
    %c0_157 = arith.constant 0 : index
    %367 = vector.load %arg19[%c0_156, %c0_157] : memref<1x128xf32, #tpu.memory_space<vmem>>, vector<1x128xf32>
    %368 = vector.shape_cast %367 : vector<1x128xf32> to vector<1x1x128xf32>
    %369 = vector.broadcast %368 : vector<1x1x128xf32> to vector<2x8x128xf32>
    %370 = arith.addf %366, %369 : vector<2x8x128xf32>
    %371 = vector.shape_cast %110 : vector<2x128xf32> to vector<2x1x128xf32>
    %372 = vector.broadcast %371 : vector<2x1x128xf32> to vector<2x8x128xf32>
    %373 = arith.mulf %370, %372 : vector<2x8x128xf32>
    %cst_158 = arith.constant 0.000000e+00 : f32
    %374 = vector.broadcast %cst_158 : f32 to vector<2x8x128xf32>
    %375 = arith.cmpf ogt, %373, %374 : vector<2x8x128xf32>
    %376 = math.exp %373 : vector<2x8x128xf32>
    %cst_159 = arith.constant 1.000000e+00 : f32
    %377 = vector.broadcast %cst_159 : f32 to vector<2x8x128xf32>
    %378 = arith.subf %376, %377 : vector<2x8x128xf32>
    %379 = arith.select %375, %373, %378 : vector<2x8x128xi1>, vector<2x8x128xf32>
    %380 = vector.shape_cast %132 : vector<1x128xf32> to vector<1x1x128xf32>
    %381 = vector.broadcast %380 : vector<1x1x128xf32> to vector<2x8x128xf32>
    %382 = arith.mulf %379, %381 : vector<2x8x128xf32>
    %cst_160 = arith.constant dense<0.000000e+00> : vector<2x8xf32>
    %383 = vector.multi_reduction <add>, %382, %cst_160 [2] : vector<2x8x128xf32> to vector<2x8xf32>
    %384 = vector.broadcast %133 : vector<1x1xf32> to vector<2x8xf32>
    %385 = arith.addf %383, %384 : vector<2x8xf32>
    %cst_161 = arith.constant dense<0xFF800000> : vector<2xf32>
    %386 = vector.multi_reduction <maximumf>, %385, %cst_161 [1] : vector<2x8xf32> to vector<2xf32>
    %387 = vector.shape_cast %386 : vector<2xf32> to vector<2x1xf32>
    %388 = vector.broadcast %387 : vector<2x1xf32> to vector<2x8xf32>
    %389 = arith.subf %385, %388 : vector<2x8xf32>
    %390 = math.exp %389 : vector<2x8xf32>
    %cst_162 = arith.constant dense<0.000000e+00> : vector<2xf32>
    %391 = vector.multi_reduction <add>, %390, %cst_162 [1] : vector<2x8xf32> to vector<2xf32>
    %392 = vector.shape_cast %391 : vector<2xf32> to vector<2x1xf32>
    %393 = tpu.reciprocal %392 {approx = true} : vector<2x1xf32> -> vector<2x1xf32>
    %394 = vector.broadcast %393 : vector<2x1xf32> to vector<2x8xf32>
    %395 = arith.mulf %390, %394 : vector<2x8xf32>
    %396 = vector.shape_cast %395 : vector<2x8xf32> to vector<2x8x1xf32>
    %397 = vector.broadcast %396 : vector<2x8x1xf32> to vector<2x8x128xf32>
    %398 = arith.mulf %397, %8 : vector<2x8x128xf32>
    %cst_163 = arith.constant dense<0.000000e+00> : vector<2x128xf32>
    %399 = vector.multi_reduction <add>, %398, %cst_163 [1] : vector<2x8x128xf32> to vector<2x128xf32>
    %c0_164 = arith.constant 0 : index
    %c0_165 = arith.constant 0 : index
    %400 = vector.load %arg22[%c0_164, %c0_165] : memref<128x128xbf16, #tpu.memory_space<vmem>>, vector<128x128xbf16>
    %401 = arith.truncf %340 : vector<2x128xf32> to vector<2x128xbf16>
    %cst_166 = arith.constant dense<0.000000e+00> : vector<2x128xf32>
    %402 = tpu.matmul %401, %400, %cst_166 {dimension_numbers = #tpu.dot_dimension_numbers<[1], [0], [0], [1], [0, 0, 1, 1], [], []>} : vector<2x128xbf16>, vector<128x128xbf16>, vector<2x128xf32> -> vector<2x128xf32>
    %c0_167 = arith.constant 0 : index
    %c0_168 = arith.constant 0 : index
    %403 = vector.load %arg23[%c0_167, %c0_168] : memref<128x128xbf16, #tpu.memory_space<vmem>>, vector<128x128xbf16>
    %404 = arith.truncf %399 : vector<2x128xf32> to vector<2x128xbf16>
    %cst_169 = arith.constant dense<0.000000e+00> : vector<2x128xf32>
    %405 = tpu.matmul %404, %403, %cst_169 {dimension_numbers = #tpu.dot_dimension_numbers<[1], [0], [0], [1], [0, 0, 1, 1], [], []>} : vector<2x128xbf16>, vector<128x128xbf16>, vector<2x128xf32> -> vector<2x128xf32>
    %406 = arith.addf %402, %405 : vector<2x128xf32>
    %c0_170 = arith.constant 0 : index
    %c0_171 = arith.constant 0 : index
    %407 = vector.load %arg24[%c0_170, %c0_171] : memref<1x128xf32, #tpu.memory_space<vmem>>, vector<1x128xf32>
    %408 = vector.broadcast %407 : vector<1x128xf32> to vector<2x128xf32>
    %409 = arith.addf %406, %408 : vector<2x128xf32>
    %c0_172 = arith.constant 0 : index
    %c0_173 = arith.constant 0 : index
    %410 = vector.load %arg26[%c0_172, %c0_173] : memref<128x128xbf16, #tpu.memory_space<vmem>>, vector<128x128xbf16>
    %411 = arith.truncf %0 : vector<2x128xf32> to vector<2x128xbf16>
    %cst_174 = arith.constant dense<0.000000e+00> : vector<2x128xf32>
    %412 = tpu.matmul %411, %410, %cst_174 {dimension_numbers = #tpu.dot_dimension_numbers<[1], [0], [0], [1], [0, 0, 1, 1], [], []>} : vector<2x128xbf16>, vector<128x128xbf16>, vector<2x128xf32> -> vector<2x128xf32>
    %c0_175 = arith.constant 0 : index
    %c0_176 = arith.constant 0 : index
    %413 = vector.load %arg27[%c0_175, %c0_176] : memref<1x128xf32, #tpu.memory_space<vmem>>, vector<1x128xf32>
    %414 = vector.broadcast %413 : vector<1x128xf32> to vector<2x128xf32>
    %415 = arith.addf %412, %414 : vector<2x128xf32>
    %c0_177 = arith.constant 0 : index
    %c0_178 = arith.constant 0 : index
    %416 = vector.load %arg28[%c0_177, %c0_178] : memref<128x128xbf16, #tpu.memory_space<vmem>>, vector<128x128xbf16>
    %417 = arith.truncf %409 : vector<2x128xf32> to vector<2x128xbf16>
    %cst_179 = arith.constant dense<0.000000e+00> : vector<2x128xf32>
    %418 = tpu.matmul %417, %416, %cst_179 {dimension_numbers = #tpu.dot_dimension_numbers<[1], [0], [0], [1], [0, 0, 1, 1], [], []>} : vector<2x128xbf16>, vector<128x128xbf16>, vector<2x128xf32> -> vector<2x128xf32>
    %c0_180 = arith.constant 0 : index
    %c0_181 = arith.constant 0 : index
    %419 = vector.load %arg29[%c0_180, %c0_181] : memref<128x128xbf16, #tpu.memory_space<vmem>>, vector<128x128xbf16>
    %420 = arith.truncf %415 : vector<2x128xf32> to vector<2x128xbf16>
    %cst_182 = arith.constant dense<0.000000e+00> : vector<2x128xf32>
    %421 = tpu.matmul %420, %419, %cst_182 {dimension_numbers = #tpu.dot_dimension_numbers<[1], [0], [0], [1], [0, 0, 1, 1], [], []>} : vector<2x128xbf16>, vector<128x128xbf16>, vector<2x128xf32> -> vector<2x128xf32>
    %422 = arith.addf %418, %421 : vector<2x128xf32>
    %c0_183 = arith.constant 0 : index
    %c0_184 = arith.constant 0 : index
    %423 = vector.load %arg30[%c0_183, %c0_184] : memref<1x128xf32, #tpu.memory_space<vmem>>, vector<1x128xf32>
    %424 = vector.broadcast %423 : vector<1x128xf32> to vector<2x128xf32>
    %425 = arith.addf %422, %424 : vector<2x128xf32>
    %cst_185 = arith.constant 0.000000e+00 : f32
    %426 = vector.broadcast %cst_185 : f32 to vector<2x128xf32>
    %427 = arith.cmpf ogt, %425, %426 : vector<2x128xf32>
    %428 = math.exp %425 : vector<2x128xf32>
    %cst_186 = arith.constant 1.000000e+00 : f32
    %429 = vector.broadcast %cst_186 : f32 to vector<2x128xf32>
    %430 = arith.subf %428, %429 : vector<2x128xf32>
    %431 = arith.select %427, %425, %430 : vector<2x128xi1>, vector<2x128xf32>
    %c0_187 = arith.constant 0 : index
    %c0_188 = arith.constant 0 : index
    %432 = vector.load %arg31[%c0_187, %c0_188] : memref<128x128xbf16, #tpu.memory_space<vmem>>, vector<128x128xbf16>
    %433 = arith.truncf %431 : vector<2x128xf32> to vector<2x128xbf16>
    %cst_189 = arith.constant dense<0.000000e+00> : vector<2x128xf32>
    %434 = tpu.matmul %433, %432, %cst_189 {dimension_numbers = #tpu.dot_dimension_numbers<[1], [0], [0], [1], [0, 0, 1, 1], [], []>} : vector<2x128xbf16>, vector<128x128xbf16>, vector<2x128xf32> -> vector<2x128xf32>
    %c0_190 = arith.constant 0 : index
    %c0_191 = arith.constant 0 : index
    %435 = vector.load %arg32[%c0_190, %c0_191] : memref<1x128xf32, #tpu.memory_space<vmem>>, vector<1x128xf32>
    %436 = vector.broadcast %435 : vector<1x128xf32> to vector<2x128xf32>
    %437 = arith.addf %434, %436 : vector<2x128xf32>
    %c0_192 = arith.constant 0 : index
    %c0_193 = arith.constant 0 : index
    %438 = vector.load %arg33[%c0_192, %c0_193] : memref<2x128xf32, #tpu.memory_space<vmem>>, vector<2x128xf32>
    tpu.vector_store %arg33[%c0_192, %c0_193], %437 {strides = array<i32>} : memref<2x128xf32, #tpu.memory_space<vmem>>, vector<2x128xf32>,
    return
  }
}

</mosaic_0001>

<bundles_post_ra>
// kernel: tpu_custom_call.1
= control target key start
LH: loop header
LB: loop body
LE: loop exit
PB: predicated region body
PF: predicated region fallthrough
CT: control target
= control target key end

     0   :  { %s6070_s6 = smov 1   ;;  %s6071_s10 = smov 2   ;;  %s6936_s0 = inlined_call_operand.smem [shape: u32[34], index: -1, kind: input, shape index: {}] }
   0x1   :  { %s6136_s5 = sld [smem:[%s6936_s0]]   ;;  %s6072_s14 = smov 3  }
   0x2   :  { %s6141_s9 = sld [smem:[%s6936_s0 + %s6070_s6]]   ;;  %s6073_s18 = smov 4  }
   0x3   :  { %s6146_s13 = sld [smem:[%s6936_s0 + %s6071_s10]]   ;;  %s6074_s22 = smov 5  }
   0x4   :  { %s6151_s17 = sld [smem:[%s6936_s0 + %s6072_s14]]   ;;  %s6075_s26 = smov 6  }
   0x5   :  { %s6156_s21 = sld [smem:[%s6936_s0 + %s6073_s18]]   ;;  %s6076_s30 = smov 7  }
   0x6   :  { %s6161_s25 = sld [smem:[%s6936_s0 + %s6074_s22]]   ;;  %s6077_s4 = smov 8  }
   0x7   :  { %s6166_s29 = sld [smem:[%s6936_s0 + %s6075_s26]]   ;;  %s6078_s10 = smov 9  }
   0x8   :  { %6942 = sst [smem:[#allocation41_spill]] %s6141_s9  ;;  %s6079_s15 = smov 10  }
   0x9   :  { %s6171_s3 = sld [smem:[%s6936_s0 + %s6076_s30]]   ;;  %s6080_s20 = smov 11  }
   0xa   :  { %s6176_s8 = sld [smem:[%s6936_s0 + %s6077_s4]]   ;;  %s6081_s26 = smov 12  }
   0xb   :  { %6943 = sst [smem:[#allocation42_spill]] %s6156_s21  ;;  %s6082_s1 = smov 13  }
   0xc   :  { %s6181_s14 = sld [smem:[%s6936_s0 + %s6078_s10]]   ;;  %s6083_s7 = smov 14  }
   0xd   :  { %6944 = sst [smem:[#allocation43_spill]] %s6166_s29  ;;  %s6085_s22 = smov 16  }
   0xe   :  { %s4059_s19 = sld [smem:[%s6936_s0 + %s6079_s15]]   ;;  %s6084_s15 = smov 15  }
   0xf   :  { %s6189_s24 = sld [smem:[%s6936_s0 + %s6080_s20]]   ;;  %s6086_s28 = smov 17  }
  0x10   :  { %6945 = sst [smem:[#allocation44_spill]] %s6176_s8  ;;  %s6088_s16 = smov 19  }
  0x11   :  { %s6194_s30 = sld [smem:[%s6936_s0 + %s6081_s26]]  }
  0x12   :  { %6946 = sst [smem:[#allocation45_spill]] %s6181_s14 }
  0x13   :  { %s6199_s6 = sld [smem:[%s6936_s0 + %s6082_s1]]  }
  0x14   :  { %s6204_s12 = sld [smem:[%s6936_s0 + %s6083_s7]]   ;;  %v72_v0 = vstv %s4059_s19  ;;  %s6087_s7 = smov 18  }
  0x15   :  { %s6209_s20 = sld [smem:[%s6936_s0 + %s6084_s15]]   ;;  %73 = vst [vmem:[#allocation2] sm:$0x1] %v72_v0  ;;  %s6089_s19 = smov 20  }
  0x16   :  { %s6214_s27 = sld [smem:[%s6936_s0 + %s6085_s22]]  }
  0x17   :  { %6947 = sst [smem:[#allocation46_spill]] %s6194_s30  ;;  %s6092_s30 = smov 24  }
  0x18   :  { %s6219_s4 = sld [smem:[%s6936_s0 + %s6086_s28]]   ;;  %s6090_s28 = smov 22  }
  0x19   :  { %s6224_s15 = sld [smem:[%s6936_s0 + %s6087_s7]]   ;;  %s6091_s7 = smov 23  }
  0x1a   :  { %6948 = sst [smem:[#allocation47_spill]] %s6204_s12 }
  0x1b   :  { %s6229_s22 = sld [smem:[%s6936_s0 + %s6088_s16]]  }
  0x1c   :  { %s6234_s1 = sld [smem:[%s6936_s0 + %s6089_s19]]   ;;  %s6093_s19 = smov 25  }
  0x1d   :  { %s6239_s12 = sld [smem:[%s6936_s0 + %s6090_s28]]  }
  0x1e   :  { %6949 = sst [smem:[#allocation48_spill]] %s6219_s4  ;;  %s6094_s4 = smov 26  }
  0x1f   :  { %s6244_s14 = sld [smem:[%s6936_s0 + %s6091_s7]]   ;;  %s6095_s7 = smov 27  }
  0x20   :  { %s6259_s8 = sld [smem:[%s6936_s0 + %s6094_s4]]   ;;  %s6098_s4 = smov 30  }
  0x21   :  { %6950 = sst [smem:[#allocation49_spill]] %s6229_s22 }
  0x22   :  { %6951 = sst [smem:[#allocation50_spill]] %s6234_s1 }
  0x23   :  { %s6249_s22 = sld [smem:[%s6936_s0 + %s6092_s30]]   ;;  %s6096_s30 = smov 28  }
  0x24   :  { %s6254_s1 = sld [smem:[%s6936_s0 + %s6093_s19]]   ;;  %s6097_s19 = smov 29  }
  0x25   :  { %s6264_s29 = sld [smem:[%s6936_s0 + %s6095_s7]]   ;;  %s6099_s7 = smov 31  }
  0x26   :  { %s6279_s21 = sld [smem:[%s6936_s0 + %s6098_s4]]   ;;  %s6102_s4 = smov 21  }
  0x29   :  { %6952 = sst [smem:[#allocation51_spill]] %s6249_s22 }
  0x2a   :  { %6953 = sst [smem:[#allocation52_spill]] %s6254_s1 }
  0x2b   :  { %6954 = sst [smem:[#allocation53_spill]] %s6264_s29 }
  0x2c   :  { %s6269_s22 = sld [smem:[%s6936_s0 + %s6096_s30]]   ;;  %s6100_s30 = smov 32  }
  0x2d   :  { %s6274_s1 = sld [smem:[%s6936_s0 + %s6097_s19]]   ;;  %s6101_s19 = smov 33  }
  0x2e   :  { %6956 = sst [smem:[#allocation55_spill]] %s6279_s21 }
  0x2f   :  { %s6284_s29 = sld [smem:[%s6936_s0 + %s6099_s7]]  }
  0x30   :  { %s6289_s9 = sld [smem:[%s6936_s0 + %s6100_s30]]  }
  0x31   :  { %s4070_s21 = sld [smem:[%s6936_s0 + %s6102_s4]]  }
  0x33   :  { %6955 = sst [smem:[#allocation54_spill]] %s6274_s1 }
  0x34   :  { %s6294_s1 = sld [smem:[%s6936_s0 + %s6101_s19]]  }
  0x37   :  { %v74_v1 = vstv %s4070_s21 }
  0x38   :  { %75 = vst [vmem:[#allocation3] sm:$0x1] %v74_v1 }
  0x39   :  { %76 = vsyncpa [#allocation5], 0 }
  0x3a   :  { %77 = vsyncpa [#allocation8], 0 }
  0x3b   :  { %78 = vsyncpa [#allocation11], 0 }
  0x3c   :  { %79 = vsyncpa [#allocation14], 0 }
  0x3d   :  { %80 = vsyncpa [#allocation17], 0 }
  0x3e   :  { %81 = vsyncpa [#allocation20], 0 }
  0x3f   :  { %82 = vsyncpa [#allocation23], 0 }
  0x40   :  { %83 = vsyncpa [#allocation26], 0 }
  0x41   :  { %84 = vsyncpa [#allocation29], 0  ;;  %s105_s7 = sshll.u32 %s6146_s13, 4  ;;  %s106_s7 = int_to_ptr.hbm [resolvable:$true] %s105_s7 }
  0x42   :  { %85 = vsyncpa [#allocation6], 0  ;;  %s6103_s10 = smov [#allocation7]   ;;  %s5642_s0 = sshra.s32 %s106_s7, 4  ;;  %s5643_s0 = int_to_ptr.hbm [resolvable:$true] %s5642_s0 }
  0x43   :  { %s107_s11 = sshll.u32 %s6103_s10, 4  ;;  %s5644_s21 = scalar_lea.hbm %s5643_s0, 16  ;;  %s108_s11 = int_to_ptr.vmem [resolvable:$true] %s107_s11 }
  0x44   :  { %p5645_p0 = scmp.ne.s32.totalorder %s5643_s0, %s5644_s21  ;;  %s5646_s30 = scalar_lea.hbm %s6146_s13, 16 }
  0x45   :  { %p5647_p1 = scmp.lt.s32.totalorder %s5643_s0, %s6146_s13  ;;  %p5648_p2 = scmp.lt.s32.totalorder %s5646_s30, %s5644_s21 }
  0x47   :  { %p5649_p3 = por %p5648_p2, %p5647_p1 }
  0x49   :  { %p5650_p4 = pnand %p5649_p3, %p5645_p0 }
  0x4b   :  { %5653 = shalt.err (!%p5650_p4)
}
  0x4c   :  { %s6104_s16 = smov 128   ;;  %s6105_s18 = smov 8  }
  0x4d   :  { %113 = dma.hbm_to_vmem [thread:$0]  %s106_s7, 256, %s108_s11, [#allocation8], %s6104_s16, %s6104_s16, %s6105_s18  }
  0x4e   :  { %s133_s19 = sshll.u32 %s6161_s25, 4  ;;  %s6106_s23 = smov [#allocation10]   ;;  %s134_s19 = int_to_ptr.hbm [resolvable:$true] %s133_s19 }
  0x4f   :  { %s135_s26 = sshll.u32 %s6106_s23, 4  ;;  %s167_s4 = sshll.u32 %s6189_s24, 4  ;;  %s136_s26 = int_to_ptr.vmem [resolvable:$true] %s135_s26  ;;  %s6304_s4 = int_to_ptr.hbm [resolvable:$true] %s167_s4 }
  0x50   :  { %s5666_s13 = sshra.s32 %s134_s19, 4  ;;  %s5670_s2 = scalar_lea.hbm %s6161_s25, 64  ;;  %s5667_s13 = int_to_ptr.hbm [resolvable:$true] %s5666_s13 }
  0x51   :  { %s5668_s28 = scalar_lea.hbm %s5667_s13, 64  ;;  %p5671_p6 = scmp.lt.s32.totalorder %s5667_s13, %s6161_s25 }
  0x52   :  { %p5669_p5 = scmp.ne.s32.totalorder %s5667_s13, %s5668_s28  ;;  %p5672_p7 = scmp.lt.s32.totalorder %s5670_s2, %s5668_s28 }
  0x54   :  { %p5673_p8 = por %p5672_p7, %p5671_p6 }
  0x56   :  { %p5674_p9 = pnand %p5673_p8, %p5669_p5 }
  0x58   :  { %5677 = shalt.err (!%p5674_p9)
}
  0x59   :  { %s6107_s10 = smov 64   ;;  %s6108_s7 = smov 4  }
  0x5a   :  { %141 = dma.hbm_to_vmem [thread:$0]  %s134_s19, 1024, %s136_s26, [#allocation11], %s6107_s10, %s6107_s10, %s6108_s7  }
  0x5b   :  { %s197_s11 = sshll.u32 %s6209_s20, 4  ;;  %s6109_s0 = smov [#allocation13]   ;;  %s6312_s11 = int_to_ptr.hbm [resolvable:$true] %s197_s11 }
  0x5c   :  { %s169_s21 = sshll.u32 %s6109_s0, 4  ;;  %s5690_s25 = sshra.s32 %s6304_s4, 4  ;;  %s170_s21 = int_to_ptr.vmem [resolvable:$true] %s169_s21  ;;  %s5691_s25 = int_to_ptr.hbm [resolvable:$true] %s5690_s25 }
  0x5d   :  { %s5692_s30 = scalar_lea.hbm %s5691_s25, 64  ;;  %s5694_s16 = scalar_lea.hbm %s6189_s24, 64 }
  0x5e   :  { %p5693_p10 = scmp.ne.s32.totalorder %s5691_s25, %s5692_s30  ;;  %p5695_p11 = scmp.lt.s32.totalorder %s5691_s25, %s6189_s24 }
  0x5f   :  { %p5696_p12 = scmp.lt.s32.totalorder %s5694_s16, %s5692_s30 }
  0x61   :  { %p5697_p13 = por %p5696_p12, %p5695_p11 }
  0x63   :  { %p5698_p0 = pnand %p5697_p13, %p5693_p10 }
  0x65   :  { %5701 = shalt.err (!%p5698_p0)
}
  0x66   :  { %175 = dma.hbm_to_vmem [thread:$0]  %s6304_s4, 1024, %s170_s21, [#allocation14], %s6107_s10, %s6107_s10, %s6108_s7  }
  0x67   :  { %s6110_s18 = smov [#allocation16]   ;;  %s225_s23 = sshll.u32 %s6224_s15, 4  ;;  %s6322_s23 = int_to_ptr.hbm [resolvable:$true] %s225_s23 }
  0x68   :  { %s199_s19 = sshll.u32 %s6110_s18, 4  ;;  %s5714_s24 = sshra.s32 %s6312_s11, 4  ;;  %s200_s19 = int_to_ptr.vmem [resolvable:$true] %s199_s19  ;;  %s5715_s24 = int_to_ptr.hbm [resolvable:$true] %s5714_s24 }
  0x69   :  { %s5716_s26 = scalar_lea.hbm %s5715_s24, 64  ;;  %s5718_s13 = scalar_lea.hbm %s6209_s20, 64 }
  0x6a   :  { %p5717_p1 = scmp.ne.s32.totalorder %s5715_s24, %s5716_s26  ;;  %p5719_p2 = scmp.lt.s32.totalorder %s5715_s24, %s6209_s20 }
  0x6b   :  { %p5720_p3 = scmp.lt.s32.totalorder %s5718_s13, %s5716_s26 }
  0x6d   :  { %p5721_p4 = por %p5720_p3, %p5719_p2 }
  0x6f   :  { %p5722_p5 = pnand %p5721_p4, %p5717_p1 }
  0x71   :  { %5725 = shalt.err (!%p5722_p5)
}
  0x72   :  { %205 = dma.hbm_to_vmem [thread:$0]  %s6312_s11, 1024, %s200_s19, [#allocation17], %s6107_s10, %s6107_s10, %s6108_s7  }
  0x73   :  { %s257_s4 = sshll.u32 %s6244_s14, 4  ;;  %s6111_s28 = smov [#allocation19]   ;;  %s6332_s4 = int_to_ptr.hbm [resolvable:$true] %s257_s4 }
  0x74   :  { %s227_s2 = sshll.u32 %s6111_s28, 4  ;;  %s5738_s20 = sshra.s32 %s6322_s23, 4  ;;  %s228_s2 = int_to_ptr.vmem [resolvable:$true] %s227_s2  ;;  %s5739_s20 = int_to_ptr.hbm [resolvable:$true] %s5738_s20 }
  0x75   :  { %s5740_s0 = scalar_lea.hbm %s5739_s20, 64  ;;  %s5742_s21 = scalar_lea.hbm %s6224_s15, 64 }
  0x76   :  { %p5741_p6 = scmp.ne.s32.totalorder %s5739_s20, %s5740_s0  ;;  %p5743_p7 = scmp.lt.s32.totalorder %s5739_s20, %s6224_s15 }
  0x77   :  { %p5744_p8 = scmp.lt.s32.totalorder %s5742_s21, %s5740_s0 }
  0x79   :  { %p5745_p9 = por %p5744_p8, %p5743_p7 }
  0x7b   :  { %p5746_p10 = pnand %p5745_p9, %p5741_p6 }
  0x7d   :  { %5749 = shalt.err (!%p5746_p10)
}
  0x7e   :  { %233 = dma.hbm_to_vmem [thread:$0]  %s6322_s23, 1024, %s228_s2, [#allocation20], %s6107_s10, %s6107_s10, %s6108_s7  }
  0x7f   :  { %s6112_s11 = smov [#allocation22]   ;;  %s289_s30 = sshll.u32 %s6269_s22, 4  ;;  %s6342_s30 = int_to_ptr.hbm [resolvable:$true] %s289_s30 }
  0x80   :  { %s259_s25 = sshll.u32 %s6112_s11, 4  ;;  %s5762_s15 = sshra.s32 %s6332_s4, 4  ;;  %s260_s25 = int_to_ptr.vmem [resolvable:$true] %s259_s25  ;;  %s5763_s15 = int_to_ptr.hbm [resolvable:$true] %s5762_s15 }
  0x81   :  { %s5764_s16 = scalar_lea.hbm %s5763_s15, 64  ;;  %s5766_s18 = scalar_lea.hbm %s6244_s14, 64 }
  0x82   :  { %p5765_p11 = scmp.ne.s32.totalorder %s5763_s15, %s5764_s16  ;;  %p5767_p12 = scmp.lt.s32.totalorder %s5763_s15, %s6244_s14 }
  0x83   :  { %p5768_p13 = scmp.lt.s32.totalorder %s5766_s18, %s5764_s16 }
  0x85   :  { %p5769_p0 = por %p5768_p13, %p5767_p12 }
  0x87   :  { %p5770_p1 = pnand %p5769_p0, %p5765_p11 }
  0x89   :  { %5773 = shalt.err (!%p5770_p1)
}
  0x8a   :  { %265 = dma.hbm_to_vmem [thread:$0]  %s6332_s4, 1024, %s260_s25, [#allocation23], %s6107_s10, %s6107_s10, %s6108_s7  }
  0x8b   :  { %s90_s19 = sshll.u32 %s6136_s5, 4  ;;  %s6113_s23 = smov [#allocation25]   ;;  %s6352_s19 = int_to_ptr.hbm [resolvable:$true] %s90_s19 }
  0x8c   :  { %s291_s24 = sshll.u32 %s6113_s23, 4  ;;  %s5786_s14 = sshra.s32 %s6342_s30, 4  ;;  %s292_s24 = int_to_ptr.vmem [resolvable:$true] %s291_s24  ;;  %s5787_s14 = int_to_ptr.hbm [resolvable:$true] %s5786_s14 }
  0x8d   :  { %s5788_s26 = scalar_lea.hbm %s5787_s14, 64  ;;  %s5790_s13 = scalar_lea.hbm %s6269_s22, 64 }
  0x8e   :  { %p5789_p2 = scmp.ne.s32.totalorder %s5787_s14, %s5788_s26  ;;  %p5791_p3 = scmp.lt.s32.totalorder %s5787_s14, %s6269_s22 }
  0x8f   :  { %p5792_p4 = scmp.lt.s32.totalorder %s5790_s13, %s5788_s26 }
  0x91   :  { %p5793_p5 = por %p5792_p4, %p5791_p3 }
  0x93   :  { %p5794_p6 = pnand %p5793_p5, %p5789_p2 }
  0x95   :  { %5797 = shalt.err (!%p5794_p6)
}
  0x96   :  { %297 = dma.hbm_to_vmem [thread:$0]  %s6342_s30, 1024, %s292_s24, [#allocation26], %s6107_s10, %s6107_s10, %s6108_s7  }
  0x97   :  { %s6114_s4 = smov [#allocation4]   ;;  %s118_s2 = sshll.u32 %s6151_s17, 4  ;;  %s119_s2 = int_to_ptr.hbm [resolvable:$true] %s118_s2 }
  0x98   :  { %s92_s28 = sshll.u32 %s6114_s4, 4  ;;  %s5810_s20 = sshra.s32 %s6352_s19, 4  ;;  %s93_s28 = int_to_ptr.vmem [resolvable:$true] %s92_s28  ;;  %s5811_s20 = int_to_ptr.hbm [resolvable:$true] %s5810_s20 }
  0x99   :  { %s5812_s22 = scalar_lea.hbm %s5811_s20, 128  ;;  %s5814_s0 = scalar_lea.hbm %s6136_s5, 128 }
  0x9a   :  { %p5813_p7 = scmp.ne.s32.totalorder %s5811_s20, %s5812_s22  ;;  %p5815_p8 = scmp.lt.s32.totalorder %s5811_s20, %s6136_s5 }
  0x9b   :  { %p5816_p9 = scmp.lt.s32.totalorder %s5814_s0, %s5812_s22 }
  0x9d   :  { %p5817_p10 = por %p5816_p9, %p5815_p8 }
  0x9f   :  { %p5818_p11 = pnand %p5817_p10, %p5813_p7 }
  0xa1   :  { %5821 = shalt.err (!%p5818_p11)
}
  0xa2   :  { %s6115_s21 = smov 1024   ;;  %s6116_s11 = smov [#allocation9]  }
  0xa3   :  { %98 = dma.hbm_to_vmem [thread:$0]  %s6352_s19, 2048, %s93_s28, [#allocation5], %s6115_s21, %s6115_s21, %s6107_s10  }
  0xa4   :  { %s120_s25 = sshll.u32 %s6116_s11, 4  ;;  %s148_s30 = sshll.u32 %s6171_s3, 4  ;;  %s121_s25 = int_to_ptr.vmem [resolvable:$true] %s120_s25  ;;  %s6368_s30 = int_to_ptr.hbm [resolvable:$true] %s148_s30 }
  0xa5   :  { %s5834_s15 = sshra.s32 %s119_s2, 4  ;;  %s5838_s16 = scalar_lea.hbm %s6151_s17, 1024  ;;  %s5835_s15 = int_to_ptr.hbm [resolvable:$true] %s5834_s15 }
  0xa6   :  { %s5836_s5 = scalar_lea.hbm %s5835_s15, 1024  ;;  %p5839_p13 = scmp.lt.s32.totalorder %s5835_s15, %s6151_s17 }
  0xa7   :  { %p5837_p12 = scmp.ne.s32.totalorder %s5835_s15, %s5836_s5  ;;  %p5840_p0 = scmp.lt.s32.totalorder %s5838_s16, %s5836_s5 }
  0xa9   :  { %p5841_p1 = por %p5840_p0, %p5839_p13 }
  0xab   :  { %p5842_p2 = pnand %p5841_p1, %p5837_p12 }
  0xad   :  { %5845 = shalt.err (!%p5842_p2)
}
  0xae   :  { %126 = dma.hbm_to_vmem [thread:$0]  %s119_s2, 16384, %s121_s25, [#allocation8], %s6107_s10, %s6107_s10, %s6108_s7  }
  0xaf   :  { %s6117_s18 = smov [#allocation12]   ;;  %s182_s23 = sshll.u32 %s6199_s6, 4  ;;  %s183_s23 = int_to_ptr.hbm [resolvable:$true] %s182_s23 }
  0xb0   :  { %s150_s19 = sshll.u32 %s6117_s18, 4  ;;  %s5858_s24 = sshra.s32 %s6368_s30, 4  ;;  %s151_s19 = int_to_ptr.vmem [resolvable:$true] %s150_s19  ;;  %s5859_s24 = int_to_ptr.hbm [resolvable:$true] %s5858_s24 }
  0xb1   :  { %s5860_s14 = scalar_lea.hbm %s5859_s24, 256  ;;  %s5862_s17 = scalar_lea.hbm %s6171_s3, 256 }
  0xb2   :  { %p5861_p3 = scmp.ne.s32.totalorder %s5859_s24, %s5860_s14  ;;  %p5863_p4 = scmp.lt.s32.totalorder %s5859_s24, %s6171_s3 }
  0xb3   :  { %p5864_p5 = scmp.lt.s32.totalorder %s5862_s17, %s5860_s14 }
  0xb5   :  { %p5865_p6 = por %p5864_p5, %p5863_p4 }
  0xb7   :  { %p5866_p7 = pnand %p5865_p6, %p5861_p3 }
  0xb9   :  { %5869 = shalt.err (!%p5866_p7)
}
  0xba   :  { %s6118_s26 = smov 256   ;;  %s6119_s13 = smov 16  }
  0xbb   :  { %156 = dma.hbm_to_vmem [thread:$0]  %s6368_s30, 4096, %s151_s19, [#allocation11], %s6118_s26, %s6118_s26, %s6119_s13  }
  0xbc   :  { %s6120_s4 = smov [#allocation15]   ;;  %s210_s2 = sshll.u32 %s6214_s27, 4  ;;  %s6381_s2 = int_to_ptr.hbm [resolvable:$true] %s210_s2 }
  0xbd   :  { %s184_s28 = sshll.u32 %s6120_s4, 4  ;;  %s5882_s20 = sshra.s32 %s183_s23, 4  ;;  %s185_s28 = int_to_ptr.vmem [resolvable:$true] %s184_s28  ;;  %s5883_s20 = int_to_ptr.hbm [resolvable:$true] %s5882_s20 }
  0xbe   :  { %s5884_s3 = scalar_lea.hbm %s5883_s20, 64  ;;  %s5886_s22 = scalar_lea.hbm %s6199_s6, 64 }
  0xbf   :  { %p5885_p8 = scmp.ne.s32.totalorder %s5883_s20, %s5884_s3  ;;  %p5887_p9 = scmp.lt.s32.totalorder %s5883_s20, %s6199_s6 }
  0xc0   :  { %p5888_p10 = scmp.lt.s32.totalorder %s5886_s22, %s5884_s3 }
  0xc2   :  { %p5889_p11 = por %p5888_p10, %p5887_p9 }
  0xc4   :  { %p5890_p12 = pnand %p5889_p11, %p5885_p8 }
  0xc6   :  { %5893 = shalt.err (!%p5890_p12)
}
  0xc7   :  { %190 = dma.hbm_to_vmem [thread:$0]  %s183_s23, 1024, %s185_s28, [#allocation14], %s6107_s10, %s6107_s10, %s6108_s7  }
  0xc8   :  { %s244_s0 = sshll.u32 %s6239_s12, 4  ;;  %s6121_s21 = smov [#allocation18]   ;;  %s6389_s0 = int_to_ptr.hbm [resolvable:$true] %s244_s0 }
  0xc9   :  { %s212_s11 = sshll.u32 %s6121_s21, 4  ;;  %s5906_s25 = sshra.s32 %s6381_s2, 4  ;;  %s213_s11 = int_to_ptr.vmem [resolvable:$true] %s212_s11  ;;  %s5907_s25 = int_to_ptr.hbm [resolvable:$true] %s5906_s25 }
  0xca   :  { %s5908_s6 = scalar_lea.hbm %s5907_s25, 64  ;;  %s5910_s30 = scalar_lea.hbm %s6214_s27, 64 }
  0xcb   :  { %p5909_p13 = scmp.ne.s32.totalorder %s5907_s25, %s5908_s6  ;;  %p5911_p0 = scmp.lt.s32.totalorder %s5907_s25, %s6214_s27 }
  0xcc   :  { %p5912_p1 = scmp.lt.s32.totalorder %s5910_s30, %s5908_s6 }
  0xce   :  { %p5913_p2 = por %p5912_p1, %p5911_p0 }
  0xd0   :  { %p5914_p3 = pnand %p5913_p2, %p5909_p13 }
  0xd2   :  { %5917 = shalt.err (!%p5914_p3)
}
  0xd3   :  { %218 = dma.hbm_to_vmem [thread:$0]  %s6381_s2, 1024, %s213_s11, [#allocation17], %s6107_s10, %s6107_s10, %s6108_s7  }
  0xd4   :  { %s6122_s15 = smov [#allocation21]   ;;  %s274_s16 = sshll.u32 %s6259_s8, 4  ;;  %s6399_s16 = int_to_ptr.hbm [resolvable:$true] %s274_s16 }
  0xd5   :  { %s246_s5 = sshll.u32 %s6122_s15, 4  ;;  %s5930_s27 = sshra.s32 %s6389_s0, 4  ;;  %s247_s5 = int_to_ptr.vmem [resolvable:$true] %s246_s5  ;;  %s5931_s27 = int_to_ptr.hbm [resolvable:$true] %s5930_s27 }
  0xd6   :  { %s5932_s18 = scalar_lea.hbm %s5931_s27, 64  ;;  %s5934_s19 = scalar_lea.hbm %s6239_s12, 64 }
  0xd7   :  { %p5933_p4 = scmp.ne.s32.totalorder %s5931_s27, %s5932_s18  ;;  %p5935_p5 = scmp.lt.s32.totalorder %s5931_s27, %s6239_s12 }
  0xd8   :  { %p5936_p6 = scmp.lt.s32.totalorder %s5934_s19, %s5932_s18 }
  0xda   :  { %p5937_p7 = por %p5936_p6, %p5935_p5 }
  0xdc   :  { %p5938_p8 = pnand %p5937_p7, %p5933_p4 }
  0xde   :  { %5941 = shalt.err (!%p5938_p8)
}
  0xdf   :  { %s6957_s23 = sld [smem:[#allocation54_spill]]  ;;  %s6123_s14 = smov [#allocation24]  }
  0xe0   :  { %252 = dma.hbm_to_vmem [thread:$0]  %s6389_s0, 1024, %s247_s5, [#allocation20], %s6107_s10, %s6107_s10, %s6108_s7  }
  0xe1   :  { %s276_s17 = sshll.u32 %s6123_s14, 4  ;;  %s5954_s12 = sshra.s32 %s6399_s16, 4  ;;  %s277_s17 = int_to_ptr.vmem [resolvable:$true] %s276_s17  ;;  %s5955_s12 = int_to_ptr.hbm [resolvable:$true] %s5954_s12 }
  0xe2   :  { %s5956_s26 = scalar_lea.hbm %s5955_s12, 64  ;;  %s5958_s13 = scalar_lea.hbm %s6259_s8, 64 }
  0xe3   :  { %p5957_p9 = scmp.ne.s32.totalorder %s5955_s12, %s5956_s26  ;;  %p5959_p10 = scmp.lt.s32.totalorder %s5955_s12, %s6259_s8 }
  0xe4   :  { %p5960_p11 = scmp.lt.s32.totalorder %s5958_s13, %s5956_s26 }
  0xe5   :  { %s302_s24 = sshll.u32 %s6957_s23, 4  ;;  %s6409_s24 = int_to_ptr.hbm [resolvable:$true] %s302_s24 }
  0xe6   :  { %p5961_p12 = por %p5960_p11, %p5959_p10 }
  0xe8   :  { %p5962_p13 = pnand %p5961_p12, %p5957_p9 }
  0xea   :  { %5965 = shalt.err (!%p5962_p13)
}
  0xeb   :  { %282 = dma.hbm_to_vmem [thread:$0]  %s6399_s16, 1024, %s277_s17, [#allocation23], %s6107_s10, %s6107_s10, %s6108_s7  }
  0xec   :  { %s6124_s4 = smov [#allocation27]   ;;  %s317_s2 = sshll.u32 %s6284_s29, 4  ;;  %s318_s2 = int_to_ptr.hbm [resolvable:$true] %s317_s2 }
  0xed   :  { %s304_s28 = sshll.u32 %s6124_s4, 4  ;;  %s5978_s20 = sshra.s32 %s6409_s24, 4  ;;  %s305_s28 = int_to_ptr.vmem [resolvable:$true] %s304_s28  ;;  %s5979_s20 = int_to_ptr.hbm [resolvable:$true] %s5978_s20 }
  0xee   :  { %s5980_s8 = scalar_lea.hbm %s5979_s20, 64  ;;  %s5982_s3 = scalar_lea.hbm %s6957_s23, 64 }
  0xef   :  { %p5981_p0 = scmp.ne.s32.totalorder %s5979_s20, %s5980_s8  ;;  %p5983_p1 = scmp.lt.s32.totalorder %s5979_s20, %s6957_s23 }
  0xf0   :  { %p5984_p2 = scmp.lt.s32.totalorder %s5982_s3, %s5980_s8 }
  0xf2   :  { %p5985_p3 = por %p5984_p2, %p5983_p1 }
  0xf4   :  { %p5986_p4 = pnand %p5985_p3, %p5981_p0 }
  0xf6   :  { %5989 = shalt.err (!%p5986_p4)
}
  0xf7   :  { %310 = dma.hbm_to_vmem [thread:$0]  %s6409_s24, 1024, %s305_s28, [#allocation26], %s6107_s10, %s6107_s10, %s6108_s7  }
  0xf8   :  { %s6125_s22 = smov [#allocation28]   ;;  %s6002_s21 = sshra.s32 %s318_s2, 4  ;;  %s6003_s21 = int_to_ptr.hbm [resolvable:$true] %s6002_s21 }
  0xf9   :  { %s319_s0 = sshll.u32 %s6125_s22, 4  ;;  %s6004_s11 = scalar_lea.hbm %s6003_s21, 64  ;;  %s320_s0 = int_to_ptr.vmem [resolvable:$true] %s319_s0 }
  0xfa   :  { %p6005_p5 = scmp.ne.s32.totalorder %s6003_s21, %s6004_s11  ;;  %s6006_s25 = scalar_lea.hbm %s6284_s29, 64 }
  0xfb   :  { %p6007_p6 = scmp.lt.s32.totalorder %s6003_s21, %s6284_s29  ;;  %p6008_p7 = scmp.lt.s32.totalorder %s6006_s25, %s6004_s11 }
  0xfd   :  { %p6009_p8 = por %p6008_p7, %p6007_p6 }
  0xff   :  { %p6010_p9 = pnand %p6009_p8, %p6005_p5 }
 0x101   :  { %6013 = shalt.err (!%p6010_p9)
}
 0x102   :  { %325 = dma.hbm_to_vmem [thread:$0]  %s318_s2, 1024, %s320_s0, [#allocation29], %s6107_s10, %s6107_s10, %s6108_s7  }
 0x103   :  { %6050 = dma.done.wait [#allocation5], 2048  }
 0x104   :  { %6051 = vsyncadd [#allocation5], 4294965248 }
 0x105   :  { %6052 = dma.done.wait [#allocation8], 16640  }
 0x106   :  { %6053 = vsyncadd [#allocation8], 4294950656 }
 0x107   :  { %6054 = dma.done.wait [#allocation11], 5120  }
 0x108   :  { %6055 = vsyncadd [#allocation11], 4294962176 }
 0x109   :  { %6056 = dma.done.wait [#allocation14], 2048  }
 0x10a   :  { %6057 = vsyncadd [#allocation14], 4294965248 }
 0x10b   :  { %6058 = dma.done.wait [#allocation17], 2048  }
 0x10c   :  { %6059 = vsyncadd [#allocation17], 4294965248 }
 0x10d   :  { %6060 = dma.done.wait [#allocation20], 2048  }
 0x10e   :  { %6061 = vsyncadd [#allocation20], 4294965248 }
 0x10f   :  { %6062 = dma.done.wait [#allocation23], 2048  }
 0x110   :  { %6063 = vsyncadd [#allocation23], 4294965248 }
 0x111   :  { %6064 = dma.done.wait [#allocation26], 2048  }
 0x112   :  { %6065 = vsyncadd [#allocation26], 4294965248 }
 0x113   :  { %6066 = dma.done.wait [#allocation29], 1024  }
 0x114   :  { %6067 = vsyncadd [#allocation29], 4294966272  ;;  %v5211_v2 = vld [vmem:[#allocation9 + $0x38] sm:$0xff]  ;;  %v5210_v6 = vld [vmem:[#allocation9 + $0x30] sm:$0xff]  ;;  %s6958_s29 = sld [smem:[#allocation41_spill]]  ;;  %vm2114_vm0 = vcmask 1041409  }
 0x115   :  { %v5227_v3 = vld [vmem:[#allocation9 + $0xb8] sm:$0xff]  ;;  %1519 = vmatpush.bf16.msra.mxu0 %v5211_v2  ;;  %v5226_v7 = vld [vmem:[#allocation9 + $0xb0] sm:$0xff]  ;;  %v5209_v10 = vld [vmem:[#allocation9 + $0x28] sm:$0xff]  ;;  %s6959_s10 = sld [smem:[#allocation42_spill]]  ;;  %vm2117_vm1 = vcmask 58368   ;;  %s6127_s17 = smov [#allocation30]  }
 0x116   :  { %v5219_v4 = vld [vmem:[#allocation9 + $0x78] sm:$0xff]  ;;  %1547 = vmatpush.bf16.msra.mxu2 %v5227_v3  ;;  %v5218_v8 = vld [vmem:[#allocation9 + $0x70] sm:$0xff]  ;;  %v5225_v11 = vld [vmem:[#allocation9 + $0xa8] sm:$0xff]  ;;  %s6960_s7 = sld [smem:[#allocation43_spill]]  ;;  %s4030_s12 = sshll.u32 %s6127_s17, 4  ;;  %s4031_s12 = int_to_ptr.vmem [resolvable:$true] %s4030_s12 }
 0x117   :  { %v5235_v5 = vld [vmem:[#allocation9 + $0xf8] sm:$0xff]  ;;  %1533 = vmatpush.bf16.msra.mxu1 %v5219_v4  ;;  %v5234_v9 = vld [vmem:[#allocation9 + $0xf0] sm:$0xff]  ;;  %v5217_v12 = vld [vmem:[#allocation9 + $0x68] sm:$0xff]  ;;  %s6961_s6 = sld [smem:[#allocation52_spill]]  ;;  %s4032_s26 = sshll.u32 %s6294_s1, 4  ;;  %s4033_s26 = int_to_ptr.hbm [resolvable:$true] %s4032_s26 }
 0x118   :  { %1561 = vmatpush.bf16.msra.mxu3 %v5235_v5  ;;  %v5233_v13 = vld [vmem:[#allocation9 + $0xe8] sm:$0xff]  ;;  %v5208_v14 = vld [vmem:[#allocation9 + $0x20] sm:$0xff]  ;;  %v5207_v18 = vld [vmem:[#allocation9 + $0x18] sm:$0xff]  ;;  %s6962_s30 = sld [smem:[#allocation44_spill]]  ;;  %s6038_s13 = sshra.s32 %s4033_s26, 4  ;;  %s6039_s13 = int_to_ptr.hbm [resolvable:$true] %s6038_s13 }
 0x119   :  { %1520 = vmatpush.bf16.msra.mxu0 %v5210_v6  ;;  %v5224_v15 = vld [vmem:[#allocation9 + $0xa0] sm:$0xff]  ;;  %v5223_v19 = vld [vmem:[#allocation9 + $0x98] sm:$0xff]  ;;  %v5206_v22 = vld [vmem:[#allocation9 + $0x10] sm:$0xff]  ;;  %s6963_s15 = sld [smem:[#allocation45_spill]]  ;;  %s6040_s4 = scalar_lea.hbm %s6039_s13, 2 }
 0x11a   :  { %1548 = vmatpush.bf16.msra.mxu2 %v5226_v7  ;;  %v5216_v16 = vld [vmem:[#allocation9 + $0x60] sm:$0xff]  ;;  %v5215_v20 = vld [vmem:[#allocation9 + $0x58] sm:$0xff]  ;;  %v5222_v23 = vld [vmem:[#allocation9 + $0x90] sm:$0xff]  ;;  %s6964_s5 = sld [smem:[#allocation47_spill]]  ;;  %p6041_p10 = scmp.ne.s32.totalorder %s6039_s13, %s6040_s4 }
 0x11b   :  { %1534 = vmatpush.bf16.msra.mxu1 %v5218_v8  ;;  %v5232_v17 = vld [vmem:[#allocation9 + $0xe0] sm:$0xff]  ;;  %v5231_v21 = vld [vmem:[#allocation9 + $0xd8] sm:$0xff]  ;;  %v5214_v24 = vld [vmem:[#allocation9 + $0x50] sm:$0xff]  ;;  %s6965_s16 = sld [smem:[#allocation46_spill]]  ;;  %s6042_s28 = scalar_lea.hbm %s6294_s1, 2 }
 0x11c   :  { %1562 = vmatpush.bf16.msra.mxu3 %v5234_v9  ;;  %v5230_v25 = vld [vmem:[#allocation9 + $0xd0] sm:$0xff]  ;;  %v5205_v26 = vld [vmem:[#allocation9 + $0x8] sm:$0xff]  ;;  %v5204_v30 = vld [vmem:[#allocation9] sm:$0xff]  ;;  %s6966_s27 = sld [smem:[#allocation48_spill]]  ;;  %p6043_p11 = scmp.lt.s32.totalorder %s6039_s13, %s6294_s1 }
 0x11d   :  { %1521 = vmatpush.bf16.msra.mxu0 %v5209_v10  ;;  %v5221_v27 = vld [vmem:[#allocation9 + $0x88] sm:$0xff]  ;;  %v5220_v31 = vld [vmem:[#allocation9 + $0x80] sm:$0xff]  ;;  %v5243_v32 = vld [vmem:[#allocation9 + $0x138] sm:$0xff]  ;;  %s6967_s18 = sld [smem:[#allocation49_spill]]  ;;  %p6044_p12 = scmp.lt.s32.totalorder %s6042_s28, %s6040_s4 }
 0x11e   :  { %1549 = vmatpush.bf16.msra.mxu2 %v5225_v11  ;;  %v5213_v28 = vld [vmem:[#allocation9 + $0x48] sm:$0xff]  ;;  %v5259_v33 = vld [vmem:[#allocation9 + $0x1b8] sm:$0xff]  ;;  %v5212_v34 = vld [vmem:[#allocation9 + $0x40] sm:$0xff]  ;;  %s6968_s19 = sld [smem:[#allocation50_spill]] }
 0x11f   :  { %1535 = vmatpush.bf16.msra.mxu1 %v5217_v12  ;;  %v5229_v29 = vld [vmem:[#allocation9 + $0xc8] sm:$0xff]  ;;  %v5228_v35 = vld [vmem:[#allocation9 + $0xc0] sm:$0xff]  ;;  %v4085_v36 = vld [vmem:[#allocation4] sm:$0xf]  ;;  %s6969_s23 = sld [smem:[#allocation51_spill]]  ;;  %p6045_p13 = por %p6044_p12, %p6043_p11 }
 0x120   :  { %1563 = vmatpush.bf16.msra.mxu3 %v5233_v13  ;;  %v5251_v37 = vld [vmem:[#allocation9 + $0x178] sm:$0xff]  ;;  %v5196_v38 = vld [vmem:[#allocation4 + $0x3c] sm:$0xf0]  ;;  %v5188_v42 = vld [vmem:[#allocation4 + $0x4] sm:$0xf]  ;;  %s6970_s24 = sld [smem:[#allocation53_spill]] }
 0x121   :  { %1522 = vmatpush.bf16.msra.mxu0 %v5208_v14  ;;  %v4093_v39 = vld [vmem:[#allocation4 + $0x8] sm:$0xf]  ;;  %v4087_v43 = vld [vmem:[#allocation4 + $0x40] sm:$0xf0]  ;;  %v5189_v44 = vld [vmem:[#allocation4 + $0xc] sm:$0xf]  ;;  %v4086_v46 = vor.u32 %v5196_v38, %v4085_v36  ;;  %p6046_p0 = pnand %p6045_p13, %p6041_p10 }
 0x122   :  { %1550 = vmatpush.bf16.msra.mxu2 %v5224_v15  ;;  %v5197_v40 = vld [vmem:[#allocation4 + $0x44] sm:$0xf0]  ;;  %v4095_v45 = vld [vmem:[#allocation4 + $0x48] sm:$0xf0]  ;;  %v5242_v48 = vld [vmem:[#allocation9 + $0x130] sm:$0xff]  ;;  %v4090_v50 = vor.u32 %v5188_v42, %v4087_v43  ;;  %s6971_s14 = sld [smem:[#allocation55_spill]] }
 0x123   :  { %1536 = vmatpush.bf16.msra.mxu1 %v5216_v16  ;;  %v5267_v41 = vld [vmem:[#allocation9 + $0x1f8] sm:$0xff]  ;;  %v4094_v47 = vor.u32 %v5197_v40, %v4093_v39  ;;  %v5258_v49 = vld [vmem:[#allocation9 + $0x1b0] sm:$0xff]  ;;  %v4098_v51 = vor.u32 %v5189_v44, %v4095_v45  ;;  %v5241_v54 = vld [vmem:[#allocation9 + $0x128] sm:$0xff] }
 0x124   :  { %1564 = vmatpush.bf16.msra.mxu3 %v5232_v17  ;;  %v5250_v52 = vld [vmem:[#allocation9 + $0x170] sm:$0xff]  ;;  %v5257_v55 = vld [vmem:[#allocation9 + $0x1a8] sm:$0xff]  ;;  %v5240_v58 = vld [vmem:[#allocation9 + $0x120] sm:$0xff] }
 0x125   :  { %1523 = vmatpush.bf16.msra.mxu0 %v5207_v18  ;;  %v5266_v53 = vld [vmem:[#allocation9 + $0x1f0] sm:$0xff]  ;;  %v5249_v56 = vld [vmem:[#allocation9 + $0x168] sm:$0xff]  ;;  %v5256_v59 = vld [vmem:[#allocation9 + $0x1a0] sm:$0xff] }
 0x126   :  { %1551 = vmatpush.bf16.msra.mxu2 %v5223_v19  ;;  %v5265_v57 = vld [vmem:[#allocation9 + $0x1e8] sm:$0xff]  ;;  %v5248_v60 = vld [vmem:[#allocation9 + $0x160] sm:$0xff]  ;;  %v5239_v62 = vld [vmem:[#allocation9 + $0x118] sm:$0xff] }
 0x127   :  { %1537 = vmatpush.bf16.msra.mxu1 %v5215_v20  ;;  %v5264_v61 = vld [vmem:[#allocation9 + $0x1e0] sm:$0xff]  ;;  %v5255_v63 = vld [vmem:[#allocation9 + $0x198] sm:$0xff]  ;;  %v5238_v2 = vld [vmem:[#allocation9 + $0x110] sm:$0xff] }
 0x128   :  { %1565 = vmatpush.bf16.msra.mxu3 %v5231_v21  ;;  %v5247_v0 = vld [vmem:[#allocation9 + $0x158] sm:$0xff]  ;;  %v5254_v3 = vld [vmem:[#allocation9 + $0x190] sm:$0xff]  ;;  %v5237_v6 = vld [vmem:[#allocation9 + $0x108] sm:$0xff] }
 0x129   :  { %1524 = vmatpush.bf16.msra.mxu0 %v5206_v22  ;;  %v5263_v1 = vld [vmem:[#allocation9 + $0x1d8] sm:$0xff]  ;;  %v5246_v4 = vld [vmem:[#allocation9 + $0x150] sm:$0xff]  ;;  %v5253_v7 = vld [vmem:[#allocation9 + $0x188] sm:$0xff] }
 0x12a   :  { %1552 = vmatpush.bf16.msra.mxu2 %v5222_v23  ;;  %v5262_v5 = vld [vmem:[#allocation9 + $0x1d0] sm:$0xff]  ;;  %v5245_v8 = vld [vmem:[#allocation9 + $0x148] sm:$0xff]  ;;  %v5236_v10 = vld [vmem:[#allocation9 + $0x100] sm:$0xff] }
 0x12b   :  { %1538 = vmatpush.bf16.msra.mxu1 %v5214_v24  ;;  %v5261_v9 = vld [vmem:[#allocation9 + $0x1c8] sm:$0xff]  ;;  %v5252_v11 = vld [vmem:[#allocation9 + $0x180] sm:$0xff]  ;;  %v5275_v12 = vld [vmem:[#allocation9 + $0x238] sm:$0xff] }
 0x12c   :  { %1566 = vmatpush.bf16.msra.mxu3 %v5230_v25  ;;  %v5291_v13 = vld [vmem:[#allocation9 + $0x2b8] sm:$0xff]  ;;  %v4101_v14 = vld [vmem:[#allocation4 + $0x10] sm:$0xf]  ;;  %v4109_v16 = vld [vmem:[#allocation4 + $0x18] sm:$0xf] }
 0x12d   :  { %1525 = vmatpush.bf16.msra.mxu0 %v5205_v26  ;;  %v5198_v15 = vld [vmem:[#allocation4 + $0x4c] sm:$0xf0]  ;;  %v5199_v17 = vld [vmem:[#allocation4 + $0x54] sm:$0xf0]  ;;  %v5190_v20 = vld [vmem:[#allocation4 + $0x14] sm:$0xf] }
 0x12e   :  { %1553 = vmatpush.bf16.msra.mxu2 %v5221_v27  ;;  %v5244_v18 = vld [vmem:[#allocation9 + $0x140] sm:$0xff]  ;;  %v5191_v22 = vld [vmem:[#allocation4 + $0x1c] sm:$0xf]  ;;  %v4102_v24 = vor.u32 %v5198_v15, %v4101_v14  ;;  %v4110_v25 = vor.u32 %v5199_v17, %v4109_v16  ;;  %v5283_v26 = vld [vmem:[#allocation9 + $0x278] sm:$0xff] }
 0x12f   :  { %1539 = vmatpush.bf16.msra.mxu1 %v5213_v28  ;;  %v5260_v19 = vld [vmem:[#allocation9 + $0x1c0] sm:$0xff]  ;;  %v4111_v23 = vld [vmem:[#allocation4 + $0x58] sm:$0xf0]  ;;  %v5299_v27 = vld [vmem:[#allocation9 + $0x2f8] sm:$0xff] }
 0x130   :  { %1567 = vmatpush.bf16.msra.mxu3 %v5229_v29  ;;  %v4103_v21 = vld [vmem:[#allocation4 + $0x50] sm:$0xf0]  ;;  %v4114_v29 = vor.u32 %v5191_v22, %v4111_v23  ;;  %v5281_v36 = vld [vmem:[#allocation9 + $0x268] sm:$0xff]  ;;  %v5271_v42 = vld [vmem:[#allocation9 + $0x218] sm:$0xff] }
 0x131   :  { %1526 = vmatpush.bf16.msra.mxu0 %v5204_v30  ;;  %v4106_v28 = vor.u32 %v5190_v20, %v4103_v21  ;;  %v5274_v30 = vld [vmem:[#allocation9 + $0x230] sm:$0xff]  ;;  %v5272_v38 = vld [vmem:[#allocation9 + $0x220] sm:$0xff]  ;;  %v5287_v43 = vld [vmem:[#allocation9 + $0x298] sm:$0xff] }
 0x132   :  { %1554 = vmatpush.bf16.msra.mxu2 %v5220_v31  ;;  %v5290_v31 = vld [vmem:[#allocation9 + $0x2b0] sm:$0xff]  ;;  %v5288_v39 = vld [vmem:[#allocation9 + $0x2a0] sm:$0xff]  ;;  %v5279_v44 = vld [vmem:[#allocation9 + $0x258] sm:$0xff] }
 0x133   :  { %1540 = vmatpush.bf16.msra.mxu1 %v5212_v34  ;;  %v5273_v34 = vld [vmem:[#allocation9 + $0x228] sm:$0xff]  ;;  %v5280_v40 = vld [vmem:[#allocation9 + $0x260] sm:$0xff]  ;;  %v5295_v45 = vld [vmem:[#allocation9 + $0x2d8] sm:$0xff] }
 0x134   :  { %1568 = vmatpush.bf16.msra.mxu3 %v5228_v35  ;;  %1527 = vmatmul.bf16.vlgmr.msra.gmra.mxu0 %v4086_v46  ;;  %v5289_v35 = vld [vmem:[#allocation9 + $0x2a8] sm:$0xff]  ;;  %v5270_v46 = vld [vmem:[#allocation9 + $0x210] sm:$0xff]  ;;  %v5312_v20 = vld [vmem:[#allocation9 + $0x360] sm:$0xff] }
 0x135   :  { %1575 = vmatpush.bf16.msrb.mxu0 %v5243_v32  ;;  %1555 = vmatmul.bf16.vlgmr.msra.gmra.mxu2 %v4094_v47  ;;  %v5282_v32 = vld [vmem:[#allocation9 + $0x270] sm:$0xff]  ;;  %v5305_v14 = vld [vmem:[#allocation9 + $0x328] sm:$0xff]  ;;  %v5328_v21 = vld [vmem:[#allocation9 + $0x3e0] sm:$0xff] }
 0x136   :  { %1603 = vmatpush.bf16.msrb.mxu2 %v5259_v33  ;;  %1541 = vmatmul.bf16.vlgmr.msra.gmra.mxu1 %v4090_v50  ;;  %v5298_v33 = vld [vmem:[#allocation9 + $0x2f0] sm:$0xff]  ;;  %v5269_v50 = vld [vmem:[#allocation9 + $0x208] sm:$0xff]  ;;  %v5303_v22 = vld [vmem:[#allocation9 + $0x318] sm:$0xff] }
 0x137   :  { %1589 = vmatpush.bf16.msrb.mxu1 %v5251_v37  ;;  %1569 = vmatmul.bf16.vlgmr.msra.gmra.mxu3 %v4098_v51  ;;  %v5297_v37 = vld [vmem:[#allocation9 + $0x2e8] sm:$0xff]  ;;  %v5286_v47 = vld [vmem:[#allocation9 + $0x290] sm:$0xff]  ;;  %v5319_v23 = vld [vmem:[#allocation9 + $0x398] sm:$0xff] }
 0x138   :  { %1617 = vmatpush.bf16.msrb.mxu3 %v5267_v41  ;;  %v5296_v41 = vld [vmem:[#allocation9 + $0x2e0] sm:$0xff]  ;;  %v5285_v51 = vld [vmem:[#allocation9 + $0x288] sm:$0xff] }
 0x139   :  { %1576 = vmatpush.bf16.msrb.mxu0 %v5242_v48  ;;  %v5278_v48 = vld [vmem:[#allocation9 + $0x250] sm:$0xff]  ;;  %v5321_v15 = vld [vmem:[#allocation9 + $0x3a8] sm:$0xff] }
 0x13a   :  { %1604 = vmatpush.bf16.msrb.mxu2 %v5258_v49  ;;  %v5294_v49 = vld [vmem:[#allocation9 + $0x2d0] sm:$0xff]  ;;  %v5313_v16 = vld [vmem:[#allocation9 + $0x368] sm:$0xff] }
 0x13b   :  { %1590 = vmatpush.bf16.msrb.mxu1 %v5250_v52  ;;  %v5277_v52 = vld [vmem:[#allocation9 + $0x248] sm:$0xff] }
 0x13c   :  { %1618 = vmatpush.bf16.msrb.mxu3 %v5266_v53  ;;  %v5293_v53 = vld [vmem:[#allocation9 + $0x2c8] sm:$0xff] }
 0x13d   :  { %1577 = vmatpush.bf16.msrb.mxu0 %v5241_v54  ;;  %v5268_v54 = vld [vmem:[#allocation9 + $0x200] sm:$0xff]  ;;  %v5329_v17 = vld [vmem:[#allocation9 + $0x3e8] sm:$0xff] }
 0x13e   :  { %1605 = vmatpush.bf16.msrb.mxu2 %v5257_v55  ;;  %v5284_v55 = vld [vmem:[#allocation9 + $0x280] sm:$0xff] }
 0x13f   :  { %1591 = vmatpush.bf16.msrb.mxu1 %v5249_v56  ;;  %v5307_v56 = vld [vmem:[#allocation9 + $0x338] sm:$0xff] }
 0x140   :  { %1619 = vmatpush.bf16.msrb.mxu3 %v5265_v57  ;;  %v5323_v57 = vld [vmem:[#allocation9 + $0x3b8] sm:$0xff] }
 0x141   :  { %1578 = vmatpush.bf16.msrb.mxu0 %v5240_v58  ;;  %v4117_v58 = vld [vmem:[#allocation4 + $0x20] sm:$0xf] }
 0x142   :  { %1606 = vmatpush.bf16.msrb.mxu2 %v5256_v59  ;;  %v5200_v59 = vld [vmem:[#allocation4 + $0x5c] sm:$0xf0] }
 0x143   :  { %1592 = vmatpush.bf16.msrb.mxu1 %v5248_v60  ;;  %v4125_v60 = vld [vmem:[#allocation4 + $0x28] sm:$0xf] }
 0x144   :  { %1620 = vmatpush.bf16.msrb.mxu3 %v5264_v61  ;;  %v5201_v61 = vld [vmem:[#allocation4 + $0x64] sm:$0xf0] }
 0x145   :  { %1579 = vmatpush.bf16.msrb.mxu0 %v5239_v62  ;;  %v5276_v62 = vld [vmem:[#allocation9 + $0x240] sm:$0xff] }
 0x146   :  { %1607 = vmatpush.bf16.msrb.mxu2 %v5255_v63  ;;  %v5292_v63 = vld [vmem:[#allocation9 + $0x2c0] sm:$0xff] }
 0x147   :  { %1593 = vmatpush.bf16.msrb.mxu1 %v5247_v0  ;;  %v5192_v0 = vld [vmem:[#allocation4 + $0x24] sm:$0xf] }
 0x148   :  { %1621 = vmatpush.bf16.msrb.mxu3 %v5263_v1  ;;  %v4119_v1 = vld [vmem:[#allocation4 + $0x60] sm:$0xf0] }
 0x149   :  { %1580 = vmatpush.bf16.msrb.mxu0 %v5238_v2  ;;  %v5193_v2 = vld [vmem:[#allocation4 + $0x2c] sm:$0xf] }
 0x14a   :  { %1608 = vmatpush.bf16.msrb.mxu2 %v5254_v3  ;;  %v4127_v3 = vld [vmem:[#allocation4 + $0x68] sm:$0xf0] }
 0x14b   :  { %1594 = vmatpush.bf16.msrb.mxu1 %v5246_v4  ;;  %v4118_v4 = vor.u32 %v5200_v59, %v4117_v58  ;;  %v392_v58 = vld [vmem:[%s6958_s29] sm:$0x3] }
 0x14c   :  { %1622 = vmatpush.bf16.msrb.mxu3 %v5262_v5  ;;  %v4126_v5 = vor.u32 %v5201_v61, %v4125_v60  ;;  %v6432_v59 = vpack.c.bf16 %v392_v58, %v392_v58  ;;  %v4805_v60 = vld [vmem:[#allocation12 + $0xe0] sm:$0xf]  ;;  %v5370_v61 = vld [vmem:[#allocation12 + $0xec] sm:$0xf0] }
 0x14d   :  { %1581 = vmatpush.bf16.msrb.mxu0 %v5237_v6  ;;  %v5315_v6 = vld [vmem:[#allocation9 + $0x378] sm:$0xff]  ;;  %v5346_v58 = vld [vmem:[#allocation12 + $0x2c] sm:$0xf0] }
 0x14e   :  { %1609 = vmatpush.bf16.msrb.mxu2 %v5253_v7  ;;  %v5331_v7 = vld [vmem:[#allocation9 + $0x3f8] sm:$0xff] }
 0x14f   :  { %1595 = vmatpush.bf16.msrb.mxu1 %v5245_v8  ;;  %v4122_v8 = vor.u32 %v5192_v0, %v4119_v1  ;;  %v4806_v0 = vor.u32 %v5370_v61, %v4805_v60  ;;  %v5371_v1 = vld [vmem:[#allocation12 + $0xf4] sm:$0xf0]  ;;  %v4717_v60 = vld [vmem:[#allocation12 + $0x28] sm:$0xf] }
 0x150   :  { %1623 = vmatpush.bf16.msrb.mxu3 %v5261_v9  ;;  %v4130_v9 = vor.u32 %v5193_v2, %v4127_v3  ;;  %v5347_v61 = vld [vmem:[#allocation12 + $0x34] sm:$0xf0] }
 0x151   :  { %1582 = vmatpush.bf16.msrb.mxu0 %v5236_v10  ;;  %v5306_v10 = vld [vmem:[#allocation9 + $0x330] sm:$0xff] }
 0x152   :  { %1610 = vmatpush.bf16.msrb.mxu2 %v5252_v11  ;;  %v5322_v11 = vld [vmem:[#allocation9 + $0x3b0] sm:$0xff] }
 0x153   :  { %1596 = vmatpush.bf16.msrb.mxu1 %v5244_v18  ;;  %v5304_v18 = vld [vmem:[#allocation9 + $0x320] sm:$0xff] }
 0x154   :  { %1624 = vmatpush.bf16.msrb.mxu3 %v5260_v19  ;;  %1583 = vmatmul.bf16.vlgmr.msrb.gmra.mxu0 %v4102_v24  ;;  %v5320_v19 = vld [vmem:[#allocation9 + $0x3a0] sm:$0xff]  ;;  %v5311_v24 = vld [vmem:[#allocation9 + $0x358] sm:$0xff] }
 0x155   :  { %1631 = vmatpush.bf16.msra.mxu0 %v5275_v12  ;;  %1611 = vmatmul.bf16.vlgmr.msrb.gmra.mxu2 %v4110_v25  ;;  %v5314_v12 = vld [vmem:[#allocation9 + $0x370] sm:$0xff]  ;;  %v5327_v25 = vld [vmem:[#allocation9 + $0x3d8] sm:$0xff] }
 0x156   :  { %1659 = vmatpush.bf16.msra.mxu2 %v5291_v13  ;;  %1597 = vmatmul.bf16.vlgmr.msrb.gmra.mxu1 %v4106_v28  ;;  %v5330_v13 = vld [vmem:[#allocation9 + $0x3f0] sm:$0xff] }
 0x157   :  { %1645 = vmatpush.bf16.msra.mxu1 %v5283_v26  ;;  %1625 = vmatmul.bf16.vlgmr.msrb.gmra.mxu3 %v4114_v29  ;;  %v5302_v26 = vld [vmem:[#allocation9 + $0x310] sm:$0xff] }
 0x158   :  { %1673 = vmatpush.bf16.msra.mxu3 %v5299_v27  ;;  %v5318_v27 = vld [vmem:[#allocation9 + $0x390] sm:$0xff] }
 0x159   :  { %1632 = vmatpush.bf16.msra.mxu0 %v5274_v30  ;;  %v5310_v28 = vld [vmem:[#allocation9 + $0x350] sm:$0xff]  ;;  %v5301_v30 = vld [vmem:[#allocation9 + $0x308] sm:$0xff] }
 0x15a   :  { %1660 = vmatpush.bf16.msra.mxu2 %v5290_v31  ;;  %v5326_v29 = vld [vmem:[#allocation9 + $0x3d0] sm:$0xff]  ;;  %v5317_v31 = vld [vmem:[#allocation9 + $0x388] sm:$0xff] }
 0x15b   :  { %1646 = vmatpush.bf16.msra.mxu1 %v5282_v32  ;;  %v5309_v32 = vld [vmem:[#allocation9 + $0x348] sm:$0xff] }
 0x15c   :  { %1674 = vmatpush.bf16.msra.mxu3 %v5298_v33  ;;  %v5325_v33 = vld [vmem:[#allocation9 + $0x3c8] sm:$0xff] }
 0x15d   :  { %1633 = vmatpush.bf16.msra.mxu0 %v5273_v34  ;;  %v5300_v34 = vld [vmem:[#allocation9 + $0x300] sm:$0xff] }
 0x15e   :  { %1661 = vmatpush.bf16.msra.mxu2 %v5289_v35  ;;  %v5316_v35 = vld [vmem:[#allocation9 + $0x380] sm:$0xff] }
 0x15f   :  { %1647 = vmatpush.bf16.msra.mxu1 %v5281_v36  ;;  %v5339_v36 = vld [vmem:[#allocation10 + $0x38] sm:$0xff] }
 0x160   :  { %1675 = vmatpush.bf16.msra.mxu3 %v5297_v37  ;;  %v4133_v37 = vld [vmem:[#allocation4 + $0x30] sm:$0xf] }
 0x161   :  { %1634 = vmatpush.bf16.msra.mxu0 %v5272_v38  ;;  %v5202_v38 = vld [vmem:[#allocation4 + $0x6c] sm:$0xf0] }
 0x162   :  { %1662 = vmatpush.bf16.msra.mxu2 %v5288_v39  ;;  %v4141_v39 = vld [vmem:[#allocation4 + $0x38] sm:$0xf] }
 0x163   :  { %1648 = vmatpush.bf16.msra.mxu1 %v5280_v40  ;;  %v5203_v40 = vld [vmem:[#allocation4 + $0x74] sm:$0xf0] }
 0x164   :  { %1676 = vmatpush.bf16.msra.mxu3 %v5296_v41  ;;  %v5308_v41 = vld [vmem:[#allocation9 + $0x340] sm:$0xff] }
 0x165   :  { %1635 = vmatpush.bf16.msra.mxu0 %v5271_v42  ;;  %v5324_v42 = vld [vmem:[#allocation9 + $0x3c0] sm:$0xff] }
 0x166   :  { %1663 = vmatpush.bf16.msra.mxu2 %v5287_v43  ;;  %v5194_v43 = vld [vmem:[#allocation4 + $0x34] sm:$0xf] }
 0x167   :  { %1649 = vmatpush.bf16.msra.mxu1 %v5279_v44  ;;  %v4135_v44 = vld [vmem:[#allocation4 + $0x70] sm:$0xf0] }
 0x168   :  { %1677 = vmatpush.bf16.msra.mxu3 %v5295_v45  ;;  %v5195_v45 = vld [vmem:[#allocation4 + $0x3c] sm:$0xf] }
 0x169   :  { %1636 = vmatpush.bf16.msra.mxu0 %v5270_v46  ;;  %v4143_v46 = vld [vmem:[#allocation4 + $0x78] sm:$0xf0] }
 0x16a   :  { %1664 = vmatpush.bf16.msra.mxu2 %v5286_v47  ;;  %v4134_v47 = vor.u32 %v5202_v38, %v4133_v37  ;;  %v4791_v37 = vld [vmem:[#allocation12 + $0xd0] sm:$0xf0] }
 0x16b   :  { %1650 = vmatpush.bf16.msra.mxu1 %v5278_v48  ;;  %v4142_v48 = vor.u32 %v5203_v40, %v4141_v39  ;;  %v5365_v40 = vld [vmem:[#allocation12 + $0xcc] sm:$0xf] }
 0x16c   :  { %1678 = vmatpush.bf16.msra.mxu3 %v5294_v49  ;;  %v4138_v49 = vor.u32 %v5194_v43, %v4135_v44  ;;  %v4725_v44 = vld [vmem:[#allocation12 + $0x40] sm:$0xf] }
 0x16d   :  { %1637 = vmatpush.bf16.msra.mxu0 %v5269_v50  ;;  %v4146_v50 = vor.u32 %v5195_v45, %v4143_v46  ;;  %v5350_v45 = vld [vmem:[#allocation12 + $0x4c] sm:$0xf0]  ;;  %v4733_v46 = vld [vmem:[#allocation12 + $0x48] sm:$0xf] }
 0x16e   :  { %1665 = vmatpush.bf16.msra.mxu2 %v5285_v51  ;;  %v5338_v51 = vld [vmem:[#allocation10 + $0x30] sm:$0xff] }
 0x16f   :  { %1651 = vmatpush.bf16.msra.mxu1 %v5277_v52  ;;  %v5337_v52 = vld [vmem:[#allocation10 + $0x28] sm:$0xff] }
 0x170   :  { %1679 = vmatpush.bf16.msra.mxu3 %v5293_v53  ;;  %v5336_v53 = vld [vmem:[#allocation10 + $0x20] sm:$0xff] }
 0x171   :  { %1638 = vmatpush.bf16.msra.mxu0 %v5268_v54  ;;  %v5335_v54 = vld [vmem:[#allocation10 + $0x18] sm:$0xff] }
 0x172   :  { %1666 = vmatpush.bf16.msra.mxu2 %v5284_v55  ;;  %v5334_v55 = vld [vmem:[#allocation10 + $0x10] sm:$0xff] }
 0x173   :  { %1652 = vmatpush.bf16.msra.mxu1 %v5276_v62  ;;  %v4813_v62 = vld [vmem:[#allocation12 + $0xe8] sm:$0xf] }
 0x174   :  { %1680 = vmatpush.bf16.msra.mxu3 %v5292_v63  ;;  %1639 = vmatmul.bf16.vlgmr.msra.gmra.mxu0 %v4118_v4  ;;  %v4814_v2 = vor.u32 %v5371_v1, %v4813_v62  ;;  %v4789_v4 = vld [vmem:[#allocation12 + $0xc0] sm:$0xf]  ;;  %v4718_v1 = vor.u32 %v5347_v61, %v4717_v60 }
 0x175   :  { %1687 = vmatpush.bf16.msrb.mxu0 %v5307_v56  ;;  %1667 = vmatmul.bf16.vlgmr.msra.gmra.mxu2 %v4126_v5  ;;  %v5333_v56 = vld [vmem:[#allocation10 + $0x8] sm:$0xff]  ;;  %v5366_v5 = vld [vmem:[#allocation12 + $0xcc] sm:$0xf0]  ;;  %v5376_v60 = vld [vmem:[#allocation13 + $0x20] sm:$0xff] }
 0x176   :  { %1715 = vmatpush.bf16.msrb.mxu2 %v5323_v57  ;;  %1653 = vmatmul.bf16.vlgmr.msra.gmra.mxu1 %v4122_v8  ;;  %v5332_v57 = vld [vmem:[#allocation10] sm:$0xff]  ;;  %v5367_v8 = vld [vmem:[#allocation12 + $0xd4] sm:$0xf0] }
 0x177   :  { %1701 = vmatpush.bf16.msrb.mxu1 %v5315_v6  ;;  %1681 = vmatmul.bf16.vlgmr.msra.gmra.mxu3 %v4130_v9  ;;  %v4797_v6 = vld [vmem:[#allocation12 + $0xc8] sm:$0xf]  ;;  %v6473_v61 = vld [vmem:[#allocation15 + $0x20] sm:$0xff] }
 0x178   :  { %1729 = vmatpush.bf16.msrb.mxu3 %v5331_v7  ;;  %v4790_v7 = vor.u32 %v5366_v5, %v4789_v4  ;;  %v4798_v9 = vor.u32 %v5367_v8, %v4797_v6  ;;  %v4759_v4 = vld [vmem:[#allocation12 + $0x90] sm:$0xf0]  ;;  %v5357_v5 = vld [vmem:[#allocation12 + $0x8c] sm:$0xf]  ;;  %v4693_v8 = vld [vmem:[#allocation12] sm:$0xf] }
 0x179   :  { %1688 = vmatpush.bf16.msrb.mxu0 %v5306_v10  ;;  %v4773_v10 = vld [vmem:[#allocation12 + $0xa0] sm:$0xf] }
 0x17a   :  { %1716 = vmatpush.bf16.msrb.mxu2 %v5322_v11  ;;  %v5362_v11 = vld [vmem:[#allocation12 + $0xac] sm:$0xf0] }
 0x17b   :  { %1702 = vmatpush.bf16.msrb.mxu1 %v5314_v12  ;;  %v4781_v12 = vld [vmem:[#allocation12 + $0xa8] sm:$0xf] }
 0x17c   :  { %1730 = vmatpush.bf16.msrb.mxu3 %v5330_v13  ;;  %v4774_v13 = vor.u32 %v5362_v11, %v4773_v10 }
 0x17d   :  { %1689 = vmatpush.bf16.msrb.mxu0 %v5305_v14  ;;  %v5363_v14 = vld [vmem:[#allocation12 + $0xb4] sm:$0xf0] }
 0x17e   :  { %1717 = vmatpush.bf16.msrb.mxu2 %v5321_v15  ;;  %v4782_v15 = vor.u32 %v5363_v14, %v4781_v12  ;;  %v4701_v12 = vld [vmem:[#allocation12 + $0x8] sm:$0xf]  ;;  %v5352_v14 = vld [vmem:[#allocation12 + $0x64] sm:$0xf] }
 0x17f   :  { %1703 = vmatpush.bf16.msrb.mxu1 %v5313_v16  ;;  %v4757_v16 = vld [vmem:[#allocation12 + $0x80] sm:$0xf] }
 0x180   :  { %1731 = vmatpush.bf16.msrb.mxu3 %v5329_v17  ;;  %v5358_v17 = vld [vmem:[#allocation12 + $0x8c] sm:$0xf0] }
 0x181   :  { %1690 = vmatpush.bf16.msrb.mxu0 %v5304_v18  ;;  %v4765_v18 = vld [vmem:[#allocation12 + $0x88] sm:$0xf] }
 0x182   :  { %1718 = vmatpush.bf16.msrb.mxu2 %v5320_v19 }
 0x183   :  { %1704 = vmatpush.bf16.msrb.mxu1 %v5312_v20  ;;  %v4758_v20 = vor.u32 %v5358_v17, %v4757_v16  ;;  %v4743_v16 = vld [vmem:[#allocation12 + $0x70] sm:$0xf0]  ;;  %v5353_v17 = vld [vmem:[#allocation12 + $0x6c] sm:$0xf] }
 0x184   :  { %1732 = vmatpush.bf16.msrb.mxu3 %v5328_v21  ;;  %v5359_v21 = vld [vmem:[#allocation12 + $0x94] sm:$0xf0] }
 0x185   :  { %1691 = vmatpush.bf16.msrb.mxu0 %v5303_v22  ;;  %v5368_v22 = vld [vmem:[#allocation12 + $0xe4] sm:$0xf] }
 0x186   :  { %1719 = vmatpush.bf16.msrb.mxu2 %v5319_v23  ;;  %v4807_v23 = vld [vmem:[#allocation12 + $0xf0] sm:$0xf0] }
 0x187   :  { %1705 = vmatpush.bf16.msrb.mxu1 %v5311_v24 }
 0x188   :  { %1733 = vmatpush.bf16.msrb.mxu3 %v5327_v25  ;;  %v4766_v25 = vor.u32 %v5359_v21, %v4765_v18  ;;  %v4751_v18 = vld [vmem:[#allocation12 + $0x78] sm:$0xf0]  ;;  %v4746_v21 = vor.u32 %v5352_v14, %v4743_v16 }
 0x189   :  { %1692 = vmatpush.bf16.msrb.mxu0 %v5302_v26  ;;  %v4810_v26 = vor.u32 %v5368_v22, %v4807_v23  ;;  %v4754_v22 = vor.u32 %v5353_v17, %v4751_v18  ;;  %v5379_v23 = vld [vmem:[#allocation13 + $0x38] sm:$0xff]  ;;  %v5372_v17 = vld [vmem:[#allocation13] sm:$0xff] }
 0x18a   :  { %1720 = vmatpush.bf16.msrb.mxu2 %v5318_v27  ;;  %v5369_v27 = vld [vmem:[#allocation12 + $0xec] sm:$0xf] }
 0x18b   :  { %1706 = vmatpush.bf16.msrb.mxu1 %v5310_v28  ;;  %v4815_v28 = vld [vmem:[#allocation12 + $0xf8] sm:$0xf0] }
 0x18c   :  { %1734 = vmatpush.bf16.msrb.mxu3 %v5326_v29  ;;  %v4818_v29 = vor.u32 %v5369_v27, %v4815_v28  ;;  %v5348_v28 = vld [vmem:[#allocation12 + $0x44] sm:$0xf] }
 0x18d   :  { %1693 = vmatpush.bf16.msrb.mxu0 %v5301_v30 }
 0x18e   :  { %1721 = vmatpush.bf16.msrb.mxu2 %v5317_v31  ;;  %v4741_v31 = vld [vmem:[#allocation12 + $0x60] sm:$0xf] }
 0x18f   :  { %1707 = vmatpush.bf16.msrb.mxu1 %v5309_v32  ;;  %v5354_v32 = vld [vmem:[#allocation12 + $0x6c] sm:$0xf0] }
 0x190   :  { %1735 = vmatpush.bf16.msrb.mxu3 %v5325_v33  ;;  %v4749_v33 = vld [vmem:[#allocation12 + $0x68] sm:$0xf] }
 0x191   :  { %1694 = vmatpush.bf16.msrb.mxu0 %v5300_v34  ;;  %v4742_v34 = vor.u32 %v5354_v32, %v4741_v31  ;;  %v5349_v31 = vld [vmem:[#allocation12 + $0x4c] sm:$0xf] }
 0x192   :  { %1722 = vmatpush.bf16.msrb.mxu2 %v5316_v35  ;;  %v5355_v35 = vld [vmem:[#allocation12 + $0x74] sm:$0xf0] }
 0x193   :  { %1708 = vmatpush.bf16.msrb.mxu1 %v5308_v41  ;;  %v4750_v38 = vor.u32 %v5355_v35, %v4749_v33  ;;  %v4799_v41 = vld [vmem:[#allocation12 + $0xd8] sm:$0xf0]  ;;  %v5378_v35 = vld [vmem:[#allocation13 + $0x30] sm:$0xff] }
 0x194   :  { %1736 = vmatpush.bf16.msrb.mxu3 %v5324_v42  ;;  %1695 = vmatmul.bf16.vlgmr.msrb.gmra.mxu0 %v4134_v47  ;;  %v4802_v42 = vor.u32 %v5365_v40, %v4799_v41  ;;  %v4726_v47 = vor.u32 %v5350_v45, %v4725_v44  ;;  %v5344_v40 = vld [vmem:[#allocation12 + $0x24] sm:$0xf]  ;;  %v4711_v41 = vld [vmem:[#allocation12 + $0x30] sm:$0xf0]  ;;  %v4719_v45 = vld [vmem:[#allocation12 + $0x38] sm:$0xf0] }
 0x195   :  { %1812 = vmatpush.bf16.msra.mxu0 %v5339_v36  ;;  %1723 = vmatmul.bf16.vlgmr.msrb.gmra.mxu2 %v4142_v48  ;;  %v5364_v36 = vld [vmem:[#allocation12 + $0xc4] sm:$0xf]  ;;  %v5351_v48 = vld [vmem:[#allocation12 + $0x54] sm:$0xf0]  ;;  %v4714_v44 = vor.u32 %v5344_v40, %v4711_v41 }
 0x196   :  { %1709 = vmatmul.bf16.vlgmr.msrb.gmra.mxu1 %v4138_v49  ;;  %2042 = vmatpush.bf16.msra.mxu2 %v4810_v26  ;;  %v4794_v39 = vor.u32 %v5364_v36, %v4791_v37  ;;  %v5360_v49 = vld [vmem:[#allocation12 + $0xa4] sm:$0xf]  ;;  %v6455_v26 = vld [vmem:[#allocation15 + $0x38] sm:$0xff]  ;;  %v6462_v36 = vld [vmem:[#allocation15 + $0x30] sm:$0xff] }
 0x197   :  { %1737 = vmatmul.bf16.vlgmr.msrb.gmra.mxu3 %v4146_v50  ;;  %2029 = vmatpush.bf16.msra.mxu1 %v4806_v0  ;;  %v4775_v50 = vld [vmem:[#allocation12 + $0xb0] sm:$0xf0]  ;;  %v5521_v37 = vld [vmem:[%s6959_s10] ss:$0 sm:$0xff] }
 0x198   :  { %2055 = vmatpush.bf16.msra.mxu3 %v4814_v2  ;;  %v5356_v2 = vld [vmem:[#allocation12 + $0x84] sm:$0xf] }
 0x199   :  { %1813 = vmatpush.bf16.msra.mxu0 %v5338_v51  ;;  %v4734_v51 = vor.u32 %v5351_v48, %v4733_v46  ;;  %v4762_v6 = vor.u32 %v5356_v2, %v4759_v4  ;;  %v5377_v46 = vld [vmem:[#allocation13 + $0x28] sm:$0xff] }
 0x19a   :  { %2043 = vmatpush.bf16.msra.mxu2 %v4794_v39 }
 0x19b   :  { %2030 = vmatpush.bf16.msra.mxu1 %v4790_v7  ;;  %v4767_v7 = vld [vmem:[#allocation12 + $0x98] sm:$0xf0] }
 0x19c   :  { %2056 = vmatpush.bf16.msra.mxu3 %v4798_v9  ;;  %v5342_v9 = vld [vmem:[#allocation12 + $0xc] sm:$0xf0]  ;;  %v4770_v11 = vor.u32 %v5357_v5, %v4767_v7  ;;  %v5375_v5 = vld [vmem:[#allocation13 + $0x18] sm:$0xff] }
 0x19d   :  { %1814 = vmatpush.bf16.msra.mxu0 %v5337_v52  ;;  %v4778_v52 = vor.u32 %v5360_v49, %v4775_v50 }
 0x19f   :  { %2031 = vmatpush.bf16.msra.mxu1 %v4774_v13  ;;  %2044 = vmatpush.bf16.msra.mxu2 %v4778_v52  ;;  %v5343_v13 = vld [vmem:[#allocation12 + $0x14] sm:$0xf0] }
 0x1a0   :  { %2057 = vmatpush.bf16.msra.mxu3 %v4782_v15  ;;  %v4694_v15 = vor.u32 %v5342_v9, %v4693_v8 }
 0x1a1   :  { %1815 = vmatpush.bf16.msra.mxu0 %v5336_v53  ;;  %v5361_v53 = vld [vmem:[#allocation12 + $0xac] sm:$0xf] }
 0x1a3   :  { %2032 = vmatpush.bf16.msra.mxu1 %v4758_v20  ;;  %2045 = vmatpush.bf16.msra.mxu2 %v4762_v6  ;;  %v4702_v20 = vor.u32 %v5343_v13, %v4701_v12  ;;  %v6479_v6 = vld [vmem:[#allocation15 + $0x18] sm:$0xff] }
 0x1a4   :  { %2058 = vmatpush.bf16.msra.mxu3 %v4766_v25 }
 0x1a5   :  { %1816 = vmatpush.bf16.msra.mxu0 %v5335_v54  ;;  %v4783_v54 = vld [vmem:[#allocation12 + $0xb8] sm:$0xf0] }
 0x1a7   :  { %2033 = vmatpush.bf16.msra.mxu1 %v4742_v34  ;;  %2046 = vmatpush.bf16.msra.mxu2 %v4746_v21  ;;  %v4735_v34 = vld [vmem:[#allocation12 + $0x58] sm:$0xf0] }
 0x1a8   :  { %2059 = vmatpush.bf16.msra.mxu3 %v4750_v38  ;;  %v4738_v38 = vor.u32 %v5349_v31, %v4735_v34 }
 0x1a9   :  { %1817 = vmatpush.bf16.msra.mxu0 %v5334_v55  ;;  %v4709_v55 = vld [vmem:[#allocation12 + $0x20] sm:$0xf] }
 0x1aa   :  { %v4710_v0 = vor.u32 %v5346_v58, %v4709_v55  ;;  %v5341_v55 = vld [vmem:[#allocation12 + $0xc] sm:$0xf]  ;;  %v4703_v58 = vld [vmem:[#allocation12 + $0x18] sm:$0xf0] }
 0x1ab   :  { %2034 = vmatpush.bf16.msra.mxu1 %v4726_v47  ;;  %v6468_v47 = vld [vmem:[#allocation15 + $0x28] sm:$0xff] }
 0x1ac   :  { %2060 = vmatpush.bf16.msra.mxu3 %v4734_v51 }
 0x1ad   :  { %1818 = vmatpush.bf16.msra.mxu0 %v5333_v56 }
 0x1af   :  { %2035 = vmatpush.bf16.msra.mxu1 %v4710_v0  ;;  %v4706_v0 = vor.u32 %v5341_v55, %v4703_v58 }
 0x1b0   :  { %2061 = vmatpush.bf16.msra.mxu3 %v4718_v1 }
 0x1b1   :  { %1819 = vmatpush.bf16.msra.mxu0 %v5332_v57  ;;  %v6435_v63 = vpop.f32.mrf.mxu0  ;;  %v4786_v57 = vor.u32 %v5361_v53, %v4783_v54  ;;  %v5340_v53 = vld [vmem:[#allocation12 + $0x4] sm:$0xf]  ;;  %v4695_v54 = vld [vmem:[#allocation12 + $0x10] sm:$0xf0] }
 0x1b2   :  { %v1529_v48 = vadd.f32 %v5521_v37, %v6435_v63 }
 0x1b3   :  { %v6441_v24 = vpop.f32.mrf.mxu1  ;;  %2036 = vmatpush.bf16.msra.mxu1 %v4694_v15  ;;  %v6488_v15 = vld [vmem:[#allocation15 + $0x8] sm:$0xff] }
 0x1b4   :  { %1820 = vmatmul.bf16.vlgmr.msra.gmra.mxu0 %v6432_v59  ;;  %2062 = vmatpush.bf16.msra.mxu3 %v4702_v20  ;;  %v1543_v63 = vadd.f32 %v6441_v24, %v1529_v48  ;;  %v5374_v24 = vld [vmem:[#allocation13 + $0x10] sm:$0xff] }
 0x1b5   :  { %2068 = vmatpush.bf16.msrb.mxu0 %v4818_v29  ;;  %v4727_v29 = vld [vmem:[#allocation12 + $0x50] sm:$0xf0] }
 0x1b6   :  { %v4730_v33 = vor.u32 %v5348_v28, %v4727_v29  ;;  %v5387_v29 = vld [vmem:[#allocation18 + $0x38] sm:$0xff] }
 0x1b7   :  { %2487 = vmatpush.bf16.msrb.mxu1 %v5379_v23 }
 0x1b8   :  { %v6443_v30 = vpop.f32.mrf.mxu2  ;;  %2667 = vmatpush.bf16.msrb.mxu3 %v6455_v26  ;;  %2047 = vmatpush.bf16.msra.mxu2 %v4730_v33 }
 0x1b9   :  { %v6437_v3 = vpop.f32.mrf.mxu0  ;;  %2069 = vmatpush.bf16.msrb.mxu0 %v4802_v42  ;;  %v5345_v42 = vld [vmem:[#allocation12 + $0x2c] sm:$0xf]  ;;  %v1557_v4 = vadd.f32 %v6443_v30, %v1543_v63 }
 0x1ba   :  { %v6445_v43 = vpop.f32.mrf.mxu3  ;;  %v4722_v49 = vor.u32 %v5345_v42, %v4719_v45  ;;  %v1531_v51 = vadd.f32 %v5521_v37, %v6437_v3  ;;  %v5373_v30 = vld [vmem:[#allocation13 + $0x8] sm:$0xff] }
 0x1bb   :  { %v6449_v62 = vpop.f32.mrf.mxu1  ;;  %2488 = vmatpush.bf16.msrb.mxu1 %v5378_v35 }
 0x1bc   :  { %2668 = vmatpush.bf16.msrb.mxu3 %v6462_v36  ;;  %2048 = vmatpush.bf16.msra.mxu2 %v4714_v44  ;;  %v1545_v3 = vadd.f32 %v6449_v62, %v1531_v51  ;;  %v1571_v62 = vadd.f32 %v6445_v43, %v1557_v4  ;;  %v6493_v43 = vld [vmem:[#allocation15] sm:$0xff] }
 0x1bd   :  { %2070 = vmatpush.bf16.msrb.mxu0 %v4786_v57  ;;  %v4698_v57 = vor.u32 %v5340_v53, %v4695_v54 }
 0x1bf   :  { %2489 = vmatpush.bf16.msrb.mxu1 %v5377_v46 }
 0x1c0   :  { %v6451_v10 = vpop.f32.mrf.mxu2  ;;  %2669 = vmatpush.bf16.msrb.mxu3 %v6468_v47  ;;  %2049 = vmatpush.bf16.msra.mxu2 %v4698_v57 }
 0x1c1   :  { %2071 = vmatpush.bf16.msrb.mxu0 %v4770_v11  ;;  %v1559_v7 = vadd.f32 %v6451_v10, %v1545_v3  ;;  %v6483_v11 = vld [vmem:[#allocation15 + $0x10] sm:$0xff] }
 0x1c2   :  { %v6453_v25 = vpop.f32.mrf.mxu3 }
 0x1c3   :  { %2490 = vmatpush.bf16.msrb.mxu1 %v5376_v60  ;;  %v1573_v13 = vadd.f32 %v6453_v25, %v1559_v7  ;;  %v5386_v7 = vld [vmem:[#allocation18 + $0x30] sm:$0xff] }
 0x1c4   :  { %2670 = vmatpush.bf16.msrb.mxu3 %v6473_v61  ;;  %2572 = vmatpush.bf16.msrb.mxu2 %v5387_v29  ;;  %v6535_v29 = vld [vmem:[#allocation7] sm:$0xff] }
 0x1c5   :  { %2072 = vmatpush.bf16.msrb.mxu0 %v4754_v22 }
 0x1c7   :  { %2491 = vmatpush.bf16.msrb.mxu1 %v5375_v5 }
 0x1c8   :  { %2671 = vmatpush.bf16.msrb.mxu3 %v6479_v6  ;;  %2573 = vmatpush.bf16.msrb.mxu2 %v5386_v7 }
 0x1c9   :  { %2073 = vmatpush.bf16.msrb.mxu0 %v4738_v38 }
 0x1cb   :  { %2492 = vmatpush.bf16.msrb.mxu1 %v5374_v24  ;;  %v5385_v24 = vld [vmem:[#allocation18 + $0x28] sm:$0xff] }
 0x1cc   :  { %2672 = vmatpush.bf16.msrb.mxu3 %v6483_v11  ;;  %2574 = vmatpush.bf16.msrb.mxu2 %v5385_v24 }
 0x1cd   :  { %2074 = vmatpush.bf16.msrb.mxu0 %v4722_v49 }
 0x1cf   :  { %2493 = vmatpush.bf16.msrb.mxu1 %v5373_v30  ;;  %v6516_v30 = vld [vmem:[#allocation16 + $0x28] sm:$0xff] }
 0x1d0   :  { %2673 = vmatpush.bf16.msrb.mxu3 %v6488_v15 }
 0x1d1   :  { %v6439_v19 = vpop.f32.mrf.mxu0  ;;  %2075 = vmatpush.bf16.msrb.mxu0 %v4706_v0 }
 0x1d2   :  { %v1585_v10 = vadd.f32 %v6439_v19, %v1571_v62  ;;  %v5525_v62 = vld [vmem:[#allocation2] ss:$0 sm:$0xff] }
 0x1d3   :  { %v6459_v32 = vpop.f32.mrf.mxu1  ;;  %2494 = vmatpush.bf16.msrb.mxu1 %v5372_v17  ;;  %v6522_v17 = vld [vmem:[#allocation16 + $0x18] sm:$0xff] }
 0x1d4   :  { %v1599_v20 = vadd.f32 %v6459_v32, %v1585_v10  ;;  %2674 = vmatpush.bf16.msrb.mxu3 %v6493_v43  ;;  %v6519_v10 = vld [vmem:[#allocation16 + $0x20] sm:$0xff] }
 0x1d8   :  { %v6465_v39 = vpop.f32.mrf.mxu2 }
 0x1d9   :  { %v6447_v56 = vpop.f32.mrf.mxu0  ;;  %v1613_v19 = vadd.f32 %v6465_v39, %v1599_v20  ;;  %v6525_v20 = vld [vmem:[#allocation16 + $0x10] sm:$0xff] }
 0x1da   :  { %v1626_v50 = vpop.f32.mrf.mxu3  ;;  %v1587_v16 = vadd.f32 %v6447_v56, %v1573_v13  ;;  %v5522_v56 = vld [vmem:[%s6960_s7] ss:$0 sm:$0xff]  ;;  %v5384_v13 = vld [vmem:[#allocation18 + $0x20] sm:$0xff] }
 0x1db   :  { %v1600_v1 = vpop.f32.mrf.mxu1  ;;  %v1627_v33 = vadd.f32 %v1626_v50, %v1613_v19  ;;  %2575 = vmatpush.bf16.msrb.mxu2 %v5384_v13  ;;  %v5524_v19 = vld [vmem:[%s6963_s15] ss:$0 sm:$0xff] }
 0x1dc   :  { %v1601_v21 = vadd.f32 %v1600_v1, %v1587_v16  ;;  %v5523_v1 = vld [vmem:[%s6961_s6] ss:$0 sm:$0xff]  ;;  %v5382_v16 = vld [vmem:[#allocation18 + $0x10] sm:$0xff] }
 0x1dd   :  { %v6505_v4 = vpack.c.bf16 %v5523_v1, %v5523_v1 }
 0x1e0   :  { %v1614_v2 = vpop.f32.mrf.mxu2 }
 0x1e1   :  { %v1615_v23 = vadd.f32 %v1614_v2, %v1601_v21  ;;  %v5380_v21 = vld [vmem:[#allocation18] sm:$0xff] }
 0x1e2   :  { %v1628_v9 = vpop.f32.mrf.mxu3 }
 0x1e3   :  { %v1629_v31 = vadd.f32 %v1628_v9, %v1615_v23  ;;  %v6513_v9 = vld [vmem:[#allocation16 + $0x30] sm:$0xff] }
 0x1e4   :  { %v1859_v23 = vld [vmem:[%s6962_s30] sm:$0xf] }
 0x1f1   :  { %v6457_v27 = vpop.f32.mrf.mxu0 }
 0x1f2   :  { %v1641_v32 = vadd.f32 %v6457_v27, %v1627_v33 }
 0x1f3   :  { %v1654_v12 = vpop.f32.mrf.mxu1 }
 0x1f4   :  { %v1655_v44 = vadd.f32 %v1654_v12, %v1641_v32  ;;  %v6126_v12 = vmov 0   ;;  %v1862_v32 = vperm.slane %v1859_v23, 1 }
 0x1f5   :  { %5518 = vset.pattern.permute.xlu1 %v6126_v12  ;;  %5519 = vset.pattern.permute.xlu2 %v6126_v12 }
 0x1f6   :  { %2103 = vperm.xlu1 %5518, %v5525_v62   ;;  %5520 = vset.pattern.permute.xlu0 %v6126_v12 }
 0x1f8   :  { %v1668_v14 = vpop.f32.mrf.mxu2 }
 0x1f9   :  { %v1642_v52 = vpop.f32.mrf.mxu0  ;;  %v1669_v46 = vadd.f32 %v1668_v14, %v1655_v44  ;;  %v5383_v14 = vld [vmem:[#allocation18 + $0x18] sm:$0xff]  ;;  %v1863_v44 = vperm.slane %v1859_v23, 2 }
 0x1fa   :  { %v1682_v18 = vpop.f32.mrf.mxu3  ;;  %v1643_v34 = vadd.f32 %v1642_v52, %v1629_v31  ;;  %2576 = vmatpush.bf16.msrb.mxu2 %v5383_v14 }
 0x1fb   :  { %v1656_v25 = vpop.f32.mrf.mxu1  ;;  %v1683_v50 = vadd.f32 %v1682_v18, %v1669_v46  ;;  %v5381_v18 = vld [vmem:[#allocation18 + $0x8] sm:$0xff] }
 0x1fc   :  { %v1657_v41 = vadd.f32 %v1656_v25, %v1643_v34  ;;  %v1861_v25 = vperm.slane %v1859_v23, 0 }
 0x1fe   :  { %2577 = vmatpush.bf16.msrb.mxu2 %v5382_v16 }
 0x200   :  { %v1670_v28 = vpop.f32.mrf.mxu2 }
 0x201   :  { %v1671_v45 = vadd.f32 %v1670_v28, %v1657_v41  ;;  %v6533_v28 = vld [vmem:[#allocation16] sm:$0xff] }
 0x202   :  { %v1684_v37 = vpop.f32.mrf.mxu3  ;;  %2578 = vmatpush.bf16.msrb.mxu2 %v5381_v18 }
 0x203   :  { %v1685_v51 = vadd.f32 %v1684_v37, %v1671_v45  ;;  %v6540_v37 = vld [vmem:[#allocation7 + $0x8] sm:$0xff] }
 0x204   :  { %v2086_v45 = vmul.f32 %v5524_v19, %v6540_v37 }
 0x206   :  { %2579 = vmatpush.bf16.msrb.mxu2 %v5380_v21  ;;  %v6560_v21 = vld [vmem:[%s6964_s5] ss:$0 sm:$0xff] }
 0x211   :  { %v1696_v8 = vpop.f32.mrf.mxu0 }
 0x212   :  { %v1697_v27 = vadd.f32 %v1696_v8, %v1683_v50  ;;  %v6510_v8 = vld [vmem:[#allocation16 + $0x38] sm:$0xff] }
 0x213   :  { %v1710_v40 = vpop.f32.mrf.mxu1  ;;  %2753 = vmatpush.bf16.msra.mxu0 %v6510_v8 }
 0x214   :  { %v1711_v58 = vadd.f32 %v1710_v40, %v1697_v27 }
 0x217   :  { %2754 = vmatpush.bf16.msra.mxu0 %v6513_v9 }
 0x218   :  { %v1724_v42 = vpop.f32.mrf.mxu2 }
 0x219   :  { %v1698_v22 = vpop.f32.mrf.mxu0  ;;  %v1725_v0 = vadd.f32 %v1724_v42, %v1711_v58 }
 0x21a   :  { %v1738_v49 = vpop.f32.mrf.mxu3  ;;  %v1699_v52 = vadd.f32 %v1698_v22, %v1685_v51  ;;  %v6528_v22 = vld [vmem:[#allocation16 + $0x8] sm:$0xff] }
 0x21b   :  { %v1712_v54 = vpop.f32.mrf.mxu1  ;;  %v6503_v2 = vadd.f32 %v1738_v49, %v1725_v0  ;;  %2755 = vmatpush.bf16.msra.mxu0 %v6516_v30 }
 0x21c   :  { %v1713_v57 = vadd.f32 %v1712_v54, %v1699_v52 }
 0x21f   :  { %2756 = vmatpush.bf16.msra.mxu0 %v6519_v10 }
 0x220   :  { %v1726_v55 = vpop.f32.mrf.mxu2 }
 0x221   :  { %v1727_v60 = vadd.f32 %v1726_v55, %v1713_v57 }
 0x222   :  { %v1740_v63 = vpop.f32.mrf.mxu3 }
 0x223   :  { %v6501_v3 = vadd.f32 %v1740_v63, %v1727_v60  ;;  %2757 = vmatpush.bf16.msra.mxu0 %v6522_v17 }
 0x225   :  { %v2438_v5 = vpack.c.bf16 %v6501_v3, %v6503_v2 }
 0x227   :  { %2758 = vmatpush.bf16.msra.mxu0 %v6525_v20 }
 0x22b   :  { %2759 = vmatpush.bf16.msra.mxu0 %v6528_v22 }
 0x22f   :  { %2760 = vmatpush.bf16.msra.mxu0 %v6533_v28 }
 0x231   :  { %v1821_v35 = vpop.f32.mrf.mxu0 }
 0x232   :  { %v1822_v38 = vadd.f32 %v5522_v56, %v1821_v35  ;;  %v1864_v56 = vperm.slane %v1859_v23, 3  ;;  %v2085_v35 = vmul.f32 %v5524_v19, %v6535_v29  ;;  %v5526_v23 = vld [vmem:[%s6965_s16] ss:$0 sm:$0xff] }
 0x234   :  { %5536 = vtanh.f32 %v1822_v38 }
 0x239   :  { %v1823_v39 = vpop.f32.mrf.mxu0 }
 0x23a   :  { %v5537_v48 = vpop.eup %5536 }
 0x23b   :  { %v1858_v53 = vpack.c.bf16 %v5537_v48, %v5537_v48 }
 0x23d   :  { %2037 = vmatmul.bf16.vlgmr.msra.gmra.mxu1 %v1858_v53  ;;  %2050 = vmatmul.bf16.vlgmr.msra.gmra.mxu2 %v1858_v53 }
 0x23e   :  { %2063 = vmatmul.bf16.vlgmr.msra.gmra.mxu3 %v1858_v53  ;;  %2076 = vmatmul.bf16.vlgmr.msrb.gmra.mxu0 %v1858_v53 }
 0x23f   :  { %3129 = vmatpush.bf16.msrb.mxu0 %v6455_v26 }
 0x243   :  { %3130 = vmatpush.bf16.msrb.mxu0 %v6462_v36 }
 0x247   :  { %3131 = vmatpush.bf16.msrb.mxu0 %v6468_v47 }
 0x24b   :  { %3132 = vmatpush.bf16.msrb.mxu0 %v6473_v61 }
 0x24d   :  { %2495 = vmatmul.bf16.vlgmr.msrb.gmra.mxu1 %v2438_v5 }
 0x24e   :  { %2675 = vmatmul.bf16.vlgmr.msrb.gmra.mxu3 %v6505_v4 }
 0x24f   :  { %3133 = vmatpush.bf16.msrb.mxu0 %v6479_v6 }
 0x253   :  { %3134 = vmatpush.bf16.msrb.mxu0 %v6483_v11 }
 0x257   :  { %3135 = vmatpush.bf16.msrb.mxu0 %v6488_v15 }
 0x25b   :  { %3136 = vmatpush.bf16.msrb.mxu0 %v6493_v43 }
 0x2ba   :  { %v2038_v31 = vpop.f32.mrf.mxu1 }
 0x2bb   :  { %v2039_v33 = vadd.f32 %v2038_v31, %v1861_v25  ;;  %v2077_v34 = vpop.f32.mrf.mxu0 }
 0x2bc   :  { %v2078_v38 = vadd.f32 %v2077_v34, %v1864_v56 }
 0x2bd   :  { %v2090_v40 = vperm.slane %v2039_v33, 0  ;;  %v2089_v46 = vrot.slane %v2039_v33, 1 }
 0x2be   :  { %v2342_v41 = vrot.slane %v2078_v38, 1  ;;  %v2343_v42 = vperm.slane %v2078_v38, 0 }
 0x2bf   :  { %v2094_v39 = vmul.f32 %v2090_v40, %v2085_v35  ;;  %v2091_v55 = vperm.slane %v2089_v46, 0 }
 0x2c0   :  { %v2344_v48 = vperm.slane %v2342_v41, 0  ;;  %v2051_v49 = vpop.f32.mrf.mxu2  ;;  %v6544_v51 = vmul.f32 %v2343_v42, %v2085_v35 }
 0x2c1   :  { %v2052_v53 = vadd.f32 %v2051_v49, %v1862_v32  ;;  %v2064_v50 = vpop.f32.mrf.mxu3  ;;  %2096 = vadd.xlane.f32.xlu0 %v2094_v39  ;;  %v2095_v62 = vmul.f32 %v2091_v55, %v2086_v45  ;;  %v2110_v39 = vlaneseq  ;;  %v6580_v49 = vld [vmem:[#allocation19 + $0x30] sm:$0xff]  ;;  %v6591_v55 = vld [vmem:[#allocation19 + $0x28] sm:$0xff] }
 0x2c2   :  { %v2065_v52 = vadd.f32 %v2064_v50, %v1863_v44  ;;  %v2040_v54 = vpop.f32.mrf.mxu1  ;;  %v6547_v27 = vmul.f32 %v2344_v48, %v2086_v45  ;;  %v6578_v48 = vpop.permute.xlu1 %2103 }
 0x2c3   :  { %v2180_v57 = vrot.slane %v2052_v53, 1  ;;  %v2181_v58 = vperm.slane %v2052_v53, 0  ;;  %v2079_v60 = vpop.f32.mrf.mxu0  ;;  %v6582_v53 = vand.u32 127, %v2110_v39 }
 0x2c4   :  { %v2261_v63 = vrot.slane %v2065_v52, 1  ;;  %v2262_v0 = vperm.slane %v2065_v52, 0 }
 0x2c5   :  { %v2182_v1 = vperm.slane %v2180_v57, 0  ;;  %v6549_v5 = vmul.f32 %v2181_v58, %v2085_v35 }
 0x2c6   :  { %v2263_v7 = vperm.slane %v2261_v63, 0  ;;  %v6552_v24 = vmul.f32 %v2262_v0, %v2085_v35  ;;  %v6599_v63 = vld [vmem:[#allocation19 + $0x20] sm:$0xff] }
 0x2c7   :  { %v6554_v12 = vmul.f32 %v2182_v1, %v2086_v45  ;;  %v6603_v1 = vld [vmem:[#allocation19 + $0x18] sm:$0xff] }
 0x2c8   :  { %v2053_v13 = vpop.f32.mrf.mxu2  ;;  %v6556_v14 = vmul.f32 %v2263_v7, %v2086_v45  ;;  %v6575_v45 = vld [vmem:[#allocation19 + $0x38] sm:$0xff]  ;;  %v6606_v7 = vld [vmem:[#allocation19 + $0x10] sm:$0xff] }
 0x2c9   :  { %v2066_v16 = vpop.f32.mrf.mxu3  ;;  %2098 = vadd.xlane.f32.xlu0 %v2095_v62  ;;  %2844 = vmatpush.bf16.msra.mxu1 %v6575_v45  ;;  %v6609_v62 = vld [vmem:[#allocation19 + $0x8] sm:$0xff]  ;;  %v6612_v13 = vld [vmem:[#allocation19] sm:$0xff] }
 0x2ca   :  { %v2496_v18 = vpop.f32.mrf.mxu1  ;;  %v5528_v16 = vld [vmem:[%s6966_s27] ss:$0 sm:$0xff] }
 0x2cb   :  { %v6566_v31 = vadd.f32 %v5526_v23, %v2496_v18 }
 0x2cd   :  { %2845 = vmatpush.bf16.msra.mxu1 %v6580_v49 }
 0x2d1   :  { %v2676_v25 = vpop.f32.mrf.mxu3  ;;  %2846 = vmatpush.bf16.msra.mxu1 %v6591_v55 }
 0x2d2   :  { %v2677_v19 = vadd.f32 %v6560_v21, %v2676_v25  ;;  %v2498_v56 = vpop.f32.mrf.mxu1 }
 0x2d3   :  { %v6568_v33 = vadd.f32 %v5526_v23, %v2498_v56 }
 0x2d4   :  { %v2681_v34 = vrot.slane %v2677_v19, 1  ;;  %v2682_v35 = vperm.slane %v2677_v19, 0 }
 0x2d5   :  { %v2523_v38 = vpack.c.bf16 %v6568_v33, %v6566_v31  ;;  %2847 = vmatpush.bf16.msra.mxu1 %v6599_v63 }
 0x2d6   :  { %v2683_v32 = vperm.slane %v2681_v34, 0  ;;  %v2686_v40 = vmul.f32 %v2682_v35, %v6566_v31 }
 0x2d7   :  { %2580 = vmatmul.bf16.vlgmr.msrb.gmra.mxu2 %v2523_v38 }
 0x2d8   :  { %v2687_v41 = vmul.f32 %v2683_v32, %v6568_v33 }
 0x2d9   :  { %v2678_v42 = vpop.f32.mrf.mxu3  ;;  %2848 = vmatpush.bf16.msra.mxu1 %v6603_v1 }
 0x2da   :  { %v2704_v44 = vpack.c.bf16 %v2687_v41, %v2686_v40 }
 0x2dc   :  { %2761 = vmatmul.bf16.vlgmr.msra.gmra.mxu0 %v2704_v44 }
 0x2dd   :  { %2849 = vmatpush.bf16.msra.mxu1 %v6606_v7 }
 0x2e1   :  { %2850 = vmatpush.bf16.msra.mxu1 %v6609_v62 }
 0x2e5   :  { %2851 = vmatpush.bf16.msra.mxu1 %v6612_v13 }
 0x2e9   :  { %3151 = vmatpush.bf16.msrb.mxu1 %v6510_v8 }
 0x2ed   :  { %3152 = vmatpush.bf16.msrb.mxu1 %v6513_v9 }
 0x2f1   :  { %3153 = vmatpush.bf16.msrb.mxu1 %v6516_v30 }
 0x2f5   :  { %3154 = vmatpush.bf16.msrb.mxu1 %v6519_v10 }
 0x2f9   :  { %3155 = vmatpush.bf16.msrb.mxu1 %v6522_v17 }
 0x2fd   :  { %3156 = vmatpush.bf16.msrb.mxu1 %v6525_v20 }
 0x301   :  { %3157 = vmatpush.bf16.msrb.mxu1 %v6528_v22 }
 0x305   :  { %3158 = vmatpush.bf16.msrb.mxu1 %v6533_v28 }
 0x334   :  { %v2097_v46 = vpop.xlane.xlu0 %2096 }
 0x335   :  { %v6585_v50 = vadd.f32 %v6578_v48, %v2097_v46 }
 0x337   :  { %v2112_v57 = vperm.slane %v6585_v50, %v6582_v53 }
 0x33c   :  { %v2099_v52 = vpop.xlane.xlu0 %2098 }
 0x33d   :  { %v6589_v54 = vadd.f32 %v6578_v48, %v2099_v52 }
 0x33f   :  { %v2113_v58 = vperm.slane %v6589_v54, %v6582_v53 }
 0x341   :  { %v2115_v60 = vsel %vm2114_vm0, %v2113_v58, %v2112_v57 }
 0x342   :  { %v2118_v0 = vsel %vm2117_vm1, %v2115_v60, -inf }
 0x343   :  { %2119 = vmax.xlane.f32.xlu1 %v2118_v0 }
 0x359   :  { %v2762_v18 = vpop.f32.mrf.mxu0 }
 0x35a   :  { %v2581_v23 = vpop.f32.mrf.mxu2 }
 0x35b   :  { %v6618_v25 = vadd.f32 %v5528_v16, %v2581_v23 }
 0x35d   :  { %v2767_v19 = vadd.f32 %v2762_v18, %v6618_v25 }
 0x35f   :  { %v2771_v56 = vmul.f32 1.442695, %v2767_v19  ;;  %vm2769_vm2 = vcmp.gt.f32.partialorder %v2767_v19, 0.0 }
 0x361   :  { %v2764_v38 = vpop.f32.mrf.mxu0  ;;  %5538 = vpow2.f32 %v2771_v56 }
 0x362   :  { %v2583_v34 = vpop.f32.mrf.mxu2 }
 0x363   :  { %v6623_v35 = vadd.f32 %v5528_v16, %v2583_v34 }
 0x365   :  { %v2768_v32 = vadd.f32 %v2764_v38, %v6623_v35 }
 0x367   :  { %v2773_v40 = vmul.f32 1.442695, %v2768_v32  ;;  %v5539_v41 = vpop.eup %5538  ;;  %vm2770_vm3 = vcmp.gt.f32.partialorder %v2768_v32, 0.0 }
 0x368   :  { %v4947_v42 = vadd.f32 -1.0, %v5539_v41 }
 0x369   :  { %5540 = vpow2.f32 %v2773_v40 }
 0x36a   :  { %v2777_v39 = vsel %vm2769_vm2, %v2767_v19, %v4947_v42 }
 0x36f   :  { %v5541_v44 = vpop.eup %5540 }
 0x370   :  { %v4948_v46 = vadd.f32 -1.0, %v5541_v44 }
 0x372   :  { %v2778_v52 = vsel %vm2770_vm3, %v2768_v32, %v4948_v46 }
 0x373   :  { %v2795_v57 = vpack.c.bf16 %v2778_v52, %v2777_v39  ;;  %v6646_v39 = vld [vmem:[%s6967_s18] ss:$0 sm:$0xff] }
 0x375   :  { %2852 = vmatmul.bf16.vlgmr.msra.gmra.mxu1 %v2795_v57 }
 0x376   :  { %3318 = vmatpush.bf16.msra.mxu1 %v6455_v26 }
 0x37a   :  { %3319 = vmatpush.bf16.msra.mxu1 %v6462_v36 }
 0x37e   :  { %3320 = vmatpush.bf16.msra.mxu1 %v6468_v47 }
 0x382   :  { %3321 = vmatpush.bf16.msra.mxu1 %v6473_v61 }
 0x386   :  { %3322 = vmatpush.bf16.msra.mxu1 %v6479_v6 }
 0x38a   :  { %3323 = vmatpush.bf16.msra.mxu1 %v6483_v11 }
 0x38e   :  { %3324 = vmatpush.bf16.msra.mxu1 %v6488_v15 }
 0x392   :  { %3325 = vmatpush.bf16.msra.mxu1 %v6493_v43 }
 0x3b6   :  { %v2120_v58 = vpop.xlane.xlu1 %2119 }
 0x3b7   :  { %v2122_v60 = vperm.slane %v2120_v58, 0  ;;  %v2123_v0 = vperm.slane %v2120_v58, 1 }
 0x3b9   :  { %v2126_v16 = vsub.f32 %v6585_v50, %v2122_v60  ;;  %v2127_v36 = vsub.f32 %v6589_v54, %v2123_v0 }
 0x3bb   :  { %v2128_v26 = vmul.f32 1.442695, %v2126_v16  ;;  %v2130_v47 = vmul.f32 1.442695, %v2127_v36 }
 0x3bd   :  { %5542 = vpow2.f32 %v2128_v26 }
 0x3be   :  { %5544 = vpow2.f32 %v2130_v47 }
 0x3c3   :  { %v5543_v18 = vpop.eup %5542 }
 0x3c4   :  { %2135 = vperm.xlu2 %5519, %v5543_v18   ;;  %v5545_v61 = vpop.eup %5544 }
 0x3cc   :  { %2138 = vperm.xlu2 %5519, %v5545_v61  }
 0x3f2   :  { %v2853_v57 = vpop.f32.mrf.mxu1 }
 0x3f3   :  { %v2862_v60 = vadd.f32 %v6646_v39, %v2853_v57 }
 0x41e   :  { %v2136_v6 = vpop.permute.xlu2 %2135 }
 0x41f   :  { %v2140_v15 = vperm.slane %v2136_v6, %v6582_v53 }
 0x426   :  { %v2139_v11 = vpop.permute.xlu2 %2138 }
 0x427   :  { %v2141_v43 = vperm.slane %v2139_v11, %v6582_v53 }
 0x429   :  { %v2142_v23 = vsel %vm2114_vm0, %v2141_v43, %v2140_v15 }
 0x42a   :  { %v2144_v50 = vsel %vm2117_vm1, %v2142_v23, 0.0 }
 0x42b   :  { %2145 = vadd.xlane.f32.xlu0 %v2144_v50 }
 0x49e   :  { %v2146_v54 = vpop.xlane.xlu0 %2145 }
 0x49f   :  { %5546 = vrcp.f32 %v2146_v54 }
 0x4a5   :  { %v5547_v19 = vpop.eup %5546 }
 0x4a6   :  { %v2150_v56 = vperm.slane %v5547_v19, 1  ;;  %v2149_v34 = vperm.slane %v5547_v19, 0  ;;  %v2855_v19 = vpop.f32.mrf.mxu1 }
 0x4a8   :  { %v2154_v38 = vmul.f32 %v5545_v61, %v2150_v56  ;;  %v2153_v32 = vmul.f32 %v5543_v18, %v2149_v34  ;;  %v6651_v61 = vld [vmem:[%s6968_s19] ss:$0 sm:$0xff]  ;;  %v2863_v34 = vadd.f32 %v6646_v39, %v2855_v19 }
 0x4aa   :  { %2162 = vperm.xlu0 %5520, %v2154_v38   ;;  %2157 = vperm.xlu2 %5519, %v2153_v32  }
 0x504   :  { %v2158_v40 = vpop.permute.xlu2 %2157 }
 0x505   :  { %v2165_v41 = vmul.f32 %v2158_v40, %v6535_v29 }
 0x507   :  { %v2167_v42 = vrot.slane %v2165_v41, 4 }
 0x509   :  { %v2168_v44 = vadd.f32 %v2167_v42, %v2165_v41 }
 0x50b   :  { %v2169_v46 = vrot.slane %v2168_v44, 2 }
 0x50d   :  { %v2170_v52 = vadd.f32 %v2169_v46, %v2168_v44 }
 0x50f   :  { %v2171_v58 = vrot.slane %v2170_v52, 1 }
 0x511   :  { %v2172_v0 = vadd.f32 %v2171_v58, %v2170_v52  ;;  %v5531_v52 = vld [vmem:[#allocation3] ss:$0 sm:$0xff] }
 0x513   :  { %v2864_v16 = vmul.f32 %v2862_v60, %v2172_v0 }
 0x515   :  { %v2868_v26 = vmul.f32 1.442695, %v2864_v16  ;;  %vm2866_vm4 = vcmp.gt.f32.partialorder %v2864_v16, 0.0 }
 0x517   :  { %5548 = vpow2.f32 %v2868_v26 }
 0x51c   :  { %v2163_v36 = vpop.permute.xlu0 %2162 }
 0x51d   :  { %v5549_v47 = vpop.eup %5548  ;;  %v2166_v18 = vmul.f32 %v2163_v36, %v6540_v37 }
 0x51e   :  { %v4981_v6 = vadd.f32 -1.0, %v5549_v47 }
 0x51f   :  { %v2173_v11 = vrot.slane %v2166_v18, 4 }
 0x520   :  { %v2874_v15 = vsel %vm2866_vm4, %v2864_v16, %v4981_v6 }
 0x521   :  { %v2174_v43 = vadd.f32 %v2173_v11, %v2166_v18  ;;  %v2879_v23 = vmul.f32 %v6651_v61, %v2874_v15 }
 0x523   :  { %v2175_v50 = vrot.slane %v2174_v43, 2  ;;  %2881 = vadd.xlane.f32.xlu2 %v2879_v23 }
 0x525   :  { %v2176_v54 = vadd.f32 %v2175_v50, %v2174_v43 }
 0x527   :  { %v2177_v56 = vrot.slane %v2176_v54, 1 }
 0x529   :  { %v2178_v38 = vadd.f32 %v2177_v56, %v2176_v54 }
 0x52b   :  { %v2865_v32 = vmul.f32 %v2863_v34, %v2178_v38 }
 0x52d   :  { %v2870_v40 = vmul.f32 1.442695, %v2865_v32  ;;  %vm2867_vm5 = vcmp.gt.f32.partialorder %v2865_v32, 0.0 }
 0x52f   :  { %5550 = vpow2.f32 %v2870_v40 }
 0x535   :  { %v5551_v41 = vpop.eup %5550 }
 0x536   :  { %v4982_v42 = vadd.f32 -1.0, %v5551_v41 }
 0x538   :  { %v2875_v44 = vsel %vm2867_vm5, %v2865_v32, %v4982_v42 }
 0x539   :  { %v2880_v46 = vmul.f32 %v6651_v61, %v2875_v44 }
 0x53b   :  { %2883 = vadd.xlane.f32.xlu1 %v2880_v46 }
 0x554   :  { %2888 = vperm.xlu1 %5518, %v5531_v52  }
 0x596   :  { %v2882_v58 = vpop.xlane.xlu2 %2881 }
 0x5ae   :  { %v2884_v57 = vpop.xlane.xlu1 %2883 }
 0x5c6   :  { %v6656_v60 = vpop.permute.xlu1 %2888 }
 0x5c7   :  { %v2891_v0 = vadd.f32 %v6656_v60, %v2882_v58  ;;  %v2892_v16 = vadd.f32 %v6656_v60, %v2884_v57 }
 0x5c9   :  { %v2895_v26 = vperm.slane %v2891_v0, %v6582_v53  ;;  %v2896_v36 = vperm.slane %v2892_v16, %v6582_v53 }
 0x5cb   :  { %v2897_v47 = vsel %vm2114_vm0, %v2896_v36, %v2895_v26  ;;  %v6674_v26 = vld [vmem:[#allocation21 + $0x30] sm:$0xff]  ;;  %v6679_v36 = vld [vmem:[#allocation21 + $0x28] sm:$0xff] }
 0x5cc   :  { %v2899_v18 = vsel %vm2117_vm1, %v2897_v47, -inf  ;;  %v6685_v47 = vld [vmem:[#allocation22 + $0x30] sm:$0xff] }
 0x5cd   :  { %2900 = vmax.xlane.f32.xlu0 %v2899_v18  ;;  %v6687_v18 = vld [vmem:[#allocation21 + $0x20] sm:$0xff] }
 0x5d5   :  { %2187 = vadd.xlane.f32.xlu0 %v6549_v5 }
 0x640   :  { %v2901_v6 = vpop.xlane.xlu0 %2900 }
 0x641   :  { %v2903_v11 = vperm.slane %v2901_v6, 0  ;;  %v2904_v15 = vperm.slane %v2901_v6, 1  ;;  %v6692_v6 = vld [vmem:[#allocation22 + $0x28] sm:$0xff] }
 0x643   :  { %v2907_v43 = vsub.f32 %v2891_v0, %v2903_v11  ;;  %v2908_v23 = vsub.f32 %v2892_v16, %v2904_v15  ;;  %v6669_v0 = vld [vmem:[#allocation21 + $0x38] sm:$0xff]  ;;  %v6701_v15 = vld [vmem:[#allocation21 + $0x10] sm:$0xff] }
 0x644   :  { %v6671_v16 = vld [vmem:[#allocation22 + $0x38] sm:$0xff]  ;;  %3110 = vmatpush.bf16.msra.mxu3 %v6669_v0  ;;  %3303 = vmatpush.bf16.msra.mxu0 %v6669_v0 }
 0x645   :  { %v2909_v50 = vmul.f32 1.442695, %v2907_v43  ;;  %v2911_v54 = vmul.f32 1.442695, %v2908_v23  ;;  %3049 = vmatpush.bf16.msra.mxu2 %v6671_v16  ;;  %v6694_v11 = vld [vmem:[#allocation21 + $0x18] sm:$0xff]  ;;  %v6708_v23 = vld [vmem:[#allocation21 + $0x8] sm:$0xff] }
 0x646   :  { %v6706_v43 = vld [vmem:[#allocation22 + $0x18] sm:$0xff] }
 0x647   :  { %5552 = vpow2.f32 %v2909_v50  ;;  %v6713_v50 = vld [vmem:[#allocation22 + $0x10] sm:$0xff] }
 0x648   :  { %5554 = vpow2.f32 %v2911_v54  ;;  %3111 = vmatpush.bf16.msra.mxu3 %v6674_v26  ;;  %3304 = vmatpush.bf16.msra.mxu0 %v6674_v26  ;;  %v6715_v54 = vld [vmem:[#allocation21] sm:$0xff] }
 0x649   :  { %3050 = vmatpush.bf16.msra.mxu2 %v6685_v47 }
 0x64c   :  { %3112 = vmatpush.bf16.msra.mxu3 %v6679_v36  ;;  %3305 = vmatpush.bf16.msra.mxu0 %v6679_v36 }
 0x64d   :  { %v5553_v19 = vpop.eup %5552  ;;  %3051 = vmatpush.bf16.msra.mxu2 %v6692_v6 }
 0x64e   :  { %v5555_v56 = vpop.eup %5554  ;;  %2916 = vperm.xlu2 %5519, %v5553_v19  }
 0x64f   :  { %2919 = vperm.xlu1 %5518, %v5555_v56  }
 0x650   :  { %3113 = vmatpush.bf16.msra.mxu3 %v6687_v18  ;;  %3306 = vmatpush.bf16.msra.mxu0 %v6687_v18 }
 0x654   :  { %3114 = vmatpush.bf16.msra.mxu3 %v6694_v11  ;;  %3307 = vmatpush.bf16.msra.mxu0 %v6694_v11 }
 0x658   :  { %3115 = vmatpush.bf16.msra.mxu3 %v6701_v15  ;;  %3308 = vmatpush.bf16.msra.mxu0 %v6701_v15 }
 0x65c   :  { %3116 = vmatpush.bf16.msra.mxu3 %v6708_v23  ;;  %3309 = vmatpush.bf16.msra.mxu0 %v6708_v23 }
 0x660   :  { %3117 = vmatpush.bf16.msra.mxu3 %v6715_v54  ;;  %3310 = vmatpush.bf16.msra.mxu0 %v6715_v54 }
 0x663   :  { %3118 = vmatmul.bf16.vlgmr.msra.gmra.mxu3 %v6505_v4 }
 0x664   :  { %3290 = vmatpush.bf16.msrb.mxu3 %v6671_v16 }
 0x668   :  { %3291 = vmatpush.bf16.msrb.mxu3 %v6685_v47 }
 0x66c   :  { %3292 = vmatpush.bf16.msrb.mxu3 %v6692_v6 }
 0x6a8   :  { %v2917_v34 = vpop.permute.xlu2 %2916 }
 0x6a9   :  { %v2921_v32 = vperm.slane %v2917_v34, %v6582_v53 }
 0x6c1   :  { %v2920_v38 = vpop.permute.xlu1 %2919 }
 0x6c2   :  { %v2922_v40 = vperm.slane %v2920_v38, %v6582_v53 }
 0x6c4   :  { %v2923_v5 = vsel %vm2114_vm0, %v2922_v40, %v2921_v32 }
 0x6c5   :  { %v2925_v41 = vsel %vm2117_vm1, %v2923_v5, 0.0 }
 0x6c6   :  { %2926 = vadd.xlane.f32.xlu2 %v2925_v41 }
 0x739   :  { %v2927_v42 = vpop.xlane.xlu2 %2926 }
 0x73a   :  { %5556 = vrcp.f32 %v2927_v42 }
 0x740   :  { %v5557_v44 = vpop.eup %5556 }
 0x741   :  { %v2930_v46 = vperm.slane %v5557_v44, 0  ;;  %v2931_v57 = vperm.slane %v5557_v44, 1 }
 0x743   :  { %v2934_v52 = vmul.f32 %v5553_v19, %v2930_v46  ;;  %v2935_v58 = vmul.f32 %v5555_v56, %v2931_v57  ;;  %v6721_v19 = vld [vmem:[#allocation22 + $0x8] sm:$0xff]  ;;  %v6726_v56 = vld [vmem:[#allocation22] sm:$0xff] }
 0x745   :  { %2938 = vperm.xlu1 %5518, %v2934_v52  }
 0x74d   :  { %2943 = vperm.xlu1 %5518, %v2935_v58  }
 0x777   :  { %2189 = vadd.xlane.f32.xlu1 %v6554_v12  ;;  %v6699_v12 = vld [vmem:[#allocation22 + $0x20] sm:$0xff] }
 0x778   :  { %3052 = vmatpush.bf16.msra.mxu2 %v6699_v12  ;;  %3293 = vmatpush.bf16.msrb.mxu3 %v6699_v12 }
 0x77c   :  { %3053 = vmatpush.bf16.msra.mxu2 %v6706_v43  ;;  %3294 = vmatpush.bf16.msrb.mxu3 %v6706_v43 }
 0x780   :  { %3054 = vmatpush.bf16.msra.mxu2 %v6713_v50  ;;  %3295 = vmatpush.bf16.msrb.mxu3 %v6713_v50 }
 0x784   :  { %3055 = vmatpush.bf16.msra.mxu2 %v6721_v19  ;;  %3296 = vmatpush.bf16.msrb.mxu3 %v6721_v19 }
 0x788   :  { %3056 = vmatpush.bf16.msra.mxu2 %v6726_v56  ;;  %3297 = vmatpush.bf16.msrb.mxu3 %v6726_v56 }
 0x78c   :  { %3178 = vmatpush.bf16.msrb.mxu2 %v6575_v45  ;;  %3367 = vmatpush.bf16.msra.mxu3 %v6575_v45 }
 0x790   :  { %3179 = vmatpush.bf16.msrb.mxu2 %v6580_v49  ;;  %3368 = vmatpush.bf16.msra.mxu3 %v6580_v49 }
 0x794   :  { %3180 = vmatpush.bf16.msrb.mxu2 %v6591_v55  ;;  %3369 = vmatpush.bf16.msra.mxu3 %v6591_v55 }
 0x798   :  { %3181 = vmatpush.bf16.msrb.mxu2 %v6599_v63  ;;  %3370 = vmatpush.bf16.msra.mxu3 %v6599_v63 }
 0x79c   :  { %3182 = vmatpush.bf16.msrb.mxu2 %v6603_v1  ;;  %3371 = vmatpush.bf16.msra.mxu3 %v6603_v1 }
 0x7a0   :  { %3183 = vmatpush.bf16.msrb.mxu2 %v6606_v7  ;;  %3372 = vmatpush.bf16.msra.mxu3 %v6606_v7 }
 0x7a4   :  { %3184 = vmatpush.bf16.msrb.mxu2 %v6609_v62  ;;  %3373 = vmatpush.bf16.msra.mxu3 %v6609_v62 }
 0x7a8   :  { %3185 = vmatpush.bf16.msrb.mxu2 %v6612_v13  ;;  %3374 = vmatpush.bf16.msra.mxu3 %v6612_v13 }
 0x7b7   :  { %v2939_v34 = vpop.permute.xlu1 %2938 }
 0x7b8   :  { %v2946_v38 = vmul.f32 %v2939_v34, %v6503_v2 }
 0x7ba   :  { %v2948_v4 = vrot.slane %v2946_v38, 4 }
 0x7bc   :  { %v2949_v32 = vadd.f32 %v2948_v4, %v2946_v38 }
 0x7be   :  { %v2950_v40 = vrot.slane %v2949_v32, 2 }
 0x7bf   :  { %v2944_v5 = vpop.permute.xlu1 %2943 }
 0x7c0   :  { %v2951_v41 = vadd.f32 %v2950_v40, %v2949_v32  ;;  %v2947_v42 = vmul.f32 %v2944_v5, %v6501_v3 }
 0x7c2   :  { %v2954_v44 = vrot.slane %v2947_v42, 4  ;;  %v2952_v46 = vrot.slane %v2951_v41, 1 }
 0x7c4   :  { %v2955_v52 = vadd.f32 %v2954_v44, %v2947_v42  ;;  %v2953_v58 = vadd.f32 %v2952_v46, %v2951_v41  ;;  %v2188_v46 = vpop.xlane.xlu0 %2187 }
 0x7c6   :  { %v2956_v57 = vrot.slane %v2955_v52, 2  ;;  %v2992_v4 = vpack.c.bf16 %v2953_v58, %v2953_v58 }
 0x7c8   :  { %v2957_v34 = vadd.f32 %v2956_v57, %v2955_v52  ;;  %v2996_v5 = vunpack.c.l.b16 %v2992_v4 }
 0x7ca   :  { %v2958_v38 = vrot.slane %v2957_v34, 1 }
 0x7cc   :  { %v2959_v32 = vadd.f32 %v2958_v38, %v2957_v34  ;;  %v6769_v38 = vld [vmem:[%s6969_s23] ss:$0 sm:$0xff] }
 0x7ce   :  { %v2993_v40 = vpack.c.bf16 %v2959_v32, %v2959_v32 }
 0x7d0   :  { %v2997_v42 = vunpack.c.l.b16 %v2993_v40 }
 0x7d2   :  { %v2998_v44 = vsel %vm2114_vm0, %v2997_v42, %v2996_v5 }
 0x7d3   :  { %v2999_v41 = vpack.c.b16 %v2998_v44, %v2998_v44 }
 0x7d5   :  { %3057 = vmatmul.bf16.vlgmr.msra.gmra.mxu2 %v2999_v41 }
 0x7d6   :  { %3340 = vmatpush.bf16.msra.mxu2 %v6510_v8  ;;  %v2191_v8 = vadd.f32 %v2188_v46, %v6578_v48 }
 0x7d8   :  { %v2195_v57 = vperm.slane %v2191_v8, %v6582_v53 }
 0x7da   :  { %3341 = vmatpush.bf16.msra.mxu2 %v6513_v9 }
 0x7de   :  { %3342 = vmatpush.bf16.msra.mxu2 %v6516_v30 }
 0x7e2   :  { %3343 = vmatpush.bf16.msra.mxu2 %v6519_v10 }
 0x7e6   :  { %3344 = vmatpush.bf16.msra.mxu2 %v6522_v17  ;;  %v3119_v17 = vpop.f32.mrf.mxu3 }
 0x7ea   :  { %v2190_v52 = vpop.xlane.xlu1 %2189  ;;  %3345 = vmatpush.bf16.msra.mxu2 %v6525_v20 }
 0x7eb   :  { %v2192_v9 = vadd.f32 %v2190_v52, %v6578_v48 }
 0x7ed   :  { %v2196_v30 = vperm.slane %v2192_v9, %v6582_v53 }
 0x7ee   :  { %3346 = vmatpush.bf16.msra.mxu2 %v6528_v22  ;;  %v3121_v34 = vpop.f32.mrf.mxu3 }
 0x7ef   :  { %v2197_v10 = vsel %vm2114_vm0, %v2196_v30, %v2195_v57 }
 0x7f0   :  { %v2199_v58 = vsel %vm2117_vm1, %v2197_v10, -inf }
 0x7f1   :  { %2200 = vmax.xlane.f32.xlu0 %v2199_v58 }
 0x7f2   :  { %3347 = vmatpush.bf16.msra.mxu2 %v6533_v28 }
 0x858   :  { %v3058_v20 = vpop.f32.mrf.mxu2 }
 0x859   :  { %v3120_v4 = vadd.f32 %v3119_v17, %v3058_v20 }
 0x85b   :  { %v3127_v32 = vadd.f32 %v6769_v38, %v3120_v4 }
 0x85d   :  { %v3128_v40 = vpack.c.bf16 %v3127_v32, %v3127_v32 }
 0x85f   :  { %3137 = vmatmul.bf16.vlgmr.msrb.gmra.mxu0 %v3128_v40 }
 0x860   :  { %v3060_v5 = vpop.f32.mrf.mxu2  ;;  %3479 = vmatpush.bf16.msrb.mxu0 %v6671_v16 }
 0x864   :  { %v2201_v22 = vpop.xlane.xlu0 %2200  ;;  %3480 = vmatpush.bf16.msrb.mxu0 %v6685_v47 }
 0x865   :  { %v2203_v42 = vperm.slane %v2201_v22, 0  ;;  %v2204_v44 = vperm.slane %v2201_v22, 1 }
 0x867   :  { %v2207_v41 = vsub.f32 %v2191_v8, %v2203_v42  ;;  %v2208_v28 = vsub.f32 %v2192_v9, %v2204_v44 }
 0x868   :  { %3481 = vmatpush.bf16.msrb.mxu0 %v6692_v6 }
 0x869   :  { %v2209_v46 = vmul.f32 1.442695, %v2207_v41  ;;  %v2211_v52 = vmul.f32 1.442695, %v2208_v28 }
 0x86b   :  { %5558 = vpow2.f32 %v2209_v46 }
 0x86c   :  { %5560 = vpow2.f32 %v2211_v52  ;;  %3482 = vmatpush.bf16.msrb.mxu0 %v6699_v12 }
 0x86f   :  { %3311 = vmatmul.bf16.vlgmr.msra.gmra.mxu0 %v3128_v40 }
 0x870   :  { %3483 = vmatpush.bf16.msrb.mxu0 %v6706_v43 }
 0x871   :  { %v5559_v57 = vpop.eup %5558 }
 0x872   :  { %v5561_v30 = vpop.eup %5560  ;;  %2216 = vperm.xlu0 %5520, %v5559_v57  }
 0x873   :  { %2219 = vperm.xlu2 %5519, %v5561_v30  }
 0x874   :  { %3484 = vmatpush.bf16.msrb.mxu0 %v6713_v50 }
 0x878   :  { %3485 = vmatpush.bf16.msrb.mxu0 %v6721_v19 }
 0x87c   :  { %3486 = vmatpush.bf16.msrb.mxu0 %v6726_v56 }
 0x880   :  { %3556 = vmatpush.bf16.msra.mxu0 %v6575_v45 }
 0x884   :  { %3557 = vmatpush.bf16.msra.mxu0 %v6580_v49 }
 0x888   :  { %3558 = vmatpush.bf16.msra.mxu0 %v6591_v55 }
 0x88c   :  { %3559 = vmatpush.bf16.msra.mxu0 %v6599_v63 }
 0x890   :  { %3560 = vmatpush.bf16.msra.mxu0 %v6603_v1 }
 0x894   :  { %3561 = vmatpush.bf16.msra.mxu0 %v6606_v7 }
 0x898   :  { %3562 = vmatpush.bf16.msra.mxu0 %v6609_v62 }
 0x89c   :  { %3563 = vmatpush.bf16.msra.mxu0 %v6612_v13 }
 0x8cd   :  { %v2220_v17 = vpop.permute.xlu2 %2219 }
 0x8ce   :  { %v2222_v1 = vperm.slane %v2220_v17, %v6582_v53 }
 0x8dc   :  { %v3138_v8 = vpop.f32.mrf.mxu0 }
 0x8dd   :  { %v3139_v9 = vadd.f32 %v6560_v21, %v3138_v8 }
 0x8df   :  { %v3143_v10 = vrot.slane %v3139_v9, 1  ;;  %v3144_v58 = vperm.slane %v3139_v9, 0 }
 0x8e1   :  { %v3145_v45 = vperm.slane %v3143_v10, 0  ;;  %v3148_v49 = vmul.f32 %v3144_v58, %v6566_v31 }
 0x8e3   :  { %v3149_v55 = vmul.f32 %v3145_v45, %v6568_v33 }
 0x8e4   :  { %v3140_v63 = vpop.f32.mrf.mxu0  ;;  %v2217_v34 = vpop.permute.xlu0 %2216 }
 0x8e5   :  { %v3150_v7 = vpack.c.bf16 %v3149_v55, %v3148_v49  ;;  %v2221_v62 = vperm.slane %v2217_v34, %v6582_v53  ;;  %v5622_v34 = vld [vmem:[#allocation15 + $0x28] sm:$0xff] }
 0x8e7   :  { %3159 = vmatmul.bf16.vlgmr.msrb.gmra.mxu1 %v3150_v7  ;;  %v2223_v13 = vsel %vm2114_vm0, %v2222_v1, %v2221_v62  ;;  %v5623_v1 = vld [vmem:[#allocation15 + $0x20] sm:$0xff]  ;;  %v5624_v7 = vld [vmem:[#allocation15 + $0x18] sm:$0xff]  ;;  %v5625_v62 = vld [vmem:[#allocation15 + $0x10] sm:$0xff] }
 0x8e8   :  { %v2225_v21 = vsel %vm2117_vm1, %v2223_v13, 0.0  ;;  %3492 = vmatpush.bf16.msrb.mxu1 %v6669_v0  ;;  %v5626_v13 = vld [vmem:[#allocation15 + $0x8] sm:$0xff] }
 0x8e9   :  { %2226 = vadd.xlane.f32.xlu0 %v2225_v21  ;;  %v5627_v21 = vld [vmem:[#allocation15] sm:$0xff] }
 0x8ec   :  { %v6796_v20 = vpop.f32.mrf.mxu0  ;;  %3493 = vmatpush.bf16.msrb.mxu1 %v6674_v26 }
 0x8f0   :  { %3494 = vmatpush.bf16.msrb.mxu1 %v6679_v36 }
 0x8f4   :  { %v3314_v4 = vpop.f32.mrf.mxu0  ;;  %3495 = vmatpush.bf16.msrb.mxu1 %v6687_v18 }
 0x8f8   :  { %3496 = vmatpush.bf16.msrb.mxu1 %v6694_v11 }
 0x8fc   :  { %3497 = vmatpush.bf16.msrb.mxu1 %v6701_v15 }
 0x900   :  { %3498 = vmatpush.bf16.msrb.mxu1 %v6708_v23 }
 0x904   :  { %3499 = vmatpush.bf16.msrb.mxu1 %v6715_v54 }
 0x95c   :  { %v2227_v32 = vpop.xlane.xlu0 %2226 }
 0x95d   :  { %5562 = vrcp.f32 %v2227_v32 }
 0x963   :  { %v5563_v40 = vpop.eup %5562 }
 0x964   :  { %v3160_v5 = vpop.f32.mrf.mxu1  ;;  %v2231_v22 = vperm.slane %v5563_v40, 1  ;;  %v2230_v42 = vperm.slane %v5563_v40, 0 }
 0x965   :  { %v3165_v44 = vadd.f32 %v3160_v5, %v6618_v25 }
 0x966   :  { %v2235_v41 = vmul.f32 %v5561_v30, %v2231_v22  ;;  %v2234_v28 = vmul.f32 %v5559_v57, %v2230_v42  ;;  %v5620_v57 = vld [vmem:[#allocation15 + $0x38] sm:$0xff]  ;;  %v5621_v30 = vld [vmem:[#allocation15 + $0x30] sm:$0xff] }
 0x967   :  { %v3169_v46 = vmul.f32 1.442695, %v3165_v44  ;;  %vm3167_vm6 = vcmp.gt.f32.partialorder %v3165_v44, 0.0 }
 0x968   :  { %2243 = vperm.xlu2 %5519, %v2235_v41   ;;  %2238 = vperm.xlu1 %5518, %v2234_v28  }
 0x969   :  { %5564 = vpow2.f32 %v3169_v46 }
 0x96c   :  { %v3162_v52 = vpop.f32.mrf.mxu1 }
 0x96d   :  { %v3166_v8 = vadd.f32 %v3162_v52, %v6623_v35 }
 0x96f   :  { %v3171_v9 = vmul.f32 1.442695, %v3166_v8  ;;  %v5565_v10 = vpop.eup %5564  ;;  %vm3168_vm7 = vcmp.gt.f32.partialorder %v3166_v8, 0.0 }
 0x970   :  { %v5047_v58 = vadd.f32 -1.0, %v5565_v10 }
 0x971   :  { %5566 = vpow2.f32 %v3171_v9 }
 0x972   :  { %v3175_v49 = vsel %vm3167_vm6, %v3165_v44, %v5047_v58 }
 0x977   :  { %v5567_v45 = vpop.eup %5566 }
 0x978   :  { %v5048_v17 = vadd.f32 -1.0, %v5567_v45 }
 0x97a   :  { %v3176_v55 = vsel %vm3168_vm7, %v3166_v8, %v5048_v17 }
 0x97b   :  { %v3177_v63 = vpack.c.bf16 %v3176_v55, %v3175_v49 }
 0x97d   :  { %3186 = vmatmul.bf16.vlgmr.msrb.gmra.mxu2 %v3177_v63 }
 0x97e   :  { %3507 = vmatpush.bf16.msrb.mxu2 %v5620_v57 }
 0x982   :  { %3508 = vmatpush.bf16.msrb.mxu2 %v5621_v30 }
 0x986   :  { %3509 = vmatpush.bf16.msrb.mxu2 %v5622_v34 }
 0x98a   :  { %3510 = vmatpush.bf16.msrb.mxu2 %v5623_v1 }
 0x98e   :  { %3511 = vmatpush.bf16.msrb.mxu2 %v5624_v7 }
 0x992   :  { %3512 = vmatpush.bf16.msrb.mxu2 %v5625_v62 }
 0x996   :  { %3513 = vmatpush.bf16.msrb.mxu2 %v5626_v13 }
 0x99a   :  { %3514 = vmatpush.bf16.msrb.mxu2 %v5627_v21 }
 0x9c2   :  { %v2244_v5 = vpop.permute.xlu2 %2243 }
 0x9c3   :  { %v2247_v22 = vmul.f32 %v2244_v5, %v6540_v37 }
 0x9c5   :  { %v2254_v44 = vrot.slane %v2247_v22, 4 }
 0x9c7   :  { %v2255_v28 = vadd.f32 %v2254_v44, %v2247_v22 }
 0x9c9   :  { %v2256_v52 = vrot.slane %v2255_v28, 2 }
 0x9cb   :  { %v2257_v10 = vadd.f32 %v2256_v52, %v2255_v28 }
 0x9cd   :  { %v2258_v55 = vrot.slane %v2257_v10, 1 }
 0x9cf   :  { %v2259_v63 = vadd.f32 %v2258_v55, %v2257_v10 }
 0x9da   :  { %v2239_v4 = vpop.permute.xlu1 %2238 }
 0x9db   :  { %v2246_v32 = vmul.f32 %v2239_v4, %v6535_v29 }
 0x9dd   :  { %v2248_v40 = vrot.slane %v2246_v32, 4 }
 0x9df   :  { %v2249_v42 = vadd.f32 %v2248_v40, %v2246_v32 }
 0x9e1   :  { %v2250_v41 = vrot.slane %v2249_v42, 2 }
 0x9e3   :  { %v2251_v46 = vadd.f32 %v2250_v41, %v2249_v42 }
 0x9e5   :  { %v2252_v8 = vrot.slane %v2251_v46, 1 }
 0x9e7   :  { %v2253_v58 = vadd.f32 %v2252_v8, %v2251_v46 }
 0xa00   :  { %v3187_v9 = vpop.f32.mrf.mxu2 }
 0xa01   :  { %v3192_v45 = vadd.f32 %v6646_v39, %v3187_v9 }
 0xa03   :  { %v3194_v17 = vmul.f32 %v3192_v45, %v2253_v58 }
 0xa05   :  { %v3198_v49 = vmul.f32 1.442695, %v3194_v17  ;;  %vm3196_vm8 = vcmp.gt.f32.partialorder %v3194_v17, 0.0 }
 0xa07   :  { %5568 = vpow2.f32 %v3198_v49 }
 0xa08   :  { %v3189_v29 = vpop.f32.mrf.mxu2 }
 0xa09   :  { %v3193_v37 = vadd.f32 %v6646_v39, %v3189_v29 }
 0xa0b   :  { %v3195_v57 = vmul.f32 %v3193_v37, %v2259_v63 }
 0xa0d   :  { %v5569_v30 = vpop.eup %5568  ;;  %v3200_v34 = vmul.f32 1.442695, %v3195_v57  ;;  %vm3197_vm9 = vcmp.gt.f32.partialorder %v3195_v57, 0.0 }
 0xa0e   :  { %v5049_v1 = vadd.f32 -1.0, %v5569_v30 }
 0xa0f   :  { %5570 = vpow2.f32 %v3200_v34 }
 0xa10   :  { %v3204_v7 = vsel %vm3196_vm8, %v3194_v17, %v5049_v1 }
 0xa11   :  { %v3206_v62 = vmul.f32 %v6651_v61, %v3204_v7 }
 0xa13   :  { %3208 = vadd.xlane.f32.xlu2 %v3206_v62 }
 0xa15   :  { %v5571_v13 = vpop.eup %5570 }
 0xa16   :  { %v5050_v21 = vadd.f32 -1.0, %v5571_v13 }
 0xa18   :  { %v3205_v4 = vsel %vm3197_vm9, %v3195_v57, %v5050_v21 }
 0xa19   :  { %v3207_v32 = vmul.f32 %v6651_v61, %v3205_v4 }
 0xa1b   :  { %3210 = vadd.xlane.f32.xlu1 %v3207_v32 }
 0xa86   :  { %v3209_v40 = vpop.xlane.xlu2 %3208 }
 0xa87   :  { %v3212_v5 = vadd.f32 %v3209_v40, %v6656_v60 }
 0xa89   :  { %v3216_v44 = vperm.slane %v3212_v5, %v6582_v53 }
 0xa8e   :  { %v3211_v22 = vpop.xlane.xlu1 %3210 }
 0xa8f   :  { %v3213_v42 = vadd.f32 %v3211_v22, %v6656_v60 }
 0xa91   :  { %v3217_v41 = vperm.slane %v3213_v42, %v6582_v53 }
 0xa93   :  { %v3218_v28 = vsel %vm2114_vm0, %v3217_v41, %v3216_v44 }
 0xa94   :  { %v3220_v46 = vsel %vm2117_vm1, %v3218_v28, -inf }
 0xa95   :  { %3221 = vmax.xlane.f32.xlu0 %v3220_v46 }
 0xb08   :  { %v3222_v52 = vpop.xlane.xlu0 %3221 }
 0xb09   :  { %v3224_v8 = vperm.slane %v3222_v52, 0  ;;  %v3225_v9 = vperm.slane %v3222_v52, 1 }
 0xb0b   :  { %v3228_v10 = vsub.f32 %v3212_v5, %v3224_v8  ;;  %v3229_v58 = vsub.f32 %v3213_v42, %v3225_v9 }
 0xb0d   :  { %v3230_v45 = vmul.f32 1.442695, %v3228_v10  ;;  %v3232_v17 = vmul.f32 1.442695, %v3229_v58 }
 0xb0f   :  { %5572 = vpow2.f32 %v3230_v45 }
 0xb10   :  { %5574 = vpow2.f32 %v3232_v17 }
 0xb15   :  { %v5573_v49 = vpop.eup %5572 }
 0xb16   :  { %v5575_v55 = vpop.eup %5574  ;;  %3237 = vperm.xlu0 %5520, %v5573_v49  }
 0xb17   :  { %3240 = vperm.xlu2 %5519, %v5575_v55  }
 0xb71   :  { %v3241_v29 = vpop.permute.xlu2 %3240 }
 0xb72   :  { %v3243_v37 = vperm.slane %v3241_v29, %v6582_v53 }
 0xb88   :  { %v3238_v63 = vpop.permute.xlu0 %3237 }
 0xb89   :  { %v3242_v57 = vperm.slane %v3238_v63, %v6582_v53 }
 0xb8b   :  { %v3244_v30 = vsel %vm2114_vm0, %v3243_v37, %v3242_v57  ;;  %v5628_v37 = vld [vmem:[#allocation16 + $0x38] sm:$0xff]  ;;  %v5629_v57 = vld [vmem:[#allocation16 + $0x30] sm:$0xff] }
 0xb8c   :  { %v3246_v34 = vsel %vm2117_vm1, %v3244_v30, 0.0  ;;  %v5630_v30 = vld [vmem:[#allocation16 + $0x28] sm:$0xff] }
 0xb8d   :  { %3247 = vadd.xlane.f32.xlu0 %v3246_v34  ;;  %v5631_v34 = vld [vmem:[#allocation16 + $0x20] sm:$0xff] }
 0xc00   :  { %v3248_v1 = vpop.xlane.xlu0 %3247 }
 0xc01   :  { %5576 = vrcp.f32 %v3248_v1  ;;  %v5632_v1 = vld [vmem:[#allocation16 + $0x18] sm:$0xff] }
 0xc07   :  { %v5577_v7 = vpop.eup %5576 }
 0xc08   :  { %v3252_v62 = vperm.slane %v5577_v7, 1  ;;  %v3251_v13 = vperm.slane %v5577_v7, 0 }
 0xc0a   :  { %v3256_v21 = vmul.f32 %v5575_v55, %v3252_v62  ;;  %v3255_v4 = vmul.f32 %v5573_v49, %v3251_v13 }
 0xc0c   :  { %3264 = vperm.xlu2 %5519, %v3256_v21   ;;  %3259 = vperm.xlu1 %5518, %v3255_v4   ;;  %v5633_v21 = vld [vmem:[#allocation16 + $0x10] sm:$0xff] }
 0xc35   :  { %2268 = vadd.xlane.f32.xlu2 %v6552_v24 }
 0xc36   :  { %2270 = vadd.xlane.f32.xlu1 %v6556_v14 }
 0xc66   :  { %v3265_v32 = vpop.permute.xlu2 %3264 }
 0xc67   :  { %v3268_v40 = vmul.f32 %v3265_v32, %v6501_v3 }
 0xc69   :  { %v3275_v5 = vrot.slane %v3268_v40, 4 }
 0xc6b   :  { %v3276_v22 = vadd.f32 %v3275_v5, %v3268_v40  ;;  %v5634_v5 = vld [vmem:[#allocation16 + $0x8] sm:$0xff] }
 0xc6d   :  { %v3277_v42 = vrot.slane %v3276_v22, 2 }
 0xc6f   :  { %v3278_v41 = vadd.f32 %v3277_v42, %v3276_v22 }
 0xc71   :  { %v3279_v52 = vrot.slane %v3278_v41, 1 }
 0xc73   :  { %v3280_v10 = vadd.f32 %v3279_v52, %v3278_v41 }
 0xc75   :  { %v3282_v24 = vpack.c.bf16 %v3280_v10, %v3280_v10 }
 0xc77   :  { %v3286_v49 = vunpack.c.l.b16 %v3282_v24 }
 0xc7e   :  { %v3260_v44 = vpop.permute.xlu1 %3259 }
 0xc7f   :  { %v3267_v28 = vmul.f32 %v3260_v44, %v6503_v2  ;;  %v5635_v44 = vld [vmem:[#allocation16] sm:$0xff] }
 0xc81   :  { %v3269_v46 = vrot.slane %v3267_v28, 4 }
 0xc83   :  { %v3270_v8 = vadd.f32 %v3269_v46, %v3267_v28 }
 0xc85   :  { %v3271_v9 = vrot.slane %v3270_v8, 2 }
 0xc87   :  { %v3272_v58 = vadd.f32 %v3271_v9, %v3270_v8 }
 0xc89   :  { %v3273_v45 = vrot.slane %v3272_v58, 1 }
 0xc8b   :  { %v3274_v17 = vadd.f32 %v3273_v45, %v3272_v58 }
 0xc8d   :  { %v3281_v14 = vpack.c.bf16 %v3274_v17, %v3274_v17 }
 0xc8f   :  { %v3285_v55 = vunpack.c.l.b16 %v3281_v14 }
 0xc91   :  { %v3287_v29 = vsel %vm2114_vm0, %v3286_v49, %v3285_v55 }
 0xc92   :  { %v3288_v63 = vpack.c.b16 %v3287_v29, %v3287_v29 }
 0xc94   :  { %3298 = vmatmul.bf16.vlgmr.msrb.gmra.mxu3 %v3288_v63 }
 0xc95   :  { %3529 = vmatpush.bf16.msrb.mxu3 %v5628_v37 }
 0xc99   :  { %3530 = vmatpush.bf16.msrb.mxu3 %v5629_v57 }
 0xc9d   :  { %3531 = vmatpush.bf16.msrb.mxu3 %v5630_v30 }
 0xca1   :  { %3532 = vmatpush.bf16.msrb.mxu3 %v5631_v34 }
 0xca5   :  { %3533 = vmatpush.bf16.msrb.mxu3 %v5632_v1 }
 0xca8   :  { %v2269_v7 = vpop.xlane.xlu2 %2268 }
 0xca9   :  { %v2272_v62 = vadd.f32 %v2269_v7, %v6578_v48  ;;  %v2271_v13 = vpop.xlane.xlu1 %2270  ;;  %3534 = vmatpush.bf16.msrb.mxu3 %v5633_v21 }
 0xcaa   :  { %v2273_v4 = vadd.f32 %v2271_v13, %v6578_v48 }
 0xcab   :  { %v2276_v32 = vperm.slane %v2272_v62, %v6582_v53 }
 0xcac   :  { %v2277_v40 = vperm.slane %v2273_v4, %v6582_v53 }
 0xcad   :  { %3535 = vmatpush.bf16.msrb.mxu3 %v5634_v5 }
 0xcae   :  { %v2278_v22 = vsel %vm2114_vm0, %v2277_v40, %v2276_v32 }
 0xcaf   :  { %v2280_v42 = vsel %vm2117_vm1, %v2278_v22, -inf }
 0xcb0   :  { %2281 = vmax.xlane.f32.xlu0 %v2280_v42 }
 0xcb1   :  { %3536 = vmatpush.bf16.msrb.mxu3 %v5635_v44 }
 0xd17   :  { %v3299_v41 = vpop.f32.mrf.mxu3 }
 0xd18   :  { %v3313_v28 = vadd.f32 %v6796_v20, %v3299_v41 }
 0xd1a   :  { %v3316_v46 = vadd.f32 %v6769_v38, %v3313_v28 }
 0xd1c   :  { %v3317_v52 = vpack.c.bf16 %v3316_v46, %v3316_v46 }
 0xd1e   :  { %3326 = vmatmul.bf16.vlgmr.msra.gmra.mxu1 %v3317_v52 }
 0xd1f   :  { %v3301_v8 = vpop.f32.mrf.mxu3  ;;  %3668 = vmatpush.bf16.msra.mxu1 %v6671_v16 }
 0xd23   :  { %v2282_v9 = vpop.xlane.xlu0 %2281  ;;  %3669 = vmatpush.bf16.msra.mxu1 %v6685_v47 }
 0xd24   :  { %v2284_v10 = vperm.slane %v2282_v9, 0  ;;  %v2285_v58 = vperm.slane %v2282_v9, 1 }
 0xd26   :  { %v2288_v45 = vsub.f32 %v2272_v62, %v2284_v10  ;;  %v2289_v24 = vsub.f32 %v2273_v4, %v2285_v58  ;;  %v6869_v58 = vld [vmem:[#allocation7 + $0x8] sm:$0xff] }
 0xd27   :  { %3670 = vmatpush.bf16.msra.mxu1 %v6692_v6  ;;  %v6845_v6 = vld [vmem:[%s6964_s5] ss:$0 sm:$0xff] }
 0xd28   :  { %v2290_v17 = vmul.f32 1.442695, %v2288_v45  ;;  %v2292_v14 = vmul.f32 1.442695, %v2289_v24 }
 0xd2a   :  { %5578 = vpow2.f32 %v2290_v17 }
 0xd2b   :  { %5580 = vpow2.f32 %v2292_v14  ;;  %3671 = vmatpush.bf16.msra.mxu1 %v6699_v12 }
 0xd2e   :  { %3500 = vmatmul.bf16.vlgmr.msrb.gmra.mxu1 %v3317_v52  ;;  %v6866_v52 = vld [vmem:[#allocation7] sm:$0xff] }
 0xd2f   :  { %3672 = vmatpush.bf16.msra.mxu1 %v6706_v43 }
 0xd30   :  { %v5579_v16 = vpop.eup %5578 }
 0xd31   :  { %v5581_v20 = vpop.eup %5580  ;;  %2297 = vperm.xlu0 %5520, %v5579_v16  }
 0xd32   :  { %2300 = vperm.xlu2 %5519, %v5581_v20  }
 0xd33   :  { %3673 = vmatpush.bf16.msra.mxu1 %v6713_v50 }
 0xd37   :  { %3674 = vmatpush.bf16.msra.mxu1 %v6721_v19 }
 0xd3b   :  { %3675 = vmatpush.bf16.msra.mxu1 %v6726_v56 }
 0xd8c   :  { %v2301_v63 = vpop.permute.xlu2 %2300 }
 0xd8d   :  { %v2303_v50 = vperm.slane %v2301_v63, %v6582_v53 }
 0xd9b   :  { %v3327_v47 = vpop.f32.mrf.mxu1 }
 0xd9c   :  { %v3328_v49 = vadd.f32 %v6845_v6, %v3327_v47 }
 0xd9e   :  { %v3332_v55 = vrot.slane %v3328_v49, 1  ;;  %v3333_v12 = vperm.slane %v3328_v49, 0 }
 0xda0   :  { %v3334_v29 = vperm.slane %v3332_v55, 0  ;;  %v3337_v43 = vmul.f32 %v3333_v12, %v6566_v31 }
 0xda2   :  { %v3338_v37 = vmul.f32 %v3334_v29, %v6568_v33 }
 0xda3   :  { %v3329_v57 = vpop.f32.mrf.mxu1  ;;  %v2298_v30 = vpop.permute.xlu0 %2297 }
 0xda4   :  { %v3339_v19 = vpack.c.bf16 %v3338_v37, %v3337_v43  ;;  %v2302_v56 = vperm.slane %v2298_v30, %v6582_v53 }
 0xda6   :  { %3348 = vmatmul.bf16.vlgmr.msra.gmra.mxu2 %v3339_v19  ;;  %v2304_v34 = vsel %vm2114_vm0, %v2303_v50, %v2302_v56 }
 0xda7   :  { %v2306_v1 = vsel %vm2117_vm1, %v2304_v34, 0.0  ;;  %3681 = vmatpush.bf16.msra.mxu2 %v6669_v0 }
 0xda8   :  { %2307 = vadd.xlane.f32.xlu0 %v2306_v1 }
 0xdab   :  { %v6855_v7 = vpop.f32.mrf.mxu1  ;;  %3682 = vmatpush.bf16.msra.mxu2 %v6674_v26 }
 0xdaf   :  { %3683 = vmatpush.bf16.msra.mxu2 %v6679_v36 }
 0xdb3   :  { %v3503_v62 = vpop.f32.mrf.mxu1  ;;  %3684 = vmatpush.bf16.msra.mxu2 %v6687_v18 }
 0xdb7   :  { %3685 = vmatpush.bf16.msra.mxu2 %v6694_v11 }
 0xdbb   :  { %3686 = vmatpush.bf16.msra.mxu2 %v6701_v15 }
 0xdbf   :  { %3687 = vmatpush.bf16.msra.mxu2 %v6708_v23 }
 0xdc3   :  { %3688 = vmatpush.bf16.msra.mxu2 %v6715_v54 }
 0xe1b   :  { %v2308_v13 = vpop.xlane.xlu0 %2307 }
 0xe1c   :  { %5582 = vrcp.f32 %v2308_v13 }
 0xe22   :  { %v5583_v0 = vpop.eup %5582 }
 0xe23   :  { %v2312_v21 = vperm.slane %v5583_v0, 1  ;;  %v2311_v4 = vperm.slane %v5583_v0, 0 }
 0xe25   :  { %v2316_v32 = vmul.f32 %v5581_v20, %v2312_v21  ;;  %v2315_v26 = vmul.f32 %v5579_v16, %v2311_v4 }
 0xe27   :  { %2324 = vperm.xlu2 %5519, %v2316_v32   ;;  %2319 = vperm.xlu1 %5518, %v2315_v26  }
 0xe29   :  { %v3349_v36 = vpop.f32.mrf.mxu2 }
 0xe2a   :  { %v3354_v18 = vadd.f32 %v3349_v36, %v6618_v25 }
 0xe2c   :  { %v3358_v40 = vmul.f32 1.442695, %v3354_v18  ;;  %vm3356_vm10 = vcmp.gt.f32.partialorder %v3354_v18, 0.0 }
 0xe2e   :  { %5584 = vpow2.f32 %v3358_v40 }
 0xe31   :  { %v3351_v11 = vpop.f32.mrf.mxu2 }
 0xe32   :  { %v3355_v15 = vadd.f32 %v3351_v11, %v6623_v35 }
 0xe34   :  { %v3360_v23 = vmul.f32 1.442695, %v3355_v15  ;;  %v5585_v54 = vpop.eup %5584  ;;  %vm3357_vm11 = vcmp.gt.f32.partialorder %v3355_v15, 0.0 }
 0xe35   :  { %v5051_v5 = vadd.f32 -1.0, %v5585_v54 }
 0xe36   :  { %5586 = vpow2.f32 %v3360_v23 }
 0xe37   :  { %v3364_v44 = vsel %vm3356_vm10, %v3354_v18, %v5051_v5 }
 0xe3c   :  { %v5587_v22 = vpop.eup %5586 }
 0xe3d   :  { %v5052_v42 = vadd.f32 -1.0, %v5587_v22 }
 0xe3f   :  { %v3365_v41 = vsel %vm3357_vm11, %v3355_v15, %v5052_v42 }
 0xe40   :  { %v3366_v28 = vpack.c.bf16 %v3365_v41, %v3364_v44 }
 0xe42   :  { %3375 = vmatmul.bf16.vlgmr.msra.gmra.mxu3 %v3366_v28 }
 0xe81   :  { %v2325_v10 = vpop.permute.xlu2 %2324 }
 0xe82   :  { %v2328_v45 = vmul.f32 %v6869_v58, %v2325_v10 }
 0xe84   :  { %v2335_v17 = vrot.slane %v2328_v45, 4 }
 0xe86   :  { %v2336_v16 = vadd.f32 %v2335_v17, %v2328_v45 }
 0xe88   :  { %v2337_v47 = vrot.slane %v2336_v16, 2 }
 0xe8a   :  { %v2338_v12 = vadd.f32 %v2337_v47, %v2336_v16 }
 0xe8c   :  { %v2339_v57 = vrot.slane %v2338_v12, 1 }
 0xe8e   :  { %v2340_v50 = vadd.f32 %v2339_v57, %v2338_v12 }
 0xe99   :  { %v2320_v46 = vpop.permute.xlu1 %2319 }
 0xe9a   :  { %v2327_v8 = vmul.f32 %v6866_v52, %v2320_v46 }
 0xe9c   :  { %v2329_v9 = vrot.slane %v2327_v8, 4 }
 0xe9e   :  { %v2330_v24 = vadd.f32 %v2329_v9, %v2327_v8 }
 0xea0   :  { %v2331_v14 = vrot.slane %v2330_v24, 2 }
 0xea2   :  { %v2332_v20 = vadd.f32 %v2331_v14, %v2330_v24 }
 0xea4   :  { %v2333_v49 = vrot.slane %v2332_v20, 1 }
 0xea6   :  { %v2334_v29 = vadd.f32 %v2333_v49, %v2332_v20 }
 0xec5   :  { %v3376_v55 = vpop.f32.mrf.mxu3 }
 0xec6   :  { %v3381_v63 = vadd.f32 %v6646_v39, %v3376_v55 }
 0xec8   :  { %v3383_v43 = vmul.f32 %v3381_v63, %v2334_v29 }
 0xeca   :  { %v3387_v37 = vmul.f32 1.442695, %v3383_v43  ;;  %vm3385_vm12 = vcmp.gt.f32.partialorder %v3383_v43, 0.0 }
 0xecc   :  { %5588 = vpow2.f32 %v3387_v37 }
 0xecd   :  { %v3378_v30 = vpop.f32.mrf.mxu3 }
 0xece   :  { %v3382_v19 = vadd.f32 %v6646_v39, %v3378_v30 }
 0xed0   :  { %v3384_v56 = vmul.f32 %v3382_v19, %v2340_v50 }
 0xed2   :  { %v5589_v34 = vpop.eup %5588  ;;  %v3389_v1 = vmul.f32 1.442695, %v3384_v56  ;;  %vm3386_vm13 = vcmp.gt.f32.partialorder %v3384_v56, 0.0 }
 0xed3   :  { %v5053_v62 = vadd.f32 -1.0, %v5589_v34 }
 0xed4   :  { %5590 = vpow2.f32 %v3389_v1 }
 0xed5   :  { %v3393_v13 = vsel %vm3385_vm12, %v3383_v43, %v5053_v62 }
 0xed6   :  { %v3395_v0 = vmul.f32 %v6651_v61, %v3393_v13 }
 0xed8   :  { %3397 = vadd.xlane.f32.xlu1 %v3395_v0 }
 0xeda   :  { %v5591_v21 = vpop.eup %5590 }
 0xedb   :  { %v5054_v4 = vadd.f32 -1.0, %v5591_v21 }
 0xedd   :  { %v3394_v32 = vsel %vm3386_vm13, %v3384_v56, %v5054_v4 }
 0xede   :  { %v3396_v26 = vmul.f32 %v6651_v61, %v3394_v32 }
 0xee0   :  { %3399 = vadd.xlane.f32.xlu2 %v3396_v26 }
 0xf4b   :  { %v3398_v36 = vpop.xlane.xlu1 %3397 }
 0xf4c   :  { %v3401_v39 = vadd.f32 %v3398_v36, %v6656_v60 }
 0xf4e   :  { %v3405_v11 = vperm.slane %v3401_v39, %v6582_v53 }
 0xf53   :  { %v3400_v18 = vpop.xlane.xlu2 %3399 }
 0xf54   :  { %v3402_v40 = vadd.f32 %v3400_v18, %v6656_v60 }
 0xf56   :  { %v3406_v15 = vperm.slane %v3402_v40, %v6582_v53 }
 0xf58   :  { %v3407_v23 = vsel %vm2114_vm0, %v3406_v15, %v3405_v11 }
 0xf59   :  { %v3409_v54 = vsel %vm2117_vm1, %v3407_v23, -inf }
 0xf5a   :  { %3410 = vmax.xlane.f32.xlu0 %v3409_v54 }
 0xfcd   :  { %v3411_v5 = vpop.xlane.xlu0 %3410 }
 0xfce   :  { %v3413_v22 = vperm.slane %v3411_v5, 0  ;;  %v3414_v42 = vperm.slane %v3411_v5, 1 }
 0xfd0   :  { %v3417_v61 = vsub.f32 %v3401_v39, %v3413_v22  ;;  %v3418_v44 = vsub.f32 %v3402_v40, %v3414_v42 }
 0xfd2   :  { %v3419_v41 = vmul.f32 1.442695, %v3417_v61  ;;  %v3421_v28 = vmul.f32 1.442695, %v3418_v44 }
 0xfd4   :  { %5592 = vpow2.f32 %v3419_v41 }
 0xfd5   :  { %5594 = vpow2.f32 %v3421_v28 }
 0xfda   :  { %v5593_v46 = vpop.eup %5592 }
 0xfdb   :  { %v5595_v8 = vpop.eup %5594  ;;  %3426 = vperm.xlu0 %5520, %v5593_v46  }
 0xfdc   :  { %3429 = vperm.xlu2 %5519, %v5595_v8  }
0x1005   :  { %2351 = vadd.xlane.f32.xlu2 %v6547_v27 }
0x1036   :  { %v3430_v9 = vpop.permute.xlu2 %3429 }
0x1037   :  { %v3432_v45 = vperm.slane %v3430_v9, %v6582_v53 }
0x104d   :  { %v3427_v10 = vpop.permute.xlu0 %3426 }
0x104e   :  { %v3431_v24 = vperm.slane %v3427_v10, %v6582_v53 }
0x1050   :  { %v3433_v17 = vsel %vm2114_vm0, %v3432_v45, %v3431_v24 }
0x1051   :  { %v3435_v14 = vsel %vm2117_vm1, %v3433_v17, 0.0 }
0x1052   :  { %3436 = vadd.xlane.f32.xlu1 %v3435_v14 }
0x1078   :  { %v2352_v18 = vpop.xlane.xlu2 %2351 }
0x1079   :  { %v2354_v40 = vadd.f32 %v2352_v18, %v6578_v48 }
0x107b   :  { %v2358_v23 = vperm.slane %v2354_v40, %v6582_v53 }
0x10c5   :  { %v3437_v16 = vpop.xlane.xlu1 %3436 }
0x10c6   :  { %5596 = vrcp.f32 %v3437_v16 }
0x10cc   :  { %v5597_v20 = vpop.eup %5596 }
0x10cd   :  { %v3441_v47 = vperm.slane %v5597_v20, 1  ;;  %v3440_v49 = vperm.slane %v5597_v20, 0 }
0x10cf   :  { %v3445_v55 = vmul.f32 %v5595_v8, %v3441_v47  ;;  %v3444_v12 = vmul.f32 %v5593_v46, %v3440_v49 }
0x10d1   :  { %3453 = vperm.xlu1 %5518, %v3445_v55   ;;  %3448 = vperm.xlu0 %5520, %v3444_v12  }
0x10fb   :  { %2349 = vadd.xlane.f32.xlu0 %v6544_v51 }
0x1143   :  { %v3454_v27 = vpop.permute.xlu1 %3453  ;;  %v3449_v29 = vpop.permute.xlu0 %3448 }
0x1144   :  { %v3457_v63 = vmul.f32 %v3454_v27, %v6501_v3  ;;  %v3456_v43 = vmul.f32 %v3449_v29, %v6503_v2 }
0x1146   :  { %v3464_v37 = vrot.slane %v3457_v63, 4  ;;  %v3458_v57 = vrot.slane %v3456_v43, 4 }
0x1148   :  { %v3465_v30 = vadd.f32 %v3464_v37, %v3457_v63  ;;  %v3459_v50 = vadd.f32 %v3458_v57, %v3456_v43 }
0x114a   :  { %v3466_v19 = vrot.slane %v3465_v30, 2  ;;  %v3460_v56 = vrot.slane %v3459_v50, 2 }
0x114c   :  { %v3467_v34 = vadd.f32 %v3466_v19, %v3465_v30  ;;  %v3461_v1 = vadd.f32 %v3460_v56, %v3459_v50 }
0x114e   :  { %v3468_v62 = vrot.slane %v3467_v34, 1  ;;  %v3462_v13 = vrot.slane %v3461_v1, 1 }
0x1150   :  { %v3469_v0 = vadd.f32 %v3468_v62, %v3467_v34  ;;  %v3463_v21 = vadd.f32 %v3462_v13, %v3461_v1 }
0x1152   :  { %v3471_v4 = vpack.c.bf16 %v3469_v0, %v3469_v0  ;;  %v3470_v51 = vpack.c.bf16 %v3463_v21, %v3463_v21 }
0x1154   :  { %v3475_v32 = vunpack.c.l.b16 %v3471_v4  ;;  %v3474_v26 = vunpack.c.l.b16 %v3470_v51 }
0x1156   :  { %v3476_v36 = vsel %vm2114_vm0, %v3475_v32, %v3474_v26 }
0x1157   :  { %v3477_v39 = vpack.c.b16 %v3476_v36, %v3476_v36 }
0x1159   :  { %3487 = vmatmul.bf16.vlgmr.msrb.gmra.mxu0 %v3477_v39 }
0x116e   :  { %v2350_v11 = vpop.xlane.xlu0 %2349 }
0x116f   :  { %v2353_v15 = vadd.f32 %v2350_v11, %v6578_v48 }
0x1171   :  { %v2357_v54 = vperm.slane %v2353_v15, %v6582_v53 }
0x1173   :  { %v2359_v5 = vsel %vm2114_vm0, %v2358_v23, %v2357_v54 }
0x1174   :  { %v2361_v22 = vsel %vm2117_vm1, %v2359_v5, -inf }
0x1175   :  { %2362 = vmax.xlane.f32.xlu1 %v2361_v22 }
0x11d6   :  { %v3488_v42 = vpop.f32.mrf.mxu0 }
0x11d7   :  { %v3502_v61 = vadd.f32 %v6855_v7, %v3488_v42 }
0x11d9   :  { %v3505_v44 = vadd.f32 %v6769_v38, %v3502_v61 }
0x11db   :  { %v3506_v41 = vpack.c.bf16 %v3505_v44, %v3505_v44 }
0x11dd   :  { %3515 = vmatmul.bf16.vlgmr.msrb.gmra.mxu2 %v3506_v41 }
0x11de   :  { %v3490_v28 = vpop.f32.mrf.mxu0 }
0x11e8   :  { %v2363_v46 = vpop.xlane.xlu1 %2362 }
0x11e9   :  { %v2365_v8 = vperm.slane %v2363_v46, 0  ;;  %v2366_v48 = vperm.slane %v2363_v46, 1 }
0x11eb   :  { %v2369_v9 = vsub.f32 %v2353_v15, %v2365_v8  ;;  %v2370_v10 = vsub.f32 %v2354_v40, %v2366_v48 }
0x11ed   :  { %v2371_v45 = vmul.f32 1.442695, %v2369_v9  ;;  %v2373_v24 = vmul.f32 1.442695, %v2370_v10  ;;  %3689 = vmatmul.bf16.vlgmr.msra.gmra.mxu2 %v3506_v41  ;;  %v5639_v9 = vld [vmem:[%s6967_s18] ss:$0 sm:$0xff] }
0x11ef   :  { %5598 = vpow2.f32 %v2371_v45 }
0x11f0   :  { %5600 = vpow2.f32 %v2373_v24 }
0x11f5   :  { %v5599_v17 = vpop.eup %5598 }
0x11f6   :  { %v5601_v14 = vpop.eup %5600  ;;  %2378 = vperm.xlu0 %5520, %v5599_v17  }
0x11f7   :  { %2381 = vperm.xlu2 %5519, %v5601_v14  }
0x1251   :  { %v2382_v49 = vpop.permute.xlu2 %2381 }
0x1252   :  { %v2384_v63 = vperm.slane %v2382_v49, %v6582_v53  ;;  %v5640_v49 = vld [vmem:[%s6968_s19] ss:$0 sm:$0xff] }
0x1260   :  { %v3516_v7 = vpop.f32.mrf.mxu2 }
0x1261   :  { %v3517_v38 = vadd.f32 %v6845_v6, %v3516_v7 }
0x1263   :  { %v3521_v16 = vrot.slane %v3517_v38, 1  ;;  %v3522_v20 = vperm.slane %v3517_v38, 0 }
0x1265   :  { %v3523_v47 = vperm.slane %v3521_v16, 0  ;;  %v3526_v55 = vmul.f32 %v3522_v20, %v6566_v31 }
0x1267   :  { %v3527_v12 = vmul.f32 %v3523_v47, %v6568_v33 }
0x1268   :  { %v3518_v27 = vpop.f32.mrf.mxu2  ;;  %v2379_v29 = vpop.permute.xlu0 %2378 }
0x1269   :  { %v3528_v43 = vpack.c.bf16 %v3527_v12, %v3526_v55  ;;  %v2383_v37 = vperm.slane %v2379_v29, %v6582_v53 }
0x126b   :  { %3537 = vmatmul.bf16.vlgmr.msrb.gmra.mxu3 %v3528_v43  ;;  %v2385_v57 = vsel %vm2114_vm0, %v2384_v63, %v2383_v37 }
0x126c   :  { %v2387_v6 = vsel %vm2117_vm1, %v2385_v57, 0.0 }
0x126d   :  { %2388 = vadd.xlane.f32.xlu0 %v2387_v6 }
0x1270   :  { %v6906_v30 = vpop.f32.mrf.mxu2 }
0x1278   :  { %v3692_v50 = vpop.f32.mrf.mxu2 }
0x12e0   :  { %v2389_v19 = vpop.xlane.xlu0 %2388 }
0x12e1   :  { %5602 = vrcp.f32 %v2389_v19 }
0x12e7   :  { %v5603_v31 = vpop.eup %5602 }
0x12e8   :  { %v2393_v33 = vperm.slane %v5603_v31, 1  ;;  %v2392_v56 = vperm.slane %v5603_v31, 0 }
0x12ea   :  { %v2397_v34 = vmul.f32 %v5601_v14, %v2393_v33  ;;  %v2396_v1 = vmul.f32 %v5599_v17, %v2392_v56 }
0x12ec   :  { %2405 = vperm.xlu2 %5519, %v2397_v34   ;;  %2400 = vperm.xlu1 %5518, %v2396_v1  }
0x12ee   :  { %v3538_v62 = vpop.f32.mrf.mxu3 }
0x12ef   :  { %v3543_v13 = vadd.f32 %v3538_v62, %v6618_v25 }
0x12f1   :  { %v3547_v0 = vmul.f32 1.442695, %v3543_v13  ;;  %vm3545_vm14 = vcmp.gt.f32.partialorder %v3543_v13, 0.0 }
0x12f3   :  { %5604 = vpow2.f32 %v3547_v0 }
0x12f6   :  { %v3540_v21 = vpop.f32.mrf.mxu3 }
0x12f7   :  { %v3544_v4 = vadd.f32 %v3540_v21, %v6623_v35 }
0x12f9   :  { %v3549_v51 = vmul.f32 1.442695, %v3544_v4  ;;  %v5605_v32 = vpop.eup %5604  ;;  %vm3546_vm15 = vcmp.gt.f32.partialorder %v3544_v4, 0.0 }
0x12fa   :  { %v5055_v26 = vadd.f32 -1.0, %v5605_v32 }
0x12fb   :  { %5606 = vpow2.f32 %v3549_v51 }
0x12fc   :  { %v3553_v18 = vsel %vm3545_vm14, %v3543_v13, %v5055_v26 }
0x1301   :  { %v5607_v36 = vpop.eup %5606 }
0x1302   :  { %v5056_v39 = vadd.f32 -1.0, %v5607_v36 }
0x1304   :  { %v3554_v40 = vsel %vm3546_vm15, %v3544_v4, %v5056_v39 }
0x1305   :  { %v3555_v11 = vpack.c.bf16 %v3554_v40, %v3553_v18 }
0x1307   :  { %3564 = vmatmul.bf16.vlgmr.msra.gmra.mxu0 %v3555_v11 }
0x1346   :  { %v2406_v54 = vpop.permute.xlu2 %2405 }
0x1347   :  { %v2409_v35 = vmul.f32 %v6869_v58, %v2406_v54 }
0x1349   :  { %v2416_v22 = vrot.slane %v2409_v35, 4 }
0x134b   :  { %v2417_v61 = vadd.f32 %v2416_v22, %v2409_v35  ;;  %v5435_v35 = vld [vmem:[#allocation24 + $0x38] sm:$0xff]  ;;  %v5433_v22 = vld [vmem:[#allocation24 + $0x28] sm:$0xff] }
0x134c   :  { %3763 = vmatpush.bf16.msra.mxu3 %v5435_v35  ;;  %v5455_v35 = vld [vmem:[#allocation28 + $0x18] sm:$0xff] }
0x134d   :  { %v2418_v41 = vrot.slane %v2417_v61, 2 }
0x134f   :  { %v2419_v8 = vadd.f32 %v2418_v41, %v2417_v61  ;;  %v5430_v61 = vld [vmem:[#allocation24 + $0x10] sm:$0xff]  ;;  %v5428_v41 = vld [vmem:[#allocation24] sm:$0xff] }
0x135e   :  { %v2401_v15 = vpop.permute.xlu1 %2400 }
0x135f   :  { %v2408_v25 = vmul.f32 %v6866_v52, %v2401_v15  ;;  %v2420_v52 = vrot.slane %v2419_v8, 1 }
0x1361   :  { %v2410_v23 = vrot.slane %v2408_v25, 4  ;;  %v2421_v14 = vadd.f32 %v2420_v52, %v2419_v8  ;;  %v5449_v52 = vld [vmem:[#allocation27 + $0x28] sm:$0xff] }
0x1363   :  { %v2411_v5 = vadd.f32 %v2410_v23, %v2408_v25 }
0x1365   :  { %v2412_v42 = vrot.slane %v2411_v5, 2 }
0x1367   :  { %v2413_v44 = vadd.f32 %v2412_v42, %v2411_v5  ;;  %v5434_v5 = vld [vmem:[#allocation24 + $0x30] sm:$0xff]  ;;  %v5431_v42 = vld [vmem:[#allocation24 + $0x18] sm:$0xff] }
0x1368   :  { %3764 = vmatpush.bf16.msra.mxu3 %v5434_v5  ;;  %v5454_v5 = vld [vmem:[#allocation28 + $0x10] sm:$0xff] }
0x1369   :  { %v2414_v28 = vrot.slane %v2413_v44, 1 }
0x136b   :  { %v2415_v48 = vadd.f32 %v2414_v28, %v2413_v44  ;;  %v5429_v44 = vld [vmem:[#allocation24 + $0x8] sm:$0xff] }
0x136c   :  { %3765 = vmatpush.bf16.msra.mxu3 %v5433_v22  ;;  %v5453_v22 = vld [vmem:[#allocation28 + $0x8] sm:$0xff] }
0x1384   :  { %v3565_v46 = vpop.f32.mrf.mxu0 }
0x1385   :  { %v3570_v10 = vadd.f32 %v5639_v9, %v3565_v46 }
0x1387   :  { %v3572_v45 = vmul.f32 %v3570_v10, %v2415_v48  ;;  %v5451_v48 = vld [vmem:[#allocation27 + $0x38] sm:$0xff]  ;;  %v5450_v10 = vld [vmem:[#allocation27 + $0x30] sm:$0xff] }
0x1388   :  { %3858 = vmatpush.bf16.msrb.mxu0 %v5451_v48 }
0x1389   :  { %v3576_v24 = vmul.f32 1.442695, %v3572_v45  ;;  %vm3574_vm2 = vcmp.gt.f32.partialorder %v3572_v45, 0.0 }
0x138b   :  { %5608 = vpow2.f32 %v3576_v24  ;;  %v5442_v24 = vld [vmem:[#allocation25 + $0x30] sm:$0xff] }
0x138c   :  { %v3567_v17 = vpop.f32.mrf.mxu0  ;;  %3859 = vmatpush.bf16.msrb.mxu0 %v5450_v10  ;;  %v5535_v10 = vld [vmem:[%s6289_s9] ss:$0 sm:$0xff] }
0x138d   :  { %v3571_v58 = vadd.f32 %v5639_v9, %v3567_v17  ;;  %v5443_v9 = vld [vmem:[#allocation25 + $0x38] sm:$0xff] }
0x138e   :  { %3919 = vmatpush.bf16.msrb.mxu1 %v5443_v9 }
0x138f   :  { %v3573_v7 = vmul.f32 %v3571_v58, %v2421_v14  ;;  %v5441_v14 = vld [vmem:[#allocation25 + $0x28] sm:$0xff] }
0x1390   :  { %3860 = vmatpush.bf16.msrb.mxu0 %v5449_v52 }
0x1391   :  { %v5609_v38 = vpop.eup %5608  ;;  %v3578_v16 = vmul.f32 1.442695, %v3573_v7  ;;  %vm3575_vm3 = vcmp.gt.f32.partialorder %v3573_v7, 0.0 }
0x1392   :  { %v5057_v20 = vadd.f32 -1.0, %v5609_v38  ;;  %3920 = vmatpush.bf16.msrb.mxu1 %v5442_v24 }
0x1393   :  { %5610 = vpow2.f32 %v3578_v16 }
0x1394   :  { %v3582_v47 = vsel %vm3574_vm2, %v3572_v45, %v5057_v20  ;;  %v5447_v20 = vld [vmem:[#allocation27 + $0x18] sm:$0xff] }
0x1395   :  { %v3584_v55 = vmul.f32 %v5640_v49, %v3582_v47 }
0x1396   :  { %3921 = vmatpush.bf16.msrb.mxu1 %v5441_v14 }
0x1397   :  { %3586 = vadd.xlane.f32.xlu2 %v3584_v55  ;;  %v5439_v55 = vld [vmem:[#allocation25 + $0x18] sm:$0xff] }
0x1399   :  { %v5611_v12 = vpop.eup %5610 }
0x139a   :  { %v5058_v27 = vadd.f32 -1.0, %v5611_v12 }
0x139c   :  { %v3583_v29 = vsel %vm3575_vm3, %v3573_v7, %v5058_v27  ;;  %v5448_v7 = vld [vmem:[#allocation27 + $0x20] sm:$0xff]  ;;  %v5446_v27 = vld [vmem:[#allocation27 + $0x10] sm:$0xff] }
0x139d   :  { %v3585_v63 = vmul.f32 %v5640_v49, %v3583_v29  ;;  %3861 = vmatpush.bf16.msrb.mxu0 %v5448_v7 }
0x139f   :  { %3588 = vadd.xlane.f32.xlu1 %v3585_v63 }
0x13a1   :  { %3862 = vmatpush.bf16.msrb.mxu0 %v5447_v20 }
0x13a5   :  { %3863 = vmatpush.bf16.msrb.mxu0 %v5446_v27 }
0x140a   :  { %v3587_v43 = vpop.xlane.xlu2 %3586 }
0x140b   :  { %v3590_v37 = vadd.f32 %v3587_v43, %v6656_v60 }
0x140d   :  { %v3594_v50 = vperm.slane %v3590_v37, %v6582_v53 }
0x1412   :  { %v3589_v57 = vpop.xlane.xlu1 %3588 }
0x1413   :  { %v3591_v6 = vadd.f32 %v3589_v57, %v6656_v60 }
0x1415   :  { %v3595_v19 = vperm.slane %v3591_v6, %v6582_v53 }
0x1417   :  { %v3596_v31 = vsel %vm2114_vm0, %v3595_v19, %v3594_v50 }
0x1418   :  { %v3598_v33 = vsel %vm2117_vm1, %v3596_v31, -inf }
0x1419   :  { %3599 = vmax.xlane.f32.xlu0 %v3598_v33 }
0x148c   :  { %v3600_v56 = vpop.xlane.xlu0 %3599 }
0x148d   :  { %v3602_v34 = vperm.slane %v3600_v56, 0  ;;  %v3603_v1 = vperm.slane %v3600_v56, 1  ;;  %v5444_v56 = vld [vmem:[#allocation27] sm:$0xff] }
0x148f   :  { %v3606_v62 = vsub.f32 %v3590_v37, %v3602_v34  ;;  %v3607_v13 = vsub.f32 %v3591_v6, %v3603_v1  ;;  %v5445_v37 = vld [vmem:[#allocation27 + $0x8] sm:$0xff]  ;;  %v5438_v34 = vld [vmem:[#allocation25 + $0x10] sm:$0xff] }
0x1490   :  { %3864 = vmatpush.bf16.msrb.mxu0 %v5445_v37  ;;  %v5533_v1 = vld [vmem:[%s6970_s24] ss:$0 sm:$0xff] }
0x1491   :  { %v3608_v0 = vmul.f32 1.442695, %v3606_v62  ;;  %v3610_v21 = vmul.f32 1.442695, %v3607_v13 }
0x1493   :  { %5612 = vpow2.f32 %v3608_v0 }
0x1494   :  { %5614 = vpow2.f32 %v3610_v21  ;;  %3865 = vmatpush.bf16.msrb.mxu0 %v5444_v56  ;;  %v5437_v21 = vld [vmem:[#allocation25 + $0x8] sm:$0xff] }
0x1499   :  { %v5613_v4 = vpop.eup %5612 }
0x149a   :  { %v5615_v60 = vpop.eup %5614  ;;  %3615 = vperm.xlu0 %5520, %v5613_v4  }
0x149b   :  { %3618 = vperm.xlu2 %5519, %v5615_v60  }
0x14f5   :  { %v3619_v51 = vpop.permute.xlu2 %3618 }
0x14f6   :  { %v3621_v26 = vperm.slane %v3619_v51, %v6582_v53  ;;  %v5459_v51 = vld [vmem:[#allocation28 + $0x38] sm:$0xff] }
0x14f7   :  { %4011 = vmatpush.bf16.msrb.mxu2 %v5459_v51 }
0x150c   :  { %v3616_v32 = vpop.permute.xlu0 %3615 }
0x150d   :  { %v3620_v36 = vperm.slane %v3616_v32, %v6582_v53  ;;  %v5432_v53 = vld [vmem:[#allocation24 + $0x20] sm:$0xff] }
0x150e   :  { %3766 = vmatpush.bf16.msra.mxu3 %v5432_v53  ;;  %v5534_v53 = vld [vmem:[%s6971_s14] ss:$0 sm:$0xff] }
0x150f   :  { %v3622_v39 = vsel %vm2114_vm0, %v3621_v26, %v3620_v36  ;;  %v5641_v36 = vld [vmem:[%s6969_s23] ss:$0 sm:$0xff] }
0x1510   :  { %v3624_v18 = vsel %vm2117_vm1, %v3622_v39, 0.0 }
0x1511   :  { %3625 = vadd.xlane.f32.xlu0 %v3624_v18 }
0x1512   :  { %3767 = vmatpush.bf16.msra.mxu3 %v5431_v42 }
0x1516   :  { %3768 = vmatpush.bf16.msra.mxu3 %v5430_v61 }
0x151a   :  { %3769 = vmatpush.bf16.msra.mxu3 %v5429_v44 }
0x151e   :  { %3770 = vmatpush.bf16.msra.mxu3 %v5428_v41 }
0x1521   :  { %3771 = vmatmul.bf16.vlgmr.msra.gmra.mxu3 %v6432_v59 }
0x1584   :  { %v3626_v40 = vpop.xlane.xlu0 %3625 }
0x1585   :  { %5616 = vrcp.f32 %v3626_v40 }
0x158b   :  { %v5617_v11 = vpop.eup %5616 }
0x158c   :  { %v3630_v15 = vperm.slane %v5617_v11, 1  ;;  %v3629_v25 = vperm.slane %v5617_v11, 0  ;;  %v5458_v11 = vld [vmem:[#allocation28 + $0x30] sm:$0xff] }
0x158d   :  { %4012 = vmatpush.bf16.msrb.mxu2 %v5458_v11 }
0x158e   :  { %v3634_v23 = vmul.f32 %v5615_v60, %v3630_v15  ;;  %v3633_v54 = vmul.f32 %v5613_v4, %v3629_v25  ;;  %v5436_v60 = vld [vmem:[#allocation25] sm:$0xff]  ;;  %v5457_v15 = vld [vmem:[#allocation28 + $0x28] sm:$0xff] }
0x1590   :  { %3642 = vperm.xlu2 %5519, %v3634_v23   ;;  %3637 = vperm.xlu1 %5518, %v3633_v54   ;;  %v5456_v23 = vld [vmem:[#allocation28 + $0x20] sm:$0xff] }
0x1591   :  { %4013 = vmatpush.bf16.msrb.mxu2 %v5457_v15 }
0x1595   :  { %4014 = vmatpush.bf16.msrb.mxu2 %v5456_v23 }
0x1599   :  { %4015 = vmatpush.bf16.msrb.mxu2 %v5455_v35 }
0x159d   :  { %4016 = vmatpush.bf16.msrb.mxu2 %v5454_v5 }
0x15a1   :  { %4017 = vmatpush.bf16.msrb.mxu2 %v5453_v22 }
0x15a4   :  { %v3772_v62 = vpop.f32.mrf.mxu3 }
0x15a5   :  { %v3773_v13 = vadd.f32 %v5533_v1, %v3772_v62 }
0x15a7   :  { %v3809_v0 = vpack.c.bf16 %v3773_v13, %v3773_v13 }
0x15a9   :  { %3866 = vmatmul.bf16.vlgmr.msrb.gmra.mxu0 %v3809_v0 }
0x15ac   :  { %v3774_v4 = vpop.f32.mrf.mxu3 }
0x15ea   :  { %v3643_v28 = vpop.permute.xlu2 %3642 }
0x15eb   :  { %v3646_v46 = vmul.f32 %v3643_v28, %v6501_v3  ;;  %v5440_v3 = vld [vmem:[#allocation25 + $0x20] sm:$0xff] }
0x15ec   :  { %3922 = vmatpush.bf16.msrb.mxu1 %v5440_v3 }
0x15ed   :  { %v3653_v8 = vrot.slane %v3646_v46, 4 }
0x15ef   :  { %v3654_v45 = vadd.f32 %v3653_v8, %v3646_v46 }
0x15f0   :  { %3923 = vmatpush.bf16.msrb.mxu1 %v5439_v55 }
0x15f1   :  { %v3655_v17 = vrot.slane %v3654_v45, 2 }
0x15f3   :  { %v3656_v59 = vadd.f32 %v3655_v17, %v3654_v45 }
0x15f4   :  { %3924 = vmatpush.bf16.msrb.mxu1 %v5438_v34 }
0x15f5   :  { %v3657_v47 = vrot.slane %v3656_v59, 1 }
0x15f7   :  { %v3658_v29 = vadd.f32 %v3657_v47, %v3656_v59 }
0x15f8   :  { %3925 = vmatpush.bf16.msrb.mxu1 %v5437_v21 }
0x15fc   :  { %3926 = vmatpush.bf16.msrb.mxu1 %v5436_v60 }
0x1602   :  { %v3638_v58 = vpop.permute.xlu1 %3637 }
0x1603   :  { %v3645_v38 = vmul.f32 %v3638_v58, %v6503_v2  ;;  %v3660_v2 = vpack.c.bf16 %v3658_v29, %v3658_v29 }
0x1605   :  { %v3647_v16 = vrot.slane %v3645_v38, 4  ;;  %v3664_v50 = vunpack.c.l.b16 %v3660_v2 }
0x1607   :  { %v3648_v49 = vadd.f32 %v3647_v16, %v3645_v38 }
0x1609   :  { %v3649_v12 = vrot.slane %v3648_v49, 2 }
0x160b   :  { %v3650_v63 = vadd.f32 %v3649_v12, %v3648_v49 }
0x160d   :  { %v3651_v43 = vrot.slane %v3650_v63, 1 }
0x160f   :  { %v3652_v57 = vadd.f32 %v3651_v43, %v3650_v63 }
0x1611   :  { %v3659_v6 = vpack.c.bf16 %v3652_v57, %v3652_v57 }
0x1613   :  { %v3663_v19 = vunpack.c.l.b16 %v3659_v6 }
0x1615   :  { %v3665_v31 = vsel %vm2114_vm0, %v3664_v50, %v3663_v19 }
0x1616   :  { %v3666_v33 = vpack.c.b16 %v3665_v31, %v3665_v31 }
0x1618   :  { %3676 = vmatmul.bf16.vlgmr.msra.gmra.mxu1 %v3666_v33 }
0x1626   :  { %v3867_v25 = vpop.f32.mrf.mxu0 }
0x162e   :  { %v3869_v54 = vpop.f32.mrf.mxu0 }
0x1695   :  { %v3677_v32 = vpop.f32.mrf.mxu1 }
0x1696   :  { %v3691_v26 = vadd.f32 %v6906_v30, %v3677_v32  ;;  %v5452_v30 = vld [vmem:[#allocation28] sm:$0xff] }
0x1697   :  { %4018 = vmatpush.bf16.msrb.mxu2 %v5452_v30 }
0x1698   :  { %v3694_v39 = vadd.f32 %v5641_v36, %v3691_v26 }
0x169a   :  { %v3792_v18 = vpack.c.bf16 %v3694_v39, %v3694_v39 }
0x169c   :  { %3927 = vmatmul.bf16.vlgmr.msrb.gmra.mxu1 %v3792_v18 }
0x169d   :  { %v3679_v40 = vpop.f32.mrf.mxu1 }
0x1719   :  { %v3928_v42 = vpop.f32.mrf.mxu1 }
0x171a   :  { %v3929_v61 = vadd.f32 %v3928_v42, %v3867_v25 }
0x171c   :  { %v3936_v44 = vadd.f32 %v5534_v53, %v3929_v61 }
0x171e   :  { %v3938_v41 = vmul.f32 1.442695, %v3936_v44  ;;  %vm3937_vm0 = vcmp.gt.f32.partialorder %v3936_v44, 0.0 }
0x1720   :  { %5618 = vpow2.f32 %v3938_v41 }
0x1721   :  { %v3930_v28 = vpop.f32.mrf.mxu1 }
0x1726   :  { %v5619_v46 = vpop.eup %5618 }
0x1727   :  { %v5155_v8 = vadd.f32 -1.0, %v5619_v46 }
0x1729   :  { %v3941_v48 = vsel %vm3937_vm0, %v3936_v44, %v5155_v8 }
0x172a   :  { %v3958_v9 = vpack.c.bf16 %v3941_v48, %v3941_v48 }
0x172c   :  { %4019 = vmatmul.bf16.vlgmr.msrb.gmra.mxu2 %v3958_v9 }
0x17af   :  { %v4020_v45 = vpop.f32.mrf.mxu2 }
0x17b0   :  { %v4021_v24 = vadd.f32 %v5535_v10, %v4020_v45 }
0x17b2   :  { %4024 = vst [vmem:[#allocation30] sm:$0x3] %v4021_v24 }
0x17b3   :  { %6049 = shalt.err (!%p6046_p0)
}
0x17b4   :  { %4035 = dma.vmem_to_hbm [thread:$0]  %s4031_s12, 32, %s4033_s26, [#allocation6]  }
0x17b7   :  { %v4022_v52 = vpop.f32.mrf.mxu2 }
0x17b8   :  { %6068 = dma.done.wait [#allocation6], 32  }
0x17b9   :  { %6069 = vsyncadd [#allocation6], 4294967264 }
0x17ba   :  { %4040 = vsyncpa [#allocation5], 1 }
0x17bb   :  { %4041 = vsyncpa [#allocation8], 1 }
0x17bc   :  { %4042 = vsyncpa [#allocation11], 1 }
0x17bd   :  { %4043 = vsyncpa [#allocation14], 1 }
0x17be   :  { %4044 = vsyncpa [#allocation17], 1 }
0x17bf   :  { %4045 = vsyncpa [#allocation20], 1 }
0x17c0   :  { %4046 = vsyncpa [#allocation23], 1 }
0x17c1   :  { %4047 = vsyncpa [#allocation26], 1 }
0x17c2   :  { %4048 = vsyncpa [#allocation29], 1 }
0x17c3   :  { %4049 = vsyncpa [#allocation6], 1 }

</bundles_post_ra>
